<compile_context>
chip_gen: v5e
topology: v5e:2x2
jax: 0.10.0
libtpu: 0.0.40
codegen_flags: <defaults>
</compile_context>

<pallas_src>
import jax
import jax.numpy as jnp
from jax import lax
from jax.experimental import pallas as pl
from jax.experimental.pallas import tpu as pltpu


def basic_block_forward(x, params, eps=1e-5):
    """x: (N, C, T, H, W) float32 (PyTorch NCDHW). Returns same shape."""
    (w1, g1, be1, m1, v1, w2, g2, be2, m2, v2) = params
    N, Cin, T, H, W = x.shape
    Cout = w1.shape[0]
    assert Cin == Cout, "downsample=None path requires inplanes == planes"
    C = Cin
    NT = N * T
    Hp, Wp = H + 2, W + 2
    PPIX = Hp * Wp                               # padded pixels per frame
    PPF = ((PPIX + 127) // 128) * 128            # lane-aligned per-frame stride

    # Frames per grid step: keep >= 4 grid steps when possible so each v7x
    # TensorCore gets >= 2 steps of pipeline overlap (harmless on v5e/v6e).
    F = 1
    for cand in (8, 4, 2):
        if NT % cand == 0 and NT // cand >= 4:
            F = cand
            break
    grid = (NT // F,)
    P = F * PPF                                  # lanes per block

    # ---- wrapper layout glue: channels on sublanes, padded pixels on lanes ----
    xc = jnp.transpose(x, (1, 0, 2, 3, 4)).reshape(C, NT, H, W)
    xp = jnp.pad(xc, ((0, 0), (0, 0), (1, 1), (1, 1)))            # (C, NT, Hp, Wp)
    xp = jnp.pad(xp.reshape(C, NT, PPIX),
                 ((0, 0), (0, 0), (0, PPF - PPIX)))               # (C, NT, PPF)
    x_lane = xp.reshape(C, NT * PPF)                              # f32

    # Folded eval-mode BN: y = conv * s + b.
    inv1 = g1 / jnp.sqrt(v1 + eps)
    inv2 = g2 / jnp.sqrt(v2 + eps)
    s1 = inv1.reshape(Cout, 1)
    b1 = (be1 - m1 * inv1).reshape(Cout, 1)
    s2 = inv2.reshape(Cout, 1)
    b2 = (be2 - m2 * inv2).reshape(Cout, 1)

    # Weights as (tap, Cout, Cin) bf16, tap = kh*3 + kw (MXU-native operands).
    w1k = jnp.transpose(w1[:, :, 0], (2, 3, 0, 1)).reshape(9, Cout, Cin).astype(jnp.bfloat16)
    w2k = jnp.transpose(w2[:, :, 0], (2, 3, 0, 1)).reshape(9, Cout, Cin).astype(jnp.bfloat16)

    # 0/1 interior mask (per frame, tiled to block width). Multiplying h1 by it
    # realises conv2's "same" zero padding -> no halo scratch, no re-zeroing.
    q = jnp.arange(PPF, dtype=jnp.int32)
    hh, ww = q // Wp, q % Wp
    interior = (q < PPIX) & (hh >= 1) & (hh <= H) & (ww >= 1) & (ww <= W)
    mask = jnp.tile(interior.astype(jnp.float32), F).reshape(1, P)

    # ------------------------------- kernel -----------------------------------
    def conv3x3(src_f32, w_ref):
        """3x3 'same' conv over lane-flattened padded frames.

        Tap (kh, kw) is a static lane rotation of the whole block (valid for every
        interior pixel because each frame carries its own zero halo and PPF slack);
        each tap is one (Cout,Cin) x (Cin,P) MXU dot accumulated in f32 vregs.
        Halo / tail lanes compute garbage that is never read back.
        """
        acc = None
        for kh in range(3):
            for kw in range(3):
                off = (kh - 1) * Wp + (kw - 1)
                tap = src_f32 if off == 0 else pltpu.roll(
                    src_f32, shift=(-off) % P, axis=1)
                d = jnp.dot(w_ref[kh * 3 + kw], tap.astype(jnp.bfloat16),
                            preferred_element_type=jnp.float32)
                acc = d if acc is None else acc + d
        return acc

    def kernel(x_ref, w1_ref, w2_ref, s1_ref, b1_ref, s2_ref, b2_ref,
               mask_ref, o_ref):
        xf = x_ref[...]                                           # (C, P) f32
        # conv1 + bn1 + relu; mask zeroes halo/tail lanes = conv2's zero padding.
        h1 = jnp.maximum(conv3x3(xf, w1_ref) * s1_ref[...] + b1_ref[...], 0.0)
        h1 = h1 * mask_ref[...]
        # conv2 + bn2 + residual (exact f32 identity) + relu.
        y2 = conv3x3(h1, w2_ref) * s2_ref[...] + b2_ref[...] + xf
        o_ref[...] = jnp.maximum(y2, 0.0)                         # lane-dense store

    flops = 4 * 9 * Cin * Cout * NT * PPF                         # 2 convs * 2 flops/MAC
    bytes_accessed = (C * NT * PPF * 4                            # input (f32)
                      + Cout * NT * PPF * 4                       # output (f32)
                      + 2 * 9 * Cin * Cout * 2                    # bf16 weights
                      + 4 * Cout * 4                              # folded BN vectors
                      + F * PPF * 4)                              # interior mask

    vec_spec = pl.BlockSpec((Cout, 1), lambda i: (0, 0))
    w_spec = pl.BlockSpec((9, Cout, Cin), lambda i: (0, 0, 0))

    out_lane = pl.pallas_call(
        kernel,
        out_shape=jax.ShapeDtypeStruct((Cout, NT * PPF), jnp.float32),
        grid=grid,
        in_specs=[
            pl.BlockSpec((C, P), lambda i: (0, i)),
            w_spec, w_spec,
            vec_spec, vec_spec, vec_spec, vec_spec,
            pl.BlockSpec((1, P), lambda i: (0, 0)),
        ],
        out_specs=pl.BlockSpec((Cout, P), lambda i: (0, i)),
        compiler_params=pltpu.CompilerParams(
            dimension_semantics=("parallel",)),
        cost_estimate=pl.CostEstimate(
            flops=flops, transcendentals=0, bytes_accessed=bytes_accessed),
    )(x_lane, w1k, w2k, s1, b1, s2, b2, mask)

    # Undo layout: drop lane pad + spatial halo, back to NCDHW.
    y = out_lane.reshape(Cout, NT, PPF)[:, :, :PPIX].reshape(Cout, NT, Hp, Wp)
    y = y[:, :, 1:1 + H, 1:1 + W]
    return y.reshape(Cout, N, T, H, W).transpose(1, 0, 2, 3, 4)


def reference(x, params, eps=1e-5):
    """Pure-JAX reference matching the PyTorch forward (eval-mode BN)."""
    (w1, g1, be1, m1, v1, w2, g2, be2, m2, v2) = params
    dn = ('NCDHW', 'OIDHW', 'NCDHW')

    def conv(a, w):
        return lax.conv_general_dilated(a, w, (1, 1, 1),
                                        [(0, 0), (1, 1), (1, 1)],
                                        dimension_numbers=dn,
                                        precision=lax.Precision.HIGHEST)

    def bn(a, g, b, m, v):
        sh = (1, -1, 1, 1, 1)
        return (a - m.reshape(sh)) / jnp.sqrt(v + eps).reshape(sh) * \
            g.reshape(sh) + b.reshape(sh)

    y = jnp.maximum(bn(conv(x, w1), g1, be1, m1, v1), 0.0)
    y = bn(conv(y, w2), g2, be2, m2, v2)
    return jnp.maximum(y + x, 0.0)


if __name__ == "__main__":
    N, C, T, H, W = 2, 32, 4, 16, 16          # inplanes = planes = 32
    key = jax.random.PRNGKey(0)
    ks = jax.random.split(key, 12)

    x = jax.random.normal(ks[0], (N, C, T, H, W), jnp.float32)
    # Conv3d weights: (out, in, kt=1, kh=3, kw=3), bias=False
    w1 = jax.random.normal(ks[1], (C, C, 1, 3, 3), jnp.float32) * 0.05
    w2 = jax.random.normal(ks[2], (C, C, 1, 3, 3), jnp.float32) * 0.05
    # BatchNorm3d params (eval-mode running stats)
    g1 = 1.0 + 0.1 * jax.random.normal(ks[3], (C,), jnp.float32)
    be1 = 0.1 * jax.random.normal(ks[4], (C,), jnp.float32)
    m1 = 0.1 * jax.random.normal(ks[5], (C,), jnp.float32)
    v1 = 0.5 + 0.5 * jnp.abs(jax.random.normal(ks[6], (C,), jnp.float32))
    g2 = 1.0 + 0.1 * jax.random.normal(ks[7], (C,), jnp.float32)
    be2 = 0.1 * jax.random.normal(ks[8], (C,), jnp.float32)
    m2 = 0.1 * jax.random.normal(ks[9], (C,), jnp.float32)
    v2 = 0.5 + 0.5 * jnp.abs(jax.random.normal(ks[10], (C,), jnp.float32))

    params = (w1, g1, be1, m1, v1, w2, g2, be2, m2, v2)

    out = jax.block_until_ready(basic_block_forward(x, params))
    ref = jax.block_until_ready(reference(x, params))

    assert out.shape == x.shape
    # Tolerance reflects bf16 MXU operands with f32 accumulation (f32 epilogue).
    assert bool(jnp.allclose(out, ref, atol=5e-2, rtol=5e-2)), (
        f"mismatch, max abs err = {float(jnp.max(jnp.abs(out - ref)))}")
    print("KERNEL_OK")
</pallas_src>

<mosaic_0001>
module attributes {stable_mosaic.version = 11 : i64} {
  func.func @kernel(%arg0: i32, %arg1: memref<32x768xf32, #tpu.memory_space<vmem>>, %arg2: memref<9x32x32xbf16, #tpu.memory_space<vmem>>, %arg3: memref<9x32x32xbf16, #tpu.memory_space<vmem>>, %arg4: memref<32x1xf32, #tpu.memory_space<vmem>>, %arg5: memref<32x1xf32, #tpu.memory_space<vmem>>, %arg6: memref<32x1xf32, #tpu.memory_space<vmem>>, %arg7: memref<32x1xf32, #tpu.memory_space<vmem>>, %arg8: memref<1x768xf32, #tpu.memory_space<vmem>>, %arg9: memref<32x768xf32, #tpu.memory_space<vmem>>) attributes {dimension_semantics = [#tpu.dimension_semantics<parallel>], iteration_bounds = array<i64: 4>, scalar_prefetch = 0 : i64, scratch_operands = 0 : i64, tpu.core_type = #tpu.core_type<tc>, window_params = [{transform_indices = @transform_0, window_bounds = array<i64: 32, 768>}, {pipeline_mode = #tpu.pipeline_mode<synchronous>, transform_indices = @transform_1, window_bounds = array<i64: 9, 32, 32>}, {pipeline_mode = #tpu.pipeline_mode<synchronous>, transform_indices = @transform_2, window_bounds = array<i64: 9, 32, 32>}, {pipeline_mode = #tpu.pipeline_mode<synchronous>, transform_indices = @transform_3, window_bounds = array<i64: 32, 1>}, {pipeline_mode = #tpu.pipeline_mode<synchronous>, transform_indices = @transform_4, window_bounds = array<i64: 32, 1>}, {pipeline_mode = #tpu.pipeline_mode<synchronous>, transform_indices = @transform_5, window_bounds = array<i64: 32, 1>}, {pipeline_mode = #tpu.pipeline_mode<synchronous>, transform_indices = @transform_6, window_bounds = array<i64: 32, 1>}, {pipeline_mode = #tpu.pipeline_mode<synchronous>, transform_indices = @transform_7, window_bounds = array<i64: 1, 768>}, {transform_indices = @transform_8, window_bounds = array<i64: 32, 768>}]} {
    %c0 = arith.constant 0 : index
    %c0_0 = arith.constant 0 : index
    %0 = vector.load %arg1[%c0, %c0_0] : memref<32x768xf32, #tpu.memory_space<vmem>>, vector<32x768xf32>
    %c19_i32 = arith.constant 19 : i32
    %1 = tpu.dynamic_rotate %0 by %c19_i32 dim 1 : vector<32x768xf32>, i32 -> vector<32x768xf32>
    %c0_1 = arith.constant 0 : index
    %c0_2 = arith.constant 0 : index
    %c0_3 = arith.constant 0 : index
    %2 = vector.load %arg2[%c0_1, %c0_2, %c0_3] : memref<9x32x32xbf16, #tpu.memory_space<vmem>>, vector<1x32x32xbf16>
    %3 = vector.shape_cast %2 : vector<1x32x32xbf16> to vector<32x32xbf16>
    %4 = arith.truncf %1 : vector<32x768xf32> to vector<32x768xbf16>
    %cst = arith.constant dense<0.000000e+00> : vector<32x768xf32>
    %5 = tpu.matmul %3, %4, %cst {dimension_numbers = #tpu.dot_dimension_numbers<[1], [0], [0], [1], [0, 0, 1, 1], [], []>} : vector<32x32xbf16>, vector<32x768xbf16>, vector<32x768xf32> -> vector<32x768xf32>
    %c18_i32 = arith.constant 18 : i32
    %6 = tpu.dynamic_rotate %0 by %c18_i32 dim 1 : vector<32x768xf32>, i32 -> vector<32x768xf32>
    %c1 = arith.constant 1 : index
    %c0_4 = arith.constant 0 : index
    %c0_5 = arith.constant 0 : index
    %7 = vector.load %arg2[%c1, %c0_4, %c0_5] : memref<9x32x32xbf16, #tpu.memory_space<vmem>>, vector<1x32x32xbf16>
    %8 = vector.shape_cast %7 : vector<1x32x32xbf16> to vector<32x32xbf16>
    %9 = arith.truncf %6 : vector<32x768xf32> to vector<32x768xbf16>
    %cst_6 = arith.constant dense<0.000000e+00> : vector<32x768xf32>
    %10 = tpu.matmul %8, %9, %cst_6 {dimension_numbers = #tpu.dot_dimension_numbers<[1], [0], [0], [1], [0, 0, 1, 1], [], []>} : vector<32x32xbf16>, vector<32x768xbf16>, vector<32x768xf32> -> vector<32x768xf32>
    %11 = arith.addf %5, %10 : vector<32x768xf32>
    %c17_i32 = arith.constant 17 : i32
    %12 = tpu.dynamic_rotate %0 by %c17_i32 dim 1 : vector<32x768xf32>, i32 -> vector<32x768xf32>
    %c2 = arith.constant 2 : index
    %c0_7 = arith.constant 0 : index
    %c0_8 = arith.constant 0 : index
    %13 = vector.load %arg2[%c2, %c0_7, %c0_8] : memref<9x32x32xbf16, #tpu.memory_space<vmem>>, vector<1x32x32xbf16>
    %14 = vector.shape_cast %13 : vector<1x32x32xbf16> to vector<32x32xbf16>
    %15 = arith.truncf %12 : vector<32x768xf32> to vector<32x768xbf16>
    %cst_9 = arith.constant dense<0.000000e+00> : vector<32x768xf32>
    %16 = tpu.matmul %14, %15, %cst_9 {dimension_numbers = #tpu.dot_dimension_numbers<[1], [0], [0], [1], [0, 0, 1, 1], [], []>} : vector<32x32xbf16>, vector<32x768xbf16>, vector<32x768xf32> -> vector<32x768xf32>
    %17 = arith.addf %11, %16 : vector<32x768xf32>
    %c1_i32 = arith.constant 1 : i32
    %18 = tpu.dynamic_rotate %0 by %c1_i32 dim 1 : vector<32x768xf32>, i32 -> vector<32x768xf32>
    %c3 = arith.constant 3 : index
    %c0_10 = arith.constant 0 : index
    %c0_11 = arith.constant 0 : index
    %19 = vector.load %arg2[%c3, %c0_10, %c0_11] : memref<9x32x32xbf16, #tpu.memory_space<vmem>>, vector<1x32x32xbf16>
    %20 = vector.shape_cast %19 : vector<1x32x32xbf16> to vector<32x32xbf16>
    %21 = arith.truncf %18 : vector<32x768xf32> to vector<32x768xbf16>
    %cst_12 = arith.constant dense<0.000000e+00> : vector<32x768xf32>
    %22 = tpu.matmul %20, %21, %cst_12 {dimension_numbers = #tpu.dot_dimension_numbers<[1], [0], [0], [1], [0, 0, 1, 1], [], []>} : vector<32x32xbf16>, vector<32x768xbf16>, vector<32x768xf32> -> vector<32x768xf32>
    %23 = arith.addf %17, %22 : vector<32x768xf32>
    %c4 = arith.constant 4 : index
    %c0_13 = arith.constant 0 : index
    %c0_14 = arith.constant 0 : index
    %24 = vector.load %arg2[%c4, %c0_13, %c0_14] : memref<9x32x32xbf16, #tpu.memory_space<vmem>>, vector<1x32x32xbf16>
    %25 = vector.shape_cast %24 : vector<1x32x32xbf16> to vector<32x32xbf16>
    %26 = arith.truncf %0 : vector<32x768xf32> to vector<32x768xbf16>
    %cst_15 = arith.constant dense<0.000000e+00> : vector<32x768xf32>
    %27 = tpu.matmul %25, %26, %cst_15 {dimension_numbers = #tpu.dot_dimension_numbers<[1], [0], [0], [1], [0, 0, 1, 1], [], []>} : vector<32x32xbf16>, vector<32x768xbf16>, vector<32x768xf32> -> vector<32x768xf32>
    %28 = arith.addf %23, %27 : vector<32x768xf32>
    %c767_i32 = arith.constant 767 : i32
    %29 = tpu.dynamic_rotate %0 by %c767_i32 dim 1 : vector<32x768xf32>, i32 -> vector<32x768xf32>
    %c5 = arith.constant 5 : index
    %c0_16 = arith.constant 0 : index
    %c0_17 = arith.constant 0 : index
    %30 = vector.load %arg2[%c5, %c0_16, %c0_17] : memref<9x32x32xbf16, #tpu.memory_space<vmem>>, vector<1x32x32xbf16>
    %31 = vector.shape_cast %30 : vector<1x32x32xbf16> to vector<32x32xbf16>
    %32 = arith.truncf %29 : vector<32x768xf32> to vector<32x768xbf16>
    %cst_18 = arith.constant dense<0.000000e+00> : vector<32x768xf32>
    %33 = tpu.matmul %31, %32, %cst_18 {dimension_numbers = #tpu.dot_dimension_numbers<[1], [0], [0], [1], [0, 0, 1, 1], [], []>} : vector<32x32xbf16>, vector<32x768xbf16>, vector<32x768xf32> -> vector<32x768xf32>
    %34 = arith.addf %28, %33 : vector<32x768xf32>
    %c751_i32 = arith.constant 751 : i32
    %35 = tpu.dynamic_rotate %0 by %c751_i32 dim 1 : vector<32x768xf32>, i32 -> vector<32x768xf32>
    %c6 = arith.constant 6 : index
    %c0_19 = arith.constant 0 : index
    %c0_20 = arith.constant 0 : index
    %36 = vector.load %arg2[%c6, %c0_19, %c0_20] : memref<9x32x32xbf16, #tpu.memory_space<vmem>>, vector<1x32x32xbf16>
    %37 = vector.shape_cast %36 : vector<1x32x32xbf16> to vector<32x32xbf16>
    %38 = arith.truncf %35 : vector<32x768xf32> to vector<32x768xbf16>
    %cst_21 = arith.constant dense<0.000000e+00> : vector<32x768xf32>
    %39 = tpu.matmul %37, %38, %cst_21 {dimension_numbers = #tpu.dot_dimension_numbers<[1], [0], [0], [1], [0, 0, 1, 1], [], []>} : vector<32x32xbf16>, vector<32x768xbf16>, vector<32x768xf32> -> vector<32x768xf32>
    %40 = arith.addf %34, %39 : vector<32x768xf32>
    %c750_i32 = arith.constant 750 : i32
    %41 = tpu.dynamic_rotate %0 by %c750_i32 dim 1 : vector<32x768xf32>, i32 -> vector<32x768xf32>
    %c7 = arith.constant 7 : index
    %c0_22 = arith.constant 0 : index
    %c0_23 = arith.constant 0 : index
    %42 = vector.load %arg2[%c7, %c0_22, %c0_23] : memref<9x32x32xbf16, #tpu.memory_space<vmem>>, vector<1x32x32xbf16>
    %43 = vector.shape_cast %42 : vector<1x32x32xbf16> to vector<32x32xbf16>
    %44 = arith.truncf %41 : vector<32x768xf32> to vector<32x768xbf16>
    %cst_24 = arith.constant dense<0.000000e+00> : vector<32x768xf32>
    %45 = tpu.matmul %43, %44, %cst_24 {dimension_numbers = #tpu.dot_dimension_numbers<[1], [0], [0], [1], [0, 0, 1, 1], [], []>} : vector<32x32xbf16>, vector<32x768xbf16>, vector<32x768xf32> -> vector<32x768xf32>
    %46 = arith.addf %40, %45 : vector<32x768xf32>
    %c749_i32 = arith.constant 749 : i32
    %47 = tpu.dynamic_rotate %0 by %c749_i32 dim 1 : vector<32x768xf32>, i32 -> vector<32x768xf32>
    %c8 = arith.constant 8 : index
    %c0_25 = arith.constant 0 : index
    %c0_26 = arith.constant 0 : index
    %48 = vector.load %arg2[%c8, %c0_25, %c0_26] : memref<9x32x32xbf16, #tpu.memory_space<vmem>>, vector<1x32x32xbf16>
    %49 = vector.shape_cast %48 : vector<1x32x32xbf16> to vector<32x32xbf16>
    %50 = arith.truncf %47 : vector<32x768xf32> to vector<32x768xbf16>
    %cst_27 = arith.constant dense<0.000000e+00> : vector<32x768xf32>
    %51 = tpu.matmul %49, %50, %cst_27 {dimension_numbers = #tpu.dot_dimension_numbers<[1], [0], [0], [1], [0, 0, 1, 1], [], []>} : vector<32x32xbf16>, vector<32x768xbf16>, vector<32x768xf32> -> vector<32x768xf32>
    %52 = arith.addf %46, %51 : vector<32x768xf32>
    %c0_28 = arith.constant 0 : index
    %c0_29 = arith.constant 0 : index
    %53 = vector.load %arg4[%c0_28, %c0_29] : memref<32x1xf32, #tpu.memory_space<vmem>>, vector<32x1xf32>
    %54 = vector.broadcast %53 : vector<32x1xf32> to vector<32x768xf32>
    %55 = arith.mulf %52, %54 : vector<32x768xf32>
    %c0_30 = arith.constant 0 : index
    %c0_31 = arith.constant 0 : index
    %56 = vector.load %arg5[%c0_30, %c0_31] : memref<32x1xf32, #tpu.memory_space<vmem>>, vector<32x1xf32>
    %57 = vector.broadcast %56 : vector<32x1xf32> to vector<32x768xf32>
    %58 = arith.addf %55, %57 : vector<32x768xf32>
    %cst_32 = arith.constant 0.000000e+00 : f32
    %59 = vector.broadcast %cst_32 : f32 to vector<32x768xf32>
    %60 = arith.maximumf %58, %59 : vector<32x768xf32>
    %c0_33 = arith.constant 0 : index
    %c0_34 = arith.constant 0 : index
    %61 = vector.load %arg8[%c0_33, %c0_34] : memref<1x768xf32, #tpu.memory_space<vmem>>, vector<1x768xf32>
    %62 = vector.broadcast %61 : vector<1x768xf32> to vector<32x768xf32>
    %63 = arith.mulf %60, %62 : vector<32x768xf32>
    %c19_i32_35 = arith.constant 19 : i32
    %64 = tpu.dynamic_rotate %63 by %c19_i32_35 dim 1 : vector<32x768xf32>, i32 -> vector<32x768xf32>
    %c0_36 = arith.constant 0 : index
    %c0_37 = arith.constant 0 : index
    %c0_38 = arith.constant 0 : index
    %65 = vector.load %arg3[%c0_36, %c0_37, %c0_38] : memref<9x32x32xbf16, #tpu.memory_space<vmem>>, vector<1x32x32xbf16>
    %66 = vector.shape_cast %65 : vector<1x32x32xbf16> to vector<32x32xbf16>
    %67 = arith.truncf %64 : vector<32x768xf32> to vector<32x768xbf16>
    %cst_39 = arith.constant dense<0.000000e+00> : vector<32x768xf32>
    %68 = tpu.matmul %66, %67, %cst_39 {dimension_numbers = #tpu.dot_dimension_numbers<[1], [0], [0], [1], [0, 0, 1, 1], [], []>} : vector<32x32xbf16>, vector<32x768xbf16>, vector<32x768xf32> -> vector<32x768xf32>
    %c18_i32_40 = arith.constant 18 : i32
    %69 = tpu.dynamic_rotate %63 by %c18_i32_40 dim 1 : vector<32x768xf32>, i32 -> vector<32x768xf32>
    %c1_41 = arith.constant 1 : index
    %c0_42 = arith.constant 0 : index
    %c0_43 = arith.constant 0 : index
    %70 = vector.load %arg3[%c1_41, %c0_42, %c0_43] : memref<9x32x32xbf16, #tpu.memory_space<vmem>>, vector<1x32x32xbf16>
    %71 = vector.shape_cast %70 : vector<1x32x32xbf16> to vector<32x32xbf16>
    %72 = arith.truncf %69 : vector<32x768xf32> to vector<32x768xbf16>
    %cst_44 = arith.constant dense<0.000000e+00> : vector<32x768xf32>
    %73 = tpu.matmul %71, %72, %cst_44 {dimension_numbers = #tpu.dot_dimension_numbers<[1], [0], [0], [1], [0, 0, 1, 1], [], []>} : vector<32x32xbf16>, vector<32x768xbf16>, vector<32x768xf32> -> vector<32x768xf32>
    %74 = arith.addf %68, %73 : vector<32x768xf32>
    %c17_i32_45 = arith.constant 17 : i32
    %75 = tpu.dynamic_rotate %63 by %c17_i32_45 dim 1 : vector<32x768xf32>, i32 -> vector<32x768xf32>
    %c2_46 = arith.constant 2 : index
    %c0_47 = arith.constant 0 : index
    %c0_48 = arith.constant 0 : index
    %76 = vector.load %arg3[%c2_46, %c0_47, %c0_48] : memref<9x32x32xbf16, #tpu.memory_space<vmem>>, vector<1x32x32xbf16>
    %77 = vector.shape_cast %76 : vector<1x32x32xbf16> to vector<32x32xbf16>
    %78 = arith.truncf %75 : vector<32x768xf32> to vector<32x768xbf16>
    %cst_49 = arith.constant dense<0.000000e+00> : vector<32x768xf32>
    %79 = tpu.matmul %77, %78, %cst_49 {dimension_numbers = #tpu.dot_dimension_numbers<[1], [0], [0], [1], [0, 0, 1, 1], [], []>} : vector<32x32xbf16>, vector<32x768xbf16>, vector<32x768xf32> -> vector<32x768xf32>
    %80 = arith.addf %74, %79 : vector<32x768xf32>
    %c1_i32_50 = arith.constant 1 : i32
    %81 = tpu.dynamic_rotate %63 by %c1_i32_50 dim 1 : vector<32x768xf32>, i32 -> vector<32x768xf32>
    %c3_51 = arith.constant 3 : index
    %c0_52 = arith.constant 0 : index
    %c0_53 = arith.constant 0 : index
    %82 = vector.load %arg3[%c3_51, %c0_52, %c0_53] : memref<9x32x32xbf16, #tpu.memory_space<vmem>>, vector<1x32x32xbf16>
    %83 = vector.shape_cast %82 : vector<1x32x32xbf16> to vector<32x32xbf16>
    %84 = arith.truncf %81 : vector<32x768xf32> to vector<32x768xbf16>
    %cst_54 = arith.constant dense<0.000000e+00> : vector<32x768xf32>
    %85 = tpu.matmul %83, %84, %cst_54 {dimension_numbers = #tpu.dot_dimension_numbers<[1], [0], [0], [1], [0, 0, 1, 1], [], []>} : vector<32x32xbf16>, vector<32x768xbf16>, vector<32x768xf32> -> vector<32x768xf32>
    %86 = arith.addf %80, %85 : vector<32x768xf32>
    %c4_55 = arith.constant 4 : index
    %c0_56 = arith.constant 0 : index
    %c0_57 = arith.constant 0 : index
    %87 = vector.load %arg3[%c4_55, %c0_56, %c0_57] : memref<9x32x32xbf16, #tpu.memory_space<vmem>>, vector<1x32x32xbf16>
    %88 = vector.shape_cast %87 : vector<1x32x32xbf16> to vector<32x32xbf16>
    %89 = arith.truncf %63 : vector<32x768xf32> to vector<32x768xbf16>
    %cst_58 = arith.constant dense<0.000000e+00> : vector<32x768xf32>
    %90 = tpu.matmul %88, %89, %cst_58 {dimension_numbers = #tpu.dot_dimension_numbers<[1], [0], [0], [1], [0, 0, 1, 1], [], []>} : vector<32x32xbf16>, vector<32x768xbf16>, vector<32x768xf32> -> vector<32x768xf32>
    %91 = arith.addf %86, %90 : vector<32x768xf32>
    %c767_i32_59 = arith.constant 767 : i32
    %92 = tpu.dynamic_rotate %63 by %c767_i32_59 dim 1 : vector<32x768xf32>, i32 -> vector<32x768xf32>
    %c5_60 = arith.constant 5 : index
    %c0_61 = arith.constant 0 : index
    %c0_62 = arith.constant 0 : index
    %93 = vector.load %arg3[%c5_60, %c0_61, %c0_62] : memref<9x32x32xbf16, #tpu.memory_space<vmem>>, vector<1x32x32xbf16>
    %94 = vector.shape_cast %93 : vector<1x32x32xbf16> to vector<32x32xbf16>
    %95 = arith.truncf %92 : vector<32x768xf32> to vector<32x768xbf16>
    %cst_63 = arith.constant dense<0.000000e+00> : vector<32x768xf32>
    %96 = tpu.matmul %94, %95, %cst_63 {dimension_numbers = #tpu.dot_dimension_numbers<[1], [0], [0], [1], [0, 0, 1, 1], [], []>} : vector<32x32xbf16>, vector<32x768xbf16>, vector<32x768xf32> -> vector<32x768xf32>
    %97 = arith.addf %91, %96 : vector<32x768xf32>
    %c751_i32_64 = arith.constant 751 : i32
    %98 = tpu.dynamic_rotate %63 by %c751_i32_64 dim 1 : vector<32x768xf32>, i32 -> vector<32x768xf32>
    %c6_65 = arith.constant 6 : index
    %c0_66 = arith.constant 0 : index
    %c0_67 = arith.constant 0 : index
    %99 = vector.load %arg3[%c6_65, %c0_66, %c0_67] : memref<9x32x32xbf16, #tpu.memory_space<vmem>>, vector<1x32x32xbf16>
    %100 = vector.shape_cast %99 : vector<1x32x32xbf16> to vector<32x32xbf16>
    %101 = arith.truncf %98 : vector<32x768xf32> to vector<32x768xbf16>
    %cst_68 = arith.constant dense<0.000000e+00> : vector<32x768xf32>
    %102 = tpu.matmul %100, %101, %cst_68 {dimension_numbers = #tpu.dot_dimension_numbers<[1], [0], [0], [1], [0, 0, 1, 1], [], []>} : vector<32x32xbf16>, vector<32x768xbf16>, vector<32x768xf32> -> vector<32x768xf32>
    %103 = arith.addf %97, %102 : vector<32x768xf32>
    %c750_i32_69 = arith.constant 750 : i32
    %104 = tpu.dynamic_rotate %63 by %c750_i32_69 dim 1 : vector<32x768xf32>, i32 -> vector<32x768xf32>
    %c7_70 = arith.constant 7 : index
    %c0_71 = arith.constant 0 : index
    %c0_72 = arith.constant 0 : index
    %105 = vector.load %arg3[%c7_70, %c0_71, %c0_72] : memref<9x32x32xbf16, #tpu.memory_space<vmem>>, vector<1x32x32xbf16>
    %106 = vector.shape_cast %105 : vector<1x32x32xbf16> to vector<32x32xbf16>
    %107 = arith.truncf %104 : vector<32x768xf32> to vector<32x768xbf16>
    %cst_73 = arith.constant dense<0.000000e+00> : vector<32x768xf32>
    %108 = tpu.matmul %106, %107, %cst_73 {dimension_numbers = #tpu.dot_dimension_numbers<[1], [0], [0], [1], [0, 0, 1, 1], [], []>} : vector<32x32xbf16>, vector<32x768xbf16>, vector<32x768xf32> -> vector<32x768xf32>
    %109 = arith.addf %103, %108 : vector<32x768xf32>
    %c749_i32_74 = arith.constant 749 : i32
    %110 = tpu.dynamic_rotate %63 by %c749_i32_74 dim 1 : vector<32x768xf32>, i32 -> vector<32x768xf32>
    %c8_75 = arith.constant 8 : index
    %c0_76 = arith.constant 0 : index
    %c0_77 = arith.constant 0 : index
    %111 = vector.load %arg3[%c8_75, %c0_76, %c0_77] : memref<9x32x32xbf16, #tpu.memory_space<vmem>>, vector<1x32x32xbf16>
    %112 = vector.shape_cast %111 : vector<1x32x32xbf16> to vector<32x32xbf16>
    %113 = arith.truncf %110 : vector<32x768xf32> to vector<32x768xbf16>
    %cst_78 = arith.constant dense<0.000000e+00> : vector<32x768xf32>
    %114 = tpu.matmul %112, %113, %cst_78 {dimension_numbers = #tpu.dot_dimension_numbers<[1], [0], [0], [1], [0, 0, 1, 1], [], []>} : vector<32x32xbf16>, vector<32x768xbf16>, vector<32x768xf32> -> vector<32x768xf32>
    %115 = arith.addf %109, %114 : vector<32x768xf32>
    %c0_79 = arith.constant 0 : index
    %c0_80 = arith.constant 0 : index
    %116 = vector.load %arg6[%c0_79, %c0_80] : memref<32x1xf32, #tpu.memory_space<vmem>>, vector<32x1xf32>
    %117 = vector.broadcast %116 : vector<32x1xf32> to vector<32x768xf32>
    %118 = arith.mulf %115, %117 : vector<32x768xf32>
    %c0_81 = arith.constant 0 : index
    %c0_82 = arith.constant 0 : index
    %119 = vector.load %arg7[%c0_81, %c0_82] : memref<32x1xf32, #tpu.memory_space<vmem>>, vector<32x1xf32>
    %120 = vector.broadcast %119 : vector<32x1xf32> to vector<32x768xf32>
    %121 = arith.addf %118, %120 : vector<32x768xf32>
    %122 = arith.addf %121, %0 : vector<32x768xf32>
    %cst_83 = arith.constant 0.000000e+00 : f32
    %123 = vector.broadcast %cst_83 : f32 to vector<32x768xf32>
    %124 = arith.maximumf %122, %123 : vector<32x768xf32>
    %c0_84 = arith.constant 0 : index
    %c0_85 = arith.constant 0 : index
    %125 = vector.load %arg9[%c0_84, %c0_85] : memref<32x768xf32, #tpu.memory_space<vmem>>, vector<32x768xf32>
    tpu.vector_store %arg9[%c0_84, %c0_85], %124 {strides = array<i32>} : memref<32x768xf32, #tpu.memory_space<vmem>>, vector<32x768xf32>,
    return
  }
  func.func @transform_0(%arg0: i32) -> (i32, i32) {
    %c0_i32 = arith.constant 0 : i32
    %c0_i32_0 = arith.constant 0 : i32
    return %c0_i32, %arg0 : i32, i32
  }
  func.func @transform_1(%arg0: i32) -> (i32, i32, i32) {
    %c0_i32 = arith.constant 0 : i32
    %c0_i32_0 = arith.constant 0 : i32
    %c0_i32_1 = arith.constant 0 : i32
    %c0_i32_2 = arith.constant 0 : i32
    return %c0_i32, %c0_i32_0, %c0_i32_1 : i32, i32, i32
  }
  func.func @transform_2(%arg0: i32) -> (i32, i32, i32) {
    %c0_i32 = arith.constant 0 : i32
    %c0_i32_0 = arith.constant 0 : i32
    %c0_i32_1 = arith.constant 0 : i32
    %c0_i32_2 = arith.constant 0 : i32
    return %c0_i32, %c0_i32_0, %c0_i32_1 : i32, i32, i32
  }
  func.func @transform_3(%arg0: i32) -> (i32, i32) {
    %c0_i32 = arith.constant 0 : i32
    %c0_i32_0 = arith.constant 0 : i32
    %c0_i32_1 = arith.constant 0 : i32
    return %c0_i32, %c0_i32_0 : i32, i32
  }
  func.func @transform_4(%arg0: i32) -> (i32, i32) {
    %c0_i32 = arith.constant 0 : i32
    %c0_i32_0 = arith.constant 0 : i32
    %c0_i32_1 = arith.constant 0 : i32
    return %c0_i32, %c0_i32_0 : i32, i32
  }
  func.func @transform_5(%arg0: i32) -> (i32, i32) {
    %c0_i32 = arith.constant 0 : i32
    %c0_i32_0 = arith.constant 0 : i32
    %c0_i32_1 = arith.constant 0 : i32
    return %c0_i32, %c0_i32_0 : i32, i32
  }
  func.func @transform_6(%arg0: i32) -> (i32, i32) {
    %c0_i32 = arith.constant 0 : i32
    %c0_i32_0 = arith.constant 0 : i32
    %c0_i32_1 = arith.constant 0 : i32
    return %c0_i32, %c0_i32_0 : i32, i32
  }
  func.func @transform_7(%arg0: i32) -> (i32, i32) {
    %c0_i32 = arith.constant 0 : i32
    %c0_i32_0 = arith.constant 0 : i32
    %c0_i32_1 = arith.constant 0 : i32
    return %c0_i32, %c0_i32_0 : i32, i32
  }
  func.func @transform_8(%arg0: i32) -> (i32, i32) {
    %c0_i32 = arith.constant 0 : i32
    %c0_i32_0 = arith.constant 0 : i32
    return %c0_i32, %arg0 : i32, i32
  }
}

</mosaic_0001>

<bundles_post_ra>
// kernel: tpu_custom_call.1
= control target key start
LH: loop header
LB: loop body
LE: loop exit
PB: predicated region body
PF: predicated region fallthrough
CT: control target
= control target key end

     0   :  { %s10830_s0 = inlined_call_operand.hbm [shape: f32[32,3072], index: 0, kind: input, shape index: {}]   ;;  %s10831_s1 = inlined_call_operand.hbm [shape: bf16[9,32,32], index: 1, kind: input, shape index: {}]   ;;  %s10832_s2 = inlined_call_operand.hbm [shape: bf16[9,32,32], index: 2, kind: input, shape index: {}]   ;;  %s10833_s3 = inlined_call_operand.vmem [shape: f32[32,1], index: 3, kind: input, shape index: {}]   ;;  %s10834_s4 = inlined_call_operand.vmem [shape: f32[32,1], index: 4, kind: input, shape index: {}]   ;;  %s10835_s5 = inlined_call_operand.vmem [shape: f32[32,1], index: 5, kind: input, shape index: {}]   ;;  %s10836_s6 = inlined_call_operand.vmem [shape: f32[32,1], index: 6, kind: input, shape index: {}]   ;;  %s10837_s7 = inlined_call_operand.vmem [shape: f32[1,768], index: 7, kind: input, shape index: {}]   ;;  %s10838_s8 = inlined_call_operand.hbm [shape: f32[32,3072], index: 8, kind: output, shape index: {}]  }
   0x1   :  { %10878 = sst [smem:[#allocation28_spill]] %s10831_s1 }
   0x2   :  { %10879 = sst [smem:[#allocation29_spill]] %s10832_s2 }
   0x3   :  { %13 = vsyncpa [#allocation3], 0 }
   0x4   :  { %15 = vsyncpa [#allocation3 + $0x1], 0 }
   0x5   :  { %16 = vsyncpa [#allocation6], 0 }
   0x6   :  { %17 = vsyncpa [#allocation4], 0 }
   0x7   :  { %19 = vsyncpa [#allocation4 + $0x1], 0  ;;  %s6696_s27 = smov 0   ;;  %s6698_s28 = smov 0  }
   0x8   :  { %s6700_s29 = smov 0   ;;  %s6702_s30 = smov 0  }
   0x9 LB: > { %10880 = sst [smem:[#allocation12_spill]] %s6626_s29  ;;  %s6717_s9 = sadd.s32 4294967295, %s6630_s30   ;;  %s6630_s30 = sphi %s6702_s30, %s10969_s30   ;;  %s6626_s29 = sphi %s6700_s29, %s10966_s29   ;;  %s6622_s28 = sphi %s6698_s28, %s10968_s28   ;;  %s6618_s27 = sphi %s6696_s27, %s10967_s27  }
   0xa   : > { %s4963_s10 = sadd.s32 4294967294, %s6630_s30   ;;  %p45_p0 = scmp.ne.s32.totalorder %s6622_s28, %s6618_s27 }
   0xb   : > { %p46_p1 = scmp.eq.s32.totalorder %s6717_s9, 0  ;;  %p216_p2 = scmp.eq.s32.totalorder %s6717_s9, 3 }
   0xc   : > { %p222_p3 = scmp.eq.s32.totalorder %s4963_s10, 3  ;;  %p4964_p5 = scmp.ge.s32.totalorder %s6630_s30, 1 }
   0xd   : > { %p6726_p4 = por %p46_p1, %p45_p0  ;;  %p229_p7 = scmp.lt.s32.totalorder %s6630_s30, 5 }
   0xe   : > { %p6731_p6 = por %p222_p3, %p45_p0  ;;  %s10883_s1 = sld [smem:[#allocation28_spill]] }
   0xf   : > { %p6739_p8 = pnand %p4964_p5, %p229_p7  ;;  %s6632_s17 = smov [#allocation5]  }
  0x10   : > { %s242_s18 = sshll.u32 %s6632_s17, 4  ;;  %s10885_s2 = sld [smem:[#allocation29_spill]]  ;;  %s243_s18 = int_to_ptr.vmem [resolvable:$true] %s242_s18 }
  0x11   : > { %p5387_p9 = pneg %p6739_p8  ;;  %s6633_s22 = smov 64  }
  0x12   : > { %s6634_s23 = smov 4   ;;  %s6635_s24 = smov [#allocation7]  }
  0x13   : > { %p5388_p10 = pnand %p5387_p9, %p46_p1  ;;  %s256_s25 = sshll.u32 %s6635_s24, 4  ;;  %s257_s25 = int_to_ptr.vmem [resolvable:$true] %s256_s25 }
  0x14   : > { %s240_s15 = sshll.u32 %s10883_s1, 4  ;;  %s6751_s26 = sadd.s32 1, %s6630_s30   ;;  %s241_s15 = int_to_ptr.hbm [resolvable:$true] %s240_s15 }
  0x15   : > { %5390 = dma.hbm_to_vmem [thread:$0]  (!%p5388_p10), %s241_s15, 2304, %s243_s18, [#allocation6], %s6633_s22, %s6633_s22, %s6634_s23  }
  0x16   : > { %s254_s21 = sshll.u32 %s10885_s2, 4  ;;  %s32_s10 = sadd.s32 1, %s6626_s29  ;;  %s255_s21 = int_to_ptr.hbm [resolvable:$true] %s254_s21 }
  0x17   : > { %5393 = dma.hbm_to_vmem [thread:$0]  (!%p5388_p10), %s255_s21, 2304, %s257_s25, [#allocation6], %s6633_s22, %s6633_s22, %s6634_s23  }
  0x18   : > { %s29_s13 = ssub.s32 %s6630_s30, %s6751_s26  ;;  %p39_p11 = scmp.ne.s32.totalorder %s6626_s29, %s6622_s28 }
  0x19   : > { %p30_p12 = scmp.eq.s32.totalorder %s29_s13, 0  ;;  %p40_p13 = scmp.eq.s32.totalorder %s6630_s30, 0 }
  0x1a   : > { %p6761_p0 = por %p216_p2, %p39_p11  ;;  %p5404_p3 = scmp.lt.s32.totalorder %s6630_s30, 4 }
  0x1b   : > { %s6767_s15 = scalar_select %p30_p12, %s6626_s29, %s32_s10  }
  0x1c   : > { %p41_p5 = por %p40_p13, %p39_p11  ;;  %s285_s17 = sand.u32 1, %s6626_s29  }
  0x1d   : > { %10887 = sst [smem:[#allocation13_spill]] %s6767_s15  ;;  %s5373_s18 = smul.u32 192, %s285_s17 }
  0x1e   : > { %s5335_s19 = smul.u32 48, %s6630_s30  ;;  %p6771_p7 = pnand %p5404_p3, %p41_p5 }
  0x1f   : > { %s289_s24 = scalar_lea.vmem [#allocation2], %s5373_s18  ;;  %s286_s10 = scalar_lea.sflag [#allocation3], %s285_s17 }
  0x20   : > { %s294_s23 = scalar_lea.hbm %s10830_s0, %s5335_s19  ;;  %s297_s25 = sshll.u32 %s289_s24, 4  ;;  %s298_s25 = int_to_ptr.vmem [resolvable:$true] %s297_s25 }
  0x21   : > { %s295_s13 = sshll.u32 %s294_s23, 4  ;;  %p6534_p9 = pneg %p6771_p7  ;;  %s296_s13 = int_to_ptr.hbm [resolvable:$true] %s295_s13 }
  0x22   : > { %s6530_s1 = sshra.s32 %s296_s13, 4  ;;  %s6537_s21 = scalar_lea.hbm %s10830_s0, 768  ;;  %s6531_s1 = int_to_ptr.hbm [resolvable:$true] %s6530_s1 }
  0x23   : > { %s6532_s2 = scalar_lea.hbm %s6531_s1, 192  ;;  %p6538_p12 = scmp.lt.s32.totalorder %s6531_s1, %s10830_s0 }
  0x24   : > { %p6533_p2 = scmp.ne.s32.totalorder %s6531_s1, %s6532_s2  ;;  %p6539_p13 = scmp.lt.s32.totalorder %s6537_s21, %s6532_s2 }
  0x26   : > { %p6535_p10 = pnand %p6534_p9, %p6533_p2  ;;  %p6540_p3 = por %p6539_p13, %p6538_p12 }
  0x28   : > { %p6536_p11 = pneg %p6535_p10 }
  0x2a   : > { %p6541_p5 = pnand %p6540_p3, %p6536_p11 }
  0x2c   : > { %6544 = shalt.err (!%p6541_p5)
}
  0x2d   : > { %s6636_s17 = smov 3072   ;;  %s6637_s18 = smov 768  }
  0x2e   : > { %s6638_s23 = smov 48   ;;  %309 = sbr.rel (%p6739_p8) target bundleno = 1468 (0x5bc), region = 52 }
  0x2f   : > { %5397 = dma.hbm_to_vmem [thread:$0]  (!%p6771_p7), %s296_s13, 3072, %s298_s25, %s286_s10, %s6636_s17, %s6637_s18, %s6638_s23  }
  0x33   : > { %s6791_s29 = sand.u32 1, %s6622_s28  }
  0x34   : > { %s5374_s1 = smul.u32 192, %s6791_s29  ;;  %s312_s2 = scalar_lea.sflag [#allocation3], %s6791_s29 }
  0x36   : > { %s6797_s15 = scalar_lea.vmem [#allocation2], %s5374_s1 }
  0x37   : > { %6605 = dma.done.wait (%p6726_p4), %s312_s2, 3072  }
  0x38   : > { %6607 = vsyncadd (%p6726_p4), %s312_s2, 4294964224 }
  0x39   : > { %6609 = dma.done.wait (%p46_p1), [#allocation6], 4608  }
  0x3a   : > { %6611 = vsyncadd (%p46_p1), [#allocation6], 4294962688  ;;  %v374_v0 = vld [vmem:[%s6797_s15 + $0x60] sm:$0xff]  ;;  %v380_v1 = vld [vmem:[%s6797_s15 + $0x90] sm:$0xff]  ;;  %s6639_s11 = smov 18   ;;  %s6640_s16 = smov 19   ;;  %v434_v38 = vlaneseq }
  0x3b   : > { %v362_v2 = vld [vmem:[%s6797_s15] sm:$0xff]  ;;  %v6810_v3 = vpack.i.bf16 %v380_v1, %v374_v0  ;;  %v368_v4 = vld [vmem:[%s6797_s15 + $0x30] sm:$0xff]  ;;  %v375_v8 = vld [vmem:[%s6797_s15 + $0x68] sm:$0xff]  ;;  %s6641_s20 = smov 17   ;;  %s6642_s24 = smov 1   ;;  %vm577_vm1 = vcmask 261120  }
  0x3c   : > { %v6813_v5 = vpack.i.bf16 %v368_v4, %v362_v2  ;;  %v378_v6 = vld [vmem:[%s6797_s15 + $0x80] sm:$0xff]  ;;  %v384_v7 = vld [vmem:[%s6797_s15 + $0xb0] sm:$0xff]  ;;  %v381_v9 = vld [vmem:[%s6797_s15 + $0x98] sm:$0xff]  ;;  %v6935_v40 = vand.u32 127, %v434_v38  ;;  %s6643_s25 = smov 127   ;;  %s6644_s13 = smov 111  }
  0x3d   : > { %5460 = vrot.lane.b32.xlu0 %v6810_v3, %s6639_s11  ;;  %v6823_v10 = vpack.i.bf16 %v384_v7, %v378_v6  ;;  %v363_v11 = vld [vmem:[%s6797_s15 + $0x8] sm:$0xff]  ;;  %v369_v12 = vld [vmem:[%s6797_s15 + $0x38] sm:$0xff]  ;;  %v6829_v13 = vpack.i.bf16 %v381_v9, %v375_v8  ;;  %v366_v18 = vld [vmem:[%s6797_s15 + $0x20] sm:$0xff]  ;;  %s6645_s10 = smov 110   ;;  %s6646_s21 = smov 109  }
  0x3e   : > { %5470 = vrot.lane.b32.xlu1 %v6813_v5, %s6639_s11  ;;  %v379_v14 = vld [vmem:[%s6797_s15 + $0x88] sm:$0xff]  ;;  %v385_v15 = vld [vmem:[%s6797_s15 + $0xb8] sm:$0xff]  ;;  %v6833_v16 = vpack.i.bf16 %v369_v12, %v363_v11  ;;  %v372_v19 = vld [vmem:[%s6797_s15 + $0x50] sm:$0xff]  ;;  %10889 = vst [vmem:[#allocation14_spill] sm:$0xff] %v6935_v40  ;;  %vm525_vm0 = vcmp.lt.s32.totalorder %v6935_v40, 18  ;;  %vm436_vm2 = vcmp.lt.s32.totalorder %v6935_v40, 19 }
  0x3f   : > { %5480 = vrot.lane.b32.xlu2 %v6823_v10, %s6639_s11  ;;  %v6835_v17 = vpack.i.bf16 %v385_v15, %v379_v14  ;;  %v367_v20 = vld [vmem:[%s6797_s15 + $0x28] sm:$0xff]  ;;  %v373_v21 = vld [vmem:[%s6797_s15 + $0x58] sm:$0xff]  ;;  %v6847_v22 = vpack.i.bf16 %v372_v19, %v366_v18  ;;  %v376_v23 = vld [vmem:[%s6797_s15 + $0x70] sm:$0xff]  ;;  %vm876_vm3 = vcmp.lt.s32.totalorder %v6935_v40, 17  ;;  %vm1120_vm4 = vcmp.lt.s32.totalorder %v6935_v40, 1  ;;  %s4856_s22 = scalar_lea.sflag [#allocation4], %s6791_s29 }
  0x40   : > { %v382_v24 = vld [vmem:[%s6797_s15 + $0xa0] sm:$0xff]  ;;  %v6851_v25 = vpack.i.bf16 %v373_v21, %v367_v20  ;;  %v377_v27 = vld [vmem:[%s6797_s15 + $0x78] sm:$0xff]  ;;  %v383_v28 = vld [vmem:[%s6797_s15 + $0xa8] sm:$0xff]  ;;  %vm1535_vm5 = vcmp.lt.s32.totalorder %v6935_v40, 127  ;;  %vm1779_vm6 = vcmp.lt.s32.totalorder %v6935_v40, 111  ;;  %vm2023_vm7 = vcmp.lt.s32.totalorder %v6935_v40, 110 }
  0x41   : > { %v6853_v26 = vpack.i.bf16 %v382_v24, %v376_v23  ;;  %v364_v29 = vld [vmem:[%s6797_s15 + $0x10] sm:$0xff]  ;;  %v370_v30 = vld [vmem:[%s6797_s15 + $0x40] sm:$0xff]  ;;  %v6865_v31 = vpack.i.bf16 %v383_v28, %v377_v27  ;;  %v365_v33 = vld [vmem:[%s6797_s15 + $0x18] sm:$0xff]  ;;  %vm2267_vm8 = vcmp.lt.s32.totalorder %v6935_v40, 109 }
  0x42   : > { %v6867_v32 = vpack.i.bf16 %v370_v30, %v364_v29  ;;  %v371_v34 = vld [vmem:[%s6797_s15 + $0x48] sm:$0xff]  ;;  %v6988_v23 = vld [vmem:[#allocation5 + $0x10] sm:$0xff] }
  0x43   : > { %v6871_v35 = vpack.i.bf16 %v371_v34, %v365_v33 }
  0x45   : > { %5465 = vrot.lane.b32.xlu0 %v6829_v13, %s6639_s11 }
  0x46   : > { %5475 = vrot.lane.b32.xlu1 %v6833_v16, %s6639_s11 }
  0x47   : > { %5485 = vrot.lane.b32.xlu2 %v6835_v17, %s6639_s11 }
  0x4d   : > { %5490 = vrot.lane.b32.xlu0 %v6847_v22, %s6639_s11 }
  0x4e   : > { %5495 = vrot.lane.b32.xlu1 %v6851_v25, %s6639_s11 }
  0x4f   : > { %5500 = vrot.lane.b32.xlu2 %v6853_v26, %s6639_s11 }
  0x55   : > { %5505 = vrot.lane.b32.xlu0 %v6865_v31, %s6639_s11 }
  0x56   : > { %5510 = vrot.lane.b32.xlu1 %v6867_v32, %s6639_s11 }
  0x57   : > { %5515 = vrot.lane.b32.xlu2 %v6871_v35, %s6639_s11 }
  0x5d   : > { %5520 = vrot.lane.b32.xlu0 %v6853_v26, %s6640_s16 }
  0x5e   : > { %5525 = vrot.lane.b32.xlu1 %v6865_v31, %s6640_s16 }
  0x5f   : > { %5530 = vrot.lane.b32.xlu2 %v6867_v32, %s6640_s16 }
  0x65   : > { %5535 = vrot.lane.b32.xlu0 %v6871_v35, %s6640_s16 }
  0x66   : > { %5540 = vrot.lane.b32.xlu1 %v6810_v3, %s6640_s16 }
  0x67   : > { %5545 = vrot.lane.b32.xlu2 %v6829_v13, %s6640_s16 }
  0x6d   : > { %5550 = vrot.lane.b32.xlu0 %v6813_v5, %s6640_s16 }
  0x6e   : > { %5555 = vrot.lane.b32.xlu1 %v6833_v16, %s6640_s16 }
  0x6f   : > { %5560 = vrot.lane.b32.xlu2 %v6835_v17, %s6640_s16 }
  0x75   : > { %5565 = vrot.lane.b32.xlu0 %v6810_v3, %s6641_s20 }
  0x76   : > { %5570 = vrot.lane.b32.xlu1 %v6829_v13, %s6641_s20 }
  0x77   : > { %5575 = vrot.lane.b32.xlu2 %v6851_v25, %s6640_s16 }
  0x7d   : > { %5580 = vrot.lane.b32.xlu0 %v6813_v5, %s6641_s20 }
  0x7e   : > { %5585 = vrot.lane.b32.xlu1 %v6833_v16, %s6641_s20 }
  0x7f   : > { %5590 = vrot.lane.b32.xlu2 %v6823_v10, %s6640_s16 }
  0x85   : > { %5595 = vrot.lane.b32.xlu0 %v6847_v22, %s6640_s16 }
  0x86   : > { %5600 = vrot.lane.b32.xlu1 %v6823_v10, %s6641_s20 }
  0x87   : > { %5605 = vrot.lane.b32.xlu2 %v6835_v17, %s6641_s20 }
  0x8d   : > { %5610 = vrot.lane.b32.xlu0 %v6847_v22, %s6641_s20 }
  0x8e   : > { %5615 = vrot.lane.b32.xlu1 %v6851_v25, %s6641_s20 }
  0x8f   : > { %5620 = vrot.lane.b32.xlu2 %v6853_v26, %s6641_s20 }
  0x95   : > { %5625 = vrot.lane.b32.xlu0 %v6865_v31, %s6641_s20 }
  0x96   : > { %5630 = vrot.lane.b32.xlu1 %v6867_v32, %s6641_s20 }
  0x97   : > { %5635 = vrot.lane.b32.xlu2 %v6871_v35, %s6641_s20 }
  0x99   : > { %v6925_v36 = vpop.permute.xlu2 %5480 }
  0x9a   : > { %v5483_v53 = vunpack.i.h.bf16 %v6925_v36  ;;  %v5482_v54 = vunpack.i.l.bf16 %v6925_v36 }
  0x9d   : > { %5640 = vrot.lane.b32.xlu0 %v6853_v26, %s6642_s24 }
  0x9e   : > { %5645 = vrot.lane.b32.xlu1 %v6865_v31, %s6642_s24 }
  0x9f   : > { %5650 = vrot.lane.b32.xlu2 %v6867_v32, %s6642_s24 }
  0xa1   : > { %v5486_v37 = vpop.permute.xlu2 %5485 }
  0xa2   : > { %v5488_v41 = vunpack.i.h.bf16 %v5486_v37  ;;  %v5487_v42 = vunpack.i.l.bf16 %v5486_v37 }
  0xa4   : > { %v528_v11 = vsel %vm525_vm0, %v5482_v54, %v5487_v42  ;;  %v529_v12 = vsel %vm525_vm0, %v5483_v53, %v5488_v41 }
  0xa5   : > { %5655 = vrot.lane.b32.xlu0 %v6871_v35, %s6642_s24  ;;  %v566_v21 = vpack.c.bf16 %v529_v12, %v528_v11 }
  0xa6   : > { %5660 = vrot.lane.b32.xlu1 %v6810_v3, %s6642_s24 }
  0xa7   : > { %5665 = vrot.lane.b32.xlu2 %v6829_v13, %s6642_s24 }
  0xa9   : > { %v6933_v39 = vpop.permute.xlu2 %5500 }
  0xaa   : > { %v5503_v51 = vunpack.i.h.bf16 %v6933_v39  ;;  %v5502_v52 = vunpack.i.l.bf16 %v6933_v39 }
  0xad   : > { %5670 = vrot.lane.b32.xlu0 %v6813_v5, %s6642_s24 }
  0xae   : > { %5675 = vrot.lane.b32.xlu1 %v6833_v16, %s6642_s24 }
  0xaf   : > { %v5461_v43 = vpop.permute.xlu0 %5460  ;;  %5680 = vrot.lane.b32.xlu2 %v6835_v17, %s6642_s24 }
  0xb0   : > { %v5463_v44 = vunpack.i.h.bf16 %v5461_v43  ;;  %v5462_v45 = vunpack.i.l.bf16 %v5461_v43  ;;  %v5471_v46 = vpop.permute.xlu1 %5470 }
  0xb1   : > { %v6946_v49 = vpop.permute.xlu2 %5515  ;;  %v5473_v56 = vunpack.i.h.bf16 %v5471_v46  ;;  %v5472_v60 = vunpack.i.l.bf16 %v5471_v46 }
  0xb2   : > { %v548_v47 = vsel %vm525_vm0, %v5487_v42, %v5462_v45  ;;  %v549_v48 = vsel %vm525_vm0, %v5488_v41, %v5463_v44  ;;  %v5518_v41 = vunpack.i.h.bf16 %v6946_v49  ;;  %v5517_v42 = vunpack.i.l.bf16 %v6946_v49 }
  0xb3   : > { %v561_v50 = vpack.c.bf16 %v549_v48, %v548_v47 }
  0xb5   : > { %590 = vmatpush.bf16.msra.mxu0 %v561_v50  ;;  %5685 = vrot.lane.b32.xlu0 %v6851_v25, %s6642_s24 }
  0xb6   : > { %5690 = vrot.lane.b32.xlu1 %v6823_v10, %s6642_s24 }
  0xb7   : > { %v5466_v55 = vpop.permute.xlu0 %5465  ;;  %5695 = vrot.lane.b32.xlu2 %v6847_v22, %s6642_s24 }
  0xb8   : > { %v5468_v57 = vunpack.i.h.bf16 %v5466_v55  ;;  %v5467_v58 = vunpack.i.l.bf16 %v5466_v55  ;;  %v6958_v59 = vpop.permute.xlu1 %5475 }
  0xb9   : > { %v5478_v61 = vunpack.i.h.bf16 %v6958_v59  ;;  %v5477_v62 = vunpack.i.l.bf16 %v6958_v59  ;;  %v6972_v4 = vpop.permute.xlu2 %5530 }
  0xba   : > { %v544_v63 = vsel %vm525_vm0, %v5462_v45, %v5467_v58  ;;  %v545_v0 = vsel %vm525_vm0, %v5463_v44, %v5468_v57  ;;  %v540_v1 = vsel %vm525_vm0, %v5467_v58, %v5502_v52  ;;  %v541_v2 = vsel %vm525_vm0, %v5468_v57, %v5503_v51 }
  0xbb   : > { %v562_v6 = vpack.c.bf16 %v545_v0, %v544_v63  ;;  %v563_v7 = vpack.c.bf16 %v541_v2, %v540_v1  ;;  %v542_v8 = vsel %vm525_vm0, %v5472_v60, %v5477_v62  ;;  %v543_v9 = vsel %vm525_vm0, %v5473_v56, %v5478_v61 }
  0xbc   : > { %v556_v15 = vpack.c.bf16 %v543_v9, %v542_v8 }
  0xbd   : > { %609 = vmatpush.bf16.msra.mxu1 %v562_v6  ;;  %628 = vmatpush.bf16.msra.mxu2 %v563_v7 }
  0xbe   : > { %5700 = vrot.lane.b32.xlu0 %v6865_v31, %s6643_s25  ;;  %5705 = vrot.lane.b32.xlu1 %v6823_v10, %s6643_s25 }
  0xbf   : > { %v5491_v14 = vpop.permute.xlu0 %5490  ;;  %5710 = vrot.lane.b32.xlu2 %v6871_v35, %s6643_s25 }
  0xc0   : > { %v5493_v18 = vunpack.i.h.bf16 %v5491_v14  ;;  %v5492_v19 = vunpack.i.l.bf16 %v5491_v14  ;;  %v5496_v20 = vpop.permute.xlu1 %5495 }
  0xc1   : > { %v5498_v24 = vunpack.i.h.bf16 %v5496_v20  ;;  %v5497_v27 = vunpack.i.l.bf16 %v5496_v20  ;;  %610 = vmatpush.bf16.msra.mxu1 %v556_v15  ;;  %v6990_v28 = vpop.permute.xlu2 %5545 }
  0xc2   : > { %v530_v50 = vsel %vm525_vm0, %v5517_v42, %v5492_v19  ;;  %v531_v55 = vsel %vm525_vm0, %v5518_v41, %v5493_v18  ;;  %v5547_v7 = vunpack.i.l.bf16 %v6990_v28 }
  0xc3   : > { %v546_v29 = vsel %vm525_vm0, %v5497_v27, %v5472_v60  ;;  %v547_v30 = vsel %vm525_vm0, %v5498_v24, %v5473_v56  ;;  %v526_v33 = vsel %vm525_vm0, %v5492_v19, %v5497_v27  ;;  %v527_v34 = vsel %vm525_vm0, %v5493_v18, %v5498_v24 }
  0xc4   : > { %4982 = vmatmul.msk.bf16.vlgmr.msra.gmra.mxu1 %vm577_vm1, %v6988_v23  ;;  %v555_v37 = vpack.c.bf16 %v547_v30, %v546_v29  ;;  %v560_v38 = vpack.c.bf16 %v527_v34, %v526_v33  ;;  %v559_v0 = vpack.c.bf16 %v531_v55, %v530_v50  ;;  %v5533_v24 = vunpack.i.h.bf16 %v6972_v4 }
  0xc5   : > { %685 = vmatpush.bf16.msrb.mxu1 %v566_v21  ;;  %v5532_v27 = vunpack.i.l.bf16 %v6972_v4 }
  0xc6   : > { %591 = vmatpush.bf16.msra.mxu0 %v555_v37  ;;  %5715 = vrot.lane.b32.xlu0 %v6847_v22, %s6643_s25 }
  0xc7   : > { %v5506_v43 = vpop.permute.xlu0 %5505  ;;  %5720 = vrot.lane.b32.xlu1 %v6829_v13, %s6643_s25  ;;  %5725 = vrot.lane.b32.xlu2 %v6853_v26, %s6643_s25 }
  0xc8   : > { %v5508_v44 = vunpack.i.h.bf16 %v5506_v43  ;;  %v5507_v45 = vunpack.i.l.bf16 %v5506_v43  ;;  %v5511_v46 = vpop.permute.xlu1 %5510 }
  0xc9   : > { %686 = vmatpush.bf16.msrb.mxu1 %v560_v38  ;;  %v5513_v47 = vunpack.i.h.bf16 %v5511_v46  ;;  %v5512_v48 = vunpack.i.l.bf16 %v5511_v46  ;;  %4980 = vmatmul.msk.bf16.vlgmr.msra.gmra.mxu0 %vm577_vm1, %v6988_v23  ;;  %v7024_v59 = vpop.permute.xlu2 %5560 }
  0xca   : > { %v536_v56 = vsel %vm525_vm0, %v5502_v52, %v5507_v45  ;;  %v537_v49 = vsel %vm525_vm0, %v5503_v51, %v5508_v44  ;;  %v532_v57 = vsel %vm525_vm0, %v5507_v45, %v5482_v54  ;;  %v533_v58 = vsel %vm525_vm0, %v5508_v44, %v5483_v53 }
  0xcb   : > { %v564_v60 = vpack.c.bf16 %v537_v49, %v536_v56  ;;  %v538_v39 = vsel %vm525_vm0, %v5477_v62, %v5512_v48  ;;  %v539_v51 = vsel %vm525_vm0, %v5478_v61, %v5513_v47  ;;  %v565_v52 = vpack.c.bf16 %v533_v58, %v532_v57  ;;  %v7036_v62 = vld [vmem:[#allocation5 + $0x18] sm:$0xff] }
  0xcc   : > { %v557_v63 = vpack.c.bf16 %v539_v51, %v538_v39  ;;  %v534_v36 = vsel %vm525_vm0, %v5512_v48, %v5517_v42  ;;  %v535_v53 = vsel %vm525_vm0, %v5513_v47, %v5518_v41  ;;  %v5548_v61 = vunpack.i.h.bf16 %v6990_v28 }
  0xcd   : > { %647 = vmatpush.bf16.msra.mxu3 %v564_v60  ;;  %666 = vmatpush.bf16.msrb.mxu0 %v565_v52  ;;  %v558_v54 = vpack.c.bf16 %v535_v53, %v534_v36  ;;  %v5563_v29 = vunpack.i.h.bf16 %v7024_v59  ;;  %v5562_v30 = vunpack.i.l.bf16 %v7024_v59 }
  0xce   : > { %629 = vmatpush.bf16.msra.mxu2 %v557_v63  ;;  %5730 = vrot.lane.b32.xlu0 %v6833_v16, %s6643_s25 }
  0xcf   : > { %v5521_v1 = vpop.permute.xlu0 %5520  ;;  %5735 = vrot.lane.b32.xlu1 %v6867_v32, %s6643_s25  ;;  %5740 = vrot.lane.b32.xlu2 %v6810_v3, %s6643_s25 }
  0xd0   : > { %v5523_v2 = vunpack.i.h.bf16 %v5521_v1  ;;  %v5522_v6 = vunpack.i.l.bf16 %v5521_v1  ;;  %v5526_v8 = vpop.permute.xlu1 %5525 }
  0xd1   : > { %4984 = vmatmul.msk.bf16.vlgmr.msra.gmra.mxu2 %vm577_vm1, %v6988_v23  ;;  %648 = vmatpush.bf16.msra.mxu3 %v558_v54  ;;  %v5528_v9 = vunpack.i.h.bf16 %v5526_v8  ;;  %v5527_v11 = vunpack.i.l.bf16 %v5526_v8  ;;  %v7047_v15 = vpop.permute.xlu2 %5575 }
  0xd2   : > { %v452_v12 = vsel %vm436_vm2, %v5548_v61, %v5523_v2  ;;  %v451_v14 = vsel %vm436_vm2, %v5547_v7, %v5522_v6  ;;  %667 = vmatpush.bf16.msrb.mxu0 %v559_v0  ;;  %v5578_v49 = vunpack.i.h.bf16 %v7047_v15  ;;  %v5577_v57 = vunpack.i.l.bf16 %v7047_v15 }
  0xd3   : > { %v448_v18 = vsel %vm436_vm2, %v5523_v2, %v5528_v9  ;;  %v447_v19 = vsel %vm436_vm2, %v5522_v6, %v5527_v11  ;;  %v473_v20 = vpack.c.bf16 %v452_v12, %v451_v14 }
  0xd4   : > { %4983 = vmatmul.msk.bf16.gmra.mxu1 %vm577_vm1, %v7036_v62  ;;  %4986 = vmatmul.msk.bf16.vlgmr.msra.gmra.mxu3 %vm577_vm1, %v6988_v23  ;;  %v474_v21 = vpack.c.bf16 %v448_v18, %v447_v19 }
  0xd6   : > { %758 = vmatpush.bf16.msra.mxu0 %v473_v20  ;;  %777 = vmatpush.bf16.msra.mxu1 %v474_v21 }
  0xd7   : > { %v7059_v28 = vpop.permute.xlu0 %5535  ;;  %5745 = vrot.lane.b32.xlu0 %v6829_v13, %s6644_s13  ;;  %5750 = vrot.lane.b32.xlu1 %v6853_v26, %s6644_s13 }
  0xd8   : > { %v5538_v33 = vunpack.i.h.bf16 %v7059_v28  ;;  %v5537_v34 = vunpack.i.l.bf16 %v7059_v28  ;;  %v5541_v37 = vpop.permute.xlu1 %5540  ;;  %v7182_v28 = vld [vmem:[#allocation5 + $0x8] sm:$0xff]  ;;  %5755 = vrot.lane.b32.xlu2 %v6813_v5, %s6643_s25 }
  0xd9   : > { %4981 = vmatmul.msk.bf16.gmra.mxu0 %vm577_vm1, %v7036_v62  ;;  %v5543_v38 = vunpack.i.h.bf16 %v5541_v37  ;;  %v5542_v41 = vunpack.i.l.bf16 %v5541_v37  ;;  %v5591_v42 = vpop.permute.xlu2 %5590 }
  0xda   : > { %v445_v4 = vsel %vm436_vm2, %v5532_v27, %v5537_v34  ;;  %v446_v43 = vsel %vm436_vm2, %v5533_v24, %v5538_v33  ;;  %v5593_v46 = vunpack.i.h.bf16 %v5591_v42  ;;  %v5592_v47 = vunpack.i.l.bf16 %v5591_v42 }
  0xdb   : > { %v459_v44 = vsel %vm436_vm2, %v5562_v30, %v5542_v41  ;;  %v460_v45 = vsel %vm436_vm2, %v5563_v29, %v5543_v38  ;;  %v455_v50 = vsel %vm436_vm2, %v5542_v41, %v5547_v7  ;;  %v456_v55 = vsel %vm436_vm2, %v5543_v38, %v5548_v61 }
  0xdc   : > { %v471_v48 = vpack.c.bf16 %v460_v45, %v459_v44  ;;  %v468_v56 = vpack.c.bf16 %v446_v43, %v445_v4  ;;  %v472_v58 = vpack.c.bf16 %v456_v55, %v455_v50  ;;  %v439_v60 = vsel %vm436_vm2, %v5592_v47, %v5562_v30  ;;  %v7128_v43 = vld [vmem:[#allocation5] sm:$0xff] }
  0xdd   : > { %v440_v39 = vsel %vm436_vm2, %v5593_v46, %v5563_v29  ;;  %v443_v51 = vsel %vm436_vm2, %v5527_v11, %v5592_v47  ;;  %v444_v52 = vsel %vm436_vm2, %v5528_v9, %v5593_v46 }
  0xde   : > { %720 = vmatpush.bf16.msrb.mxu2 %v471_v48  ;;  %778 = vmatpush.bf16.msra.mxu1 %v468_v56  ;;  %v475_v6 = vpack.c.bf16 %v444_v52, %v443_v51  ;;  %v476_v61 = vpack.c.bf16 %v440_v39, %v439_v60 }
  0xdf   : > { %v5551_v59 = vpop.permute.xlu0 %5550  ;;  %739 = vmatpush.bf16.msrb.mxu3 %v472_v58  ;;  %5760 = vrot.lane.b32.xlu0 %v6833_v16, %s6644_s13 }
  0xe0   : > { %v5553_v63 = vunpack.i.h.bf16 %v5551_v59  ;;  %v5552_v36 = vunpack.i.l.bf16 %v5551_v59  ;;  %v5556_v53 = vpop.permute.xlu1 %5555  ;;  %5765 = vrot.lane.b32.xlu1 %v6867_v32, %s6644_s13  ;;  %5770 = vrot.lane.b32.xlu2 %v6835_v17, %s6643_s25 }
  0xe1   : > { %4985 = vmatmul.msk.bf16.gmra.mxu2 %vm577_vm1, %v7036_v62  ;;  %v5558_v54 = vunpack.i.h.bf16 %v5556_v53  ;;  %v5557_v0 = vunpack.i.l.bf16 %v5556_v53  ;;  %v7117_v19 = vpop.permute.xlu2 %5605 }
  0xe2   : > { %v457_v1 = vsel %vm436_vm2, %v5577_v57, %v5552_v36  ;;  %v458_v2 = vsel %vm436_vm2, %v5578_v49, %v5553_v63  ;;  %v5607_v38 = vunpack.i.l.bf16 %v7117_v19 }
  0xe3   : > { %v465_v7 = vpack.c.bf16 %v458_v2, %v457_v1  ;;  %v453_v8 = vsel %vm436_vm2, %v5552_v36, %v5557_v0  ;;  %v454_v9 = vsel %vm436_vm2, %v5553_v63, %v5558_v54  ;;  %v449_v11 = vsel %vm436_vm2, %v5557_v0, %v5532_v27 }
  0xe4   : > { %4987 = vmatmul.msk.bf16.gmra.mxu3 %vm577_vm1, %v7036_v62  ;;  %4990 = vmatmul.msk.bf16.vlgmr.msrb.gmra.mxu1 %vm577_vm1, %v6988_v23  ;;  %v466_v12 = vpack.c.bf16 %v454_v9, %v453_v8  ;;  %v450_v14 = vsel %vm436_vm2, %v5558_v54, %v5533_v24  ;;  %v5608_v24 = vunpack.i.h.bf16 %v7117_v19 }
  0xe5   : > { %721 = vmatpush.bf16.msrb.mxu2 %v465_v7  ;;  %v467_v18 = vpack.c.bf16 %v450_v14, %v449_v11 }
  0xe6   : > { %740 = vmatpush.bf16.msrb.mxu3 %v466_v12 }
  0xe7   : > { %v5566_v20 = vpop.permute.xlu0 %5565  ;;  %759 = vmatpush.bf16.msra.mxu0 %v467_v18  ;;  %5775 = vrot.lane.b32.xlu0 %v6851_v25, %s6643_s25 }
  0xe8   : > { %v5568_v21 = vunpack.i.h.bf16 %v5566_v20  ;;  %v5567_v27 = vunpack.i.l.bf16 %v5566_v20  ;;  %v5571_v29 = vpop.permute.xlu1 %5570  ;;  %5780 = vrot.lane.b32.xlu1 %v6810_v3, %s6644_s13 }
  0xe9   : > { %796 = vmatpush.bf16.msra.mxu2 %v475_v6  ;;  %4988 = vmatmul.msk.bf16.vlgmr.msrb.gmra.mxu0 %vm577_vm1, %v6988_v23  ;;  %v5573_v30 = vunpack.i.h.bf16 %v5571_v29  ;;  %v5572_v37 = vunpack.i.l.bf16 %v5571_v29  ;;  %v7134_v46 = vpop.permute.xlu2 %5620 }
  0xea   : > { %815 = vmatpush.bf16.msra.mxu3 %v476_v61  ;;  %v899_v44 = vsel %vm876_vm3, %v5607_v38, %v5567_v27  ;;  %v900_v23 = vsel %vm876_vm3, %v5608_v24, %v5568_v21  ;;  %v5623_v59 = vunpack.i.h.bf16 %v7134_v46  ;;  %v5622_v60 = vunpack.i.l.bf16 %v7134_v46 }
  0xeb   : > { %v896_v41 = vsel %vm876_vm3, %v5568_v21, %v5573_v30  ;;  %v895_v42 = vsel %vm876_vm3, %v5567_v27, %v5572_v37  ;;  %v912_v58 = vpack.c.bf16 %v900_v23, %v899_v44 }
  0xec   : > { %v913_v4 = vpack.c.bf16 %v896_v41, %v895_v42  ;;  %v891_v63 = vsel %vm876_vm3, %v5572_v37, %v5622_v60  ;;  %v892_v36 = vsel %vm876_vm3, %v5573_v30, %v5623_v59 }
  0xed   : > { %940 = vmatpush.bf16.msrb.mxu0 %v912_v58  ;;  %v914_v61 = vpack.c.bf16 %v892_v36, %v891_v63 }
  0xee   : > { %959 = vmatpush.bf16.msrb.mxu1 %v913_v4 }
  0xef   : > { %v5581_v45 = vpop.permute.xlu0 %5580 }
  0xf0   : > { %v5583_v47 = vunpack.i.h.bf16 %v5581_v45  ;;  %v5582_v48 = vunpack.i.l.bf16 %v5581_v45  ;;  %v7136_v50 = vpop.permute.xlu1 %5585  ;;  %5795 = vrot.lane.b32.xlu1 %v6851_v25, %s6644_s13 }
  0xf1   : > { %5000 = vmatmul.msk.bf16.vlgmr.msrb.gmra.mxu2 %vm577_vm1, %v7128_v43  ;;  %v5588_v55 = vunpack.i.h.bf16 %v7136_v50  ;;  %v5587_v56 = vunpack.i.l.bf16 %v7136_v50 }
  0xf3   : > { %v893_v39 = vsel %vm876_vm3, %v5582_v48, %v5587_v56  ;;  %v894_v51 = vsel %vm876_vm3, %v5583_v47, %v5588_v55 }
  0xf4   : > { %4991 = vmatmul.msk.bf16.gmra.mxu1 %vm577_vm1, %v7036_v62  ;;  %5002 = vmatmul.msk.bf16.vlgmr.msrb.gmra.mxu3 %vm577_vm1, %v7128_v43  ;;  %v907_v52 = vpack.c.bf16 %v894_v51, %v893_v39 }
  0xf6   : > { %960 = vmatpush.bf16.msrb.mxu1 %v907_v52 }
  0xf7   : > { %v5596_v53 = vpop.permute.xlu0 %5595 }
  0xf8   : > { %v5598_v54 = vunpack.i.h.bf16 %v5596_v53  ;;  %v5597_v0 = vunpack.i.l.bf16 %v5596_v53  ;;  %v5601_v1 = vpop.permute.xlu1 %5600  ;;  %5810 = vrot.lane.b32.xlu1 %v6871_v35, %s6644_s13 }
  0xf9   : > { %4989 = vmatmul.msk.bf16.gmra.mxu0 %vm577_vm1, %v7036_v62  ;;  %v5603_v2 = vunpack.i.h.bf16 %v5601_v1  ;;  %v5602_v6 = vunpack.i.l.bf16 %v5601_v1 }
  0xfa   : > { %v441_v7 = vsel %vm436_vm2, %v5537_v34, %v5597_v0  ;;  %v442_v8 = vsel %vm436_vm2, %v5538_v33, %v5598_v54  ;;  %v437_v9 = vsel %vm436_vm2, %v5597_v0, %v5577_v57  ;;  %v438_v62 = vsel %vm436_vm2, %v5598_v54, %v5578_v49 }
  0xfb   : > { %v469_v11 = vpack.c.bf16 %v442_v8, %v441_v7  ;;  %v470_v12 = vpack.c.bf16 %v438_v62, %v437_v9  ;;  %v880_v33 = vsel %vm876_vm3, %v5603_v2, %v5608_v24  ;;  %v879_v34 = vsel %vm876_vm3, %v5602_v6, %v5607_v38 }
  0xfc   : > { %v917_v19 = vpack.c.bf16 %v880_v33, %v879_v34 }
  0xfd   : > { %797 = vmatpush.bf16.msra.mxu2 %v469_v11  ;;  %816 = vmatpush.bf16.msra.mxu3 %v470_v12 }
  0xff   : > { %v5611_v15 = vpop.permute.xlu0 %5610 }
 0x100   : > { %v5616_v57 = vpop.permute.xlu1 %5615  ;;  %v5613_v49 = vunpack.i.h.bf16 %v5611_v15  ;;  %v5612_v14 = vunpack.i.l.bf16 %v5611_v15 }
 0x101   : > { %978 = vmatpush.bf16.msrb.mxu2 %v914_v61  ;;  %v5618_v18 = vunpack.i.h.bf16 %v5616_v57  ;;  %v5617_v31 = vunpack.i.l.bf16 %v5616_v57 }
 0x102   : > { %5001 = vmatmul.msk.bf16.gmra.mxu2 %vm577_vm1, %v7182_v28 }
 0x103   : > { %v897_v20 = vsel %vm876_vm3, %v5617_v31, %v5582_v48  ;;  %v898_v21 = vsel %vm876_vm3, %v5618_v18, %v5583_v47  ;;  %v877_v29 = vsel %vm876_vm3, %v5612_v14, %v5617_v31  ;;  %v878_v30 = vsel %vm876_vm3, %v5613_v49, %v5618_v18 }
 0x104   : > { %5003 = vmatmul.msk.bf16.gmra.mxu3 %vm577_vm1, %v7182_v28  ;;  %5006 = vmatmul.msk.bf16.vlgmr.msra.gmra.mxu1 %vm577_vm1, %v7128_v43  ;;  %v906_v27 = vpack.c.bf16 %v898_v21, %v897_v20  ;;  %v911_v37 = vpack.c.bf16 %v878_v30, %v877_v29 }
 0x105   : > { %1035 = vmatpush.bf16.msra.mxu1 %v917_v19 }
 0x106   : > { %941 = vmatpush.bf16.msrb.mxu0 %v906_v27 }
 0x107   : > { %v5626_v24 = vpop.permute.xlu0 %5625 }
 0x108   : > { %v5631_v38 = vpop.permute.xlu1 %5630  ;;  %v5628_v41 = vunpack.i.h.bf16 %v5626_v24  ;;  %v5627_v22 = vunpack.i.l.bf16 %v5626_v24 }
 0x109   : > { %5004 = vmatmul.msk.bf16.vlgmr.msra.gmra.mxu0 %vm577_vm1, %v7128_v43  ;;  %v5633_v42 = vunpack.i.h.bf16 %v5631_v38  ;;  %v5632_v4 = vunpack.i.l.bf16 %v5631_v38  ;;  %1036 = vmatpush.bf16.msra.mxu1 %v911_v37 }
 0x10a   : > { %v888_v44 = vsel %vm876_vm3, %v5623_v59, %v5628_v41  ;;  %v883_v23 = vsel %vm876_vm3, %v5627_v22, %v5602_v6  ;;  %v884_v45 = vsel %vm876_vm3, %v5628_v41, %v5603_v2  ;;  %v887_v47 = vsel %vm876_vm3, %v5622_v60, %v5627_v22  ;;  %v5636_v60 = vpop.permute.xlu2 %5635  ;;  %v7262_v2 = vld [vmem:[#allocation5 + $0x20] sm:$0xff] }
 0x10b   : > { %v889_v48 = vsel %vm876_vm3, %v5587_v56, %v5632_v4  ;;  %v890_v58 = vsel %vm876_vm3, %v5588_v55, %v5633_v42  ;;  %v916_v59 = vpack.c.bf16 %v884_v45, %v883_v23  ;;  %v915_v46 = vpack.c.bf16 %v888_v44, %v887_v47 }
 0x10c   : > { %v908_v39 = vpack.c.bf16 %v890_v58, %v889_v48  ;;  %v5638_v51 = vunpack.i.h.bf16 %v5636_v60  ;;  %v5637_v10 = vunpack.i.l.bf16 %v5636_v60  ;;  %v7327_v60 = vld [vmem:[#allocation5 + $0x28] sm:$0xff] }
 0x10d   : > { %1016 = vmatpush.bf16.msra.mxu0 %v916_v59  ;;  %997 = vmatpush.bf16.msrb.mxu3 %v915_v46 }
 0x10e   : > { %979 = vmatpush.bf16.msrb.mxu2 %v908_v39  ;;  %v885_v56 = vsel %vm876_vm3, %v5632_v4, %v5637_v10  ;;  %v886_v50 = vsel %vm876_vm3, %v5633_v42, %v5638_v51  ;;  %v881_v63 = vsel %vm876_vm3, %v5637_v10, %v5612_v14  ;;  %v882_v36 = vsel %vm876_vm3, %v5638_v51, %v5613_v49 }
 0x10f   : > { %v5641_v52 = vpop.permute.xlu0 %5640  ;;  %v909_v55 = vpack.c.bf16 %v886_v50, %v885_v56  ;;  %v910_v53 = vpack.c.bf16 %v882_v36, %v881_v63 }
 0x110   : > { %v7250_v0 = vpop.permute.xlu1 %5645  ;;  %v5643_v12 = vunpack.i.h.bf16 %v5641_v52 }
 0x111   : > { %998 = vmatpush.bf16.msrb.mxu3 %v909_v55  ;;  %1017 = vmatpush.bf16.msra.mxu0 %v910_v53  ;;  %v5648_v33 = vunpack.i.h.bf16 %v7250_v0  ;;  %v5647_v34 = vunpack.i.l.bf16 %v7250_v0 }
 0x112   : > { %5008 = vmatmul.msk.bf16.vlgmr.msra.gmra.mxu2 %vm577_vm1, %v7128_v43  ;;  %v7248_v54 = vpop.permute.xlu2 %5650 }
 0x113   : > { %v1132_v29 = vsel %vm1120_vm4, %v5643_v12, %v5648_v33  ;;  %v5653_v39 = vunpack.i.h.bf16 %v7248_v54  ;;  %v5652_v32 = vunpack.i.l.bf16 %v7248_v54 }
 0x114   : > { %5007 = vmatmul.msk.bf16.gmra.mxu1 %vm577_vm1, %v7182_v28  ;;  %5010 = vmatmul.msk.bf16.vlgmr.msra.gmra.mxu3 %vm577_vm1, %v7128_v43 }
 0x117   : > { %v7252_v1 = vpop.permute.xlu0 %5655 }
 0x118   : > { %v5661_v43 = vpop.permute.xlu1 %5660  ;;  %v5657_v5 = vunpack.i.l.bf16 %v7252_v1  ;;  %v5658_v10 = vunpack.i.h.bf16 %v7252_v1 }
 0x119   : > { %5005 = vmatmul.msk.bf16.gmra.mxu0 %vm577_vm1, %v7182_v28  ;;  %v5663_v61 = vunpack.i.h.bf16 %v5661_v43  ;;  %v5662_v7 = vunpack.i.l.bf16 %v5661_v43 }
 0x11a   : > { %v5666_v13 = vpop.permute.xlu2 %5665  ;;  %v1129_v36 = vsel %vm1120_vm4, %v5652_v32, %v5657_v5  ;;  %v1130_v0 = vsel %vm1120_vm4, %v5653_v39, %v5658_v10 }
 0x11b   : > { %v5668_v8 = vunpack.i.h.bf16 %v5666_v13  ;;  %v5667_v9 = vunpack.i.l.bf16 %v5666_v13  ;;  %v1153_v43 = vpack.c.bf16 %v1130_v0, %v1129_v36  ;;  %v6441_v0 = vld [vmem:[%s6797_s15 + $0x40] sm:$0xff] }
 0x11d   : > { %v1140_v18 = vsel %vm1120_vm4, %v5663_v61, %v5668_v8  ;;  %v1139_v31 = vsel %vm1120_vm4, %v5662_v7, %v5667_v9  ;;  %v1136_v24 = vsel %vm1120_vm4, %v5668_v8, %v5643_v12 }
 0x11e   : > { %v1157_v44 = vpack.c.bf16 %v1140_v18, %v1139_v31  ;;  %v7429_v18 = vld [vmem:[%s6797_s15 + $0xa8] sm:$0xff] }
 0x11f   : > { %v5671_v6 = vpop.permute.xlu0 %5670 }
 0x120   : > { %v5676_v15 = vpop.permute.xlu1 %5675  ;;  %v5673_v57 = vunpack.i.h.bf16 %v5671_v6  ;;  %v5672_v49 = vunpack.i.l.bf16 %v5671_v6  ;;  %1203 = vmatpush.bf16.msra.mxu3 %v1157_v44 }
 0x121   : > { %v5678_v38 = vunpack.i.h.bf16 %v5676_v15  ;;  %v5677_v41 = vunpack.i.l.bf16 %v5676_v15 }
 0x122   : > { %5009 = vmatmul.msk.bf16.gmra.mxu2 %vm577_vm1, %v7182_v28  ;;  %v7271_v16 = vpop.permute.xlu2 %5680 }
 0x123   : > { %v5683_v62 = vunpack.i.h.bf16 %v7271_v16  ;;  %v5682_v11 = vunpack.i.l.bf16 %v7271_v16  ;;  %v1137_v59 = vsel %vm1120_vm4, %v5672_v49, %v5677_v41  ;;  %v1138_v46 = vsel %vm1120_vm4, %v5673_v57, %v5678_v38 }
 0x124   : > { %5011 = vmatmul.msk.bf16.gmra.mxu3 %vm577_vm1, %v7182_v28  ;;  %5022 = vmatmul.msk.bf16.vlgmr.msrb.gmra.mxu1 %vm577_vm1, %v7262_v2  ;;  %v5642_v28 = vunpack.i.l.bf16 %v5641_v52  ;;  %v1151_v51 = vpack.c.bf16 %v1138_v46, %v1137_v59  ;;  %v1133_v55 = vsel %vm1120_vm4, %v5677_v41, %v5652_v32  ;;  %v1134_v63 = vsel %vm1120_vm4, %v5678_v38, %v5653_v39  ;;  %v6431_v38 = vld [vmem:[%s6797_s15 + $0x98] sm:$0xff]  ;;  %v7490_v39 = vld [vmem:[%s6797_s15 + $0x20] sm:$0xff]  ;;  %v7493_v32 = vld [vmem:[%s6797_s15 + $0x50] sm:$0xff] }
 0x125   : > { %v1143_v26 = vsel %vm1120_vm4, %v5682_v11, %v5662_v7  ;;  %v1144_v14 = vsel %vm1120_vm4, %v5683_v62, %v5663_v61  ;;  %v1152_v54 = vpack.c.bf16 %v1134_v63, %v1133_v55  ;;  %v7362_v61 = vld [vmem:[%s6797_s15] sm:$0xff]  ;;  %v7365_v7 = vld [vmem:[%s6797_s15 + $0x30] sm:$0xff] }
 0x126   : > { %v1156_v20 = vpack.c.bf16 %v1144_v14, %v1143_v26  ;;  %v1131_v30 = vsel %vm1120_vm4, %v5642_v28, %v5647_v34  ;;  %v1135_v37 = vsel %vm1120_vm4, %v5667_v9, %v5642_v28  ;;  %1204 = vmatpush.bf16.msra.mxu3 %v1151_v51  ;;  %v7369_v8 = vpack.i.bf16 %v7365_v7, %v7362_v61  ;;  %v7426_v14 = vld [vmem:[%s6797_s15 + $0x78] sm:$0xff] }
 0x127   : > { %v7295_v19 = vpop.permute.xlu0 %5685  ;;  %v1158_v45 = vpack.c.bf16 %v1136_v24, %v1135_v37  ;;  %v1159_v47 = vpack.c.bf16 %v1132_v29, %v1131_v30  ;;  %v7433_v31 = vpack.i.bf16 %v7429_v18, %v7426_v14  ;;  %v6430_v24 = vld [vmem:[%s6797_s15 + $0x68] sm:$0xff]  ;;  %v1321_v51 = vpack.c.bf16 %v7365_v7, %v7362_v61  ;;  %v6442_v7 = vld [vmem:[%s6797_s15 + $0x18] sm:$0xff] }
 0x128   : > { %v5688_v21 = vunpack.i.h.bf16 %v7295_v19  ;;  %v5687_v27 = vunpack.i.l.bf16 %v7295_v19  ;;  %1184 = vmatpush.bf16.msra.mxu2 %v1156_v20  ;;  %v5691_v23 = vpop.permute.xlu1 %5690  ;;  %5790 = vrot.lane.b32.xlu0 %v7369_v8, %s6644_s13  ;;  %v7436_v19 = vld [vmem:[%s6797_s15 + $0x80] sm:$0xff]  ;;  %v7439_v20 = vld [vmem:[%s6797_s15 + $0xb0] sm:$0xff]  ;;  %v1328_v41 = vpack.c.bf16 %v6431_v38, %v6430_v24  ;;  %v5839_v61 = vpack.i.bf16 %v6431_v38, %v6430_v24 }
 0x129   : > { %5020 = vmatmul.msk.bf16.vlgmr.msrb.gmra.mxu0 %vm577_vm1, %v7262_v2  ;;  %v5693_v48 = vunpack.i.h.bf16 %v5691_v23  ;;  %v5692_v58 = vunpack.i.l.bf16 %v5691_v23  ;;  %1241 = vmatpush.bf16.msrb.mxu1 %v1159_v47  ;;  %v7476_v23 = vld [vmem:[%s6797_s15 + $0x60] sm:$0xff] }
 0x12a   : > { %v1141_v22 = vsel %vm1120_vm4, %v5687_v27, %v5672_v49  ;;  %v1142_v42 = vsel %vm1120_vm4, %v5688_v21, %v5673_v57  ;;  %1222 = vmatpush.bf16.msrb.mxu0 %v1158_v45  ;;  %v5696_v53 = vpop.permute.xlu2 %5695  ;;  %v7417_v57 = vld [vmem:[#allocation5 + $0x30] sm:$0xff] }
 0x12b   : > { %v1150_v4 = vpack.c.bf16 %v1142_v42, %v1141_v22  ;;  %v1127_v56 = vsel %vm1120_vm4, %v5647_v34, %v5692_v58  ;;  %v1128_v50 = vsel %vm1120_vm4, %v5648_v33, %v5693_v48  ;;  %v5698_v1 = vunpack.i.h.bf16 %v5696_v53  ;;  %v7469_v42 = vld [vmem:[#allocation5 + $0x38] sm:$0xff]  ;;  %v7479_v45 = vld [vmem:[%s6797_s15 + $0x90] sm:$0xff] }
 0x12c   : > { %v1160_v52 = vpack.c.bf16 %v1128_v50, %v1127_v56  ;;  %v5697_v13 = vunpack.i.l.bf16 %v5696_v53  ;;  %v1124_v25 = vsel %vm1120_vm4, %v5693_v48, %v5683_v62  ;;  %v1123_v12 = vsel %vm1120_vm4, %v5692_v58, %v5682_v11  ;;  %v7398_v62 = vld [vmem:[%s6797_s15 + $0x88] sm:$0xff]  ;;  %v7401_v11 = vld [vmem:[%s6797_s15 + $0xb8] sm:$0xff]  ;;  %v6438_v50 = vld [vmem:[%s6797_s15 + $0x70] sm:$0xff] }
 0x12d   : > { %1185 = vmatpush.bf16.msra.mxu2 %v1150_v4  ;;  %1242 = vmatpush.bf16.msrb.mxu1 %v1153_v43  ;;  %v1126_v17 = vsel %vm1120_vm4, %v5658_v10, %v5698_v1  ;;  %v1161_v33 = vpack.c.bf16 %v1124_v25, %v1123_v12  ;;  %v7405_v35 = vpack.i.bf16 %v7401_v11, %v7398_v62  ;;  %v6434_v48 = vld [vmem:[%s6797_s15 + $0x8] sm:$0xff]  ;;  %v6435_v58 = vld [vmem:[%s6797_s15 + $0x38] sm:$0xff] }
 0x12e   : > { %1223 = vmatpush.bf16.msrb.mxu0 %v1152_v54  ;;  %v1125_v3 = vsel %vm1120_vm4, %v5657_v5, %v5697_v13  ;;  %v1121_v34 = vsel %vm1120_vm4, %v5697_v13, %v5687_v27  ;;  %v1327_v47 = vpack.c.bf16 %v7479_v45, %v7476_v23  ;;  %v1322_v59 = vpack.c.bf16 %v6435_v58, %v6434_v48  ;;  %v6440_v54 = vld [vmem:[%s6797_s15 + $0x10] sm:$0xff]  ;;  %v6443_v25 = vld [vmem:[%s6797_s15 + $0x48] sm:$0xff] }
 0x12f   : > { %v1154_v6 = vpack.c.bf16 %v1126_v17, %v1125_v3  ;;  %5785 = vrot.lane.b32.xlu2 %v7405_v35, %s6644_s13  ;;  %v5849_v36 = vpack.i.bf16 %v6435_v58, %v6434_v48  ;;  %v1330_v13 = vpack.c.bf16 %v7429_v18, %v7426_v14  ;;  %v1324_v12 = vpack.c.bf16 %v6443_v25, %v6442_v7 }
 0x130   : > { %v7532_v3 = vpop.permute.xlu0 %5700 }
 0x132   : > { %5024 = vmatmul.msk.bf16.vlgmr.msrb.gmra.mxu2 %vm577_vm1, %v7262_v2  ;;  %v7530_v43 = vpop.permute.xlu2 %5710 }
 0x133   : > { %1260 = vmatpush.bf16.msrb.mxu2 %v1160_v52  ;;  %v6439_v52 = vld [vmem:[%s6797_s15 + $0xa0] sm:$0xff] }
 0x134   : > { %5023 = vmatmul.msk.bf16.gmra.mxu1 %vm577_vm1, %v7327_v60  ;;  %5026 = vmatmul.msk.bf16.vlgmr.msrb.gmra.mxu3 %vm577_vm1, %v7262_v2  ;;  %v1329_v55 = vpack.c.bf16 %v6439_v52, %v6438_v50  ;;  %v5844_v48 = vpack.i.bf16 %v6439_v52, %v6438_v50  ;;  %v7592_v50 = vld [vmem:[#allocation5 + $0x40] sm:$0xff] }
 0x135   : > { %1279 = vmatpush.bf16.msrb.mxu3 %v1161_v33 }
 0x137   : > { %1261 = vmatpush.bf16.msrb.mxu2 %v1154_v6  ;;  %5800 = vrot.lane.b32.xlu2 %v7433_v31, %s6644_s13 }
 0x138   : > { %v7557_v14 = vpop.permute.xlu0 %5715 }
 0x139   : > { %5021 = vmatmul.msk.bf16.gmra.mxu0 %vm577_vm1, %v7327_v60 }
 0x13a   : > { %v7561_v24 = vpop.permute.xlu2 %5725 }
 0x141   : > { %v7375_v9 = vpop.f32.mrf.mxu1 }
 0x142   : > { %5025 = vmatmul.msk.bf16.gmra.mxu2 %vm577_vm1, %v7327_v60 }
 0x144   : > { %5027 = vmatmul.msk.bf16.gmra.mxu3 %vm577_vm1, %v7327_v60  ;;  %5030 = vmatmul.msk.bf16.vlgmr.msra.gmra.mxu1 %vm577_vm1, %v7262_v2 }
 0x145   : > { %1374 = vmatpush.bf16.msra.mxu1 %v1328_v41 }
 0x146   : > { %v7391_v28 = vpop.f32.mrf.mxu0 }
 0x149   : > { %5028 = vmatmul.msk.bf16.vlgmr.msra.gmra.mxu0 %vm577_vm1, %v7262_v2  ;;  %v7395_v16 = vpop.f32.mrf.mxu1  ;;  %v1122_v2 = vsel %vm1120_vm4, %v5698_v1, %v5688_v21  ;;  %v7443_v21 = vpack.i.bf16 %v7439_v20, %v7436_v19  ;;  %1375 = vmatpush.bf16.msra.mxu1 %v1322_v59  ;;  %v1323_v1 = vpack.c.bf16 %v6441_v0, %v6440_v54 }
 0x14a   : > { %v1155_v15 = vpack.c.bf16 %v1122_v2, %v1121_v34  ;;  %1355 = vmatpush.bf16.msra.mxu0 %v1327_v47  ;;  %v7545_v34 = vpack.i.bf16 %v6443_v25, %v6442_v7  ;;  %v1332_v47 = vpack.c.bf16 %v7401_v11, %v7398_v62  ;;  %v7587_v62 = vpop.permute.xlu2 %5740 }
 0x14b   : > { %5805 = vrot.lane.b32.xlu0 %v7443_v21, %s6644_s13  ;;  %5825 = vrot.lane.b32.xlu1 %v7443_v21, %s6645_s10  ;;  %v10843_v7 = vunpack.i.h.bf16 %v7587_v62 }
 0x14c   : > { %1280 = vmatpush.bf16.msrb.mxu3 %v1155_v15 }
 0x14e   : > { %v7419_v49 = vpop.f32.mrf.mxu0  ;;  %1356 = vmatpush.bf16.msra.mxu0 %v1321_v51  ;;  %v7583_v51 = vpop.permute.xlu0 %5730 }
 0x151   : > { %v7423_v26 = vpop.f32.mrf.mxu1 }
 0x152   : > { %5040 = vmatmul.msk.bf16.vlgmr.msra.gmra.mxu2 %vm577_vm1, %v7417_v57 }
 0x153   : > { %5820 = vrot.lane.b32.xlu0 %v7433_v31, %s6645_s10  ;;  %1393 = vmatpush.bf16.msra.mxu2 %v1329_v55 }
 0x154   : > { %v7449_v27 = vpop.f32.mrf.mxu2  ;;  %5031 = vmatmul.msk.bf16.gmra.mxu1 %vm577_vm1, %v7327_v60  ;;  %5042 = vmatmul.msk.bf16.vlgmr.msra.gmra.mxu3 %vm577_vm1, %v7417_v57 }
 0x155   : > { %1412 = vmatpush.bf16.msra.mxu3 %v1330_v13  ;;  %5840 = vrot.lane.b32.xlu1 %v5839_v61, %s6645_s10 }
 0x156   : > { %v7455_v29 = vpop.f32.mrf.mxu0 }
 0x157   : > { %v7457_v30 = vpop.f32.mrf.mxu3  ;;  %1394 = vmatpush.bf16.msra.mxu2 %v1323_v1 }
 0x159   : > { %5029 = vmatmul.msk.bf16.gmra.mxu0 %vm577_vm1, %v7327_v60  ;;  %v7461_v37 = vpop.f32.mrf.mxu1  ;;  %v7497_v60 = vpack.i.bf16 %v7493_v32, %v7490_v39  ;;  %1413 = vmatpush.bf16.msra.mxu3 %v1324_v12  ;;  %v5727_v12 = vunpack.i.l.bf16 %v7561_v24 }
 0x15b   : > { %10890 = vst [vmem:[#allocation15_spill] sm:$0xff] %v7497_v60  ;;  %5835 = vrot.lane.b32.xlu0 %v7497_v60, %s6645_s10  ;;  %5815 = vrot.lane.b32.xlu2 %v7497_v60, %s6644_s13 }
 0x15c   : > { %v7467_v22 = vpop.f32.mrf.mxu2 }
 0x15e   : > { %v7471_v4 = vpop.f32.mrf.mxu0 }
 0x15f   : > { %v7473_v44 = vpop.f32.mrf.mxu3 }
 0x161   : > { %v7487_v46 = vpop.f32.mrf.mxu1 }
 0x162   : > { %5041 = vmatmul.msk.bf16.gmra.mxu2 %vm577_vm1, %v7469_v42 }
 0x163   : > { %5850 = vrot.lane.b32.xlu0 %v5849_v36, %s6645_s10  ;;  %5830 = vrot.lane.b32.xlu2 %v7545_v34, %s6645_s10 }
 0x164   : > { %v7499_v5 = vpop.f32.mrf.mxu2  ;;  %5043 = vmatmul.msk.bf16.gmra.mxu3 %vm577_vm1, %v7469_v42  ;;  %5046 = vmatmul.msk.bf16.vlgmr.msrb.gmra.mxu1 %vm577_vm1, %v7417_v57 }
 0x165   : > { %1450 = vmatpush.bf16.msrb.mxu1 %v1332_v47 }
 0x166   : > { %v7509_v10 = vpop.f32.mrf.mxu0 }
 0x167   : > { %v7511_v56 = vpop.f32.mrf.mxu3 }
 0x169   : > { %5044 = vmatmul.msk.bf16.vlgmr.msrb.gmra.mxu0 %vm577_vm1, %v7417_v57  ;;  %v7517_v63 = vpop.f32.mrf.mxu1 }
 0x16b   : > { %5865 = vrot.lane.b32.xlu0 %v5839_v61, %s6646_s21  ;;  %5845 = vrot.lane.b32.xlu2 %v5844_v48, %s6645_s10 }
 0x16c   : > { %v7521_v53 = vpop.f32.mrf.mxu2 }
 0x16e   : > { %v7534_v17 = vpop.f32.mrf.mxu0 }
 0x16f   : > { %v7536_v6 = vpop.f32.mrf.mxu3 }
 0x171   : > { %v7542_v33 = vpop.f32.mrf.mxu1 }
 0x172   : > { %5048 = vmatmul.msk.bf16.vlgmr.msrb.gmra.mxu2 %vm577_vm1, %v7417_v57 }
 0x173   : > { %5880 = vrot.lane.b32.xlu0 %v5849_v36, %s6646_s21  ;;  %v6444_v36 = vld [vmem:[%s6797_s15 + $0x28] sm:$0xff] }
 0x174   : > { %v723_v2 = vpop.f32.mrf.mxu2  ;;  %5047 = vmatmul.msk.bf16.gmra.mxu1 %vm577_vm1, %v7469_v42  ;;  %5050 = vmatmul.msk.bf16.vlgmr.msrb.gmra.mxu3 %vm577_vm1, %v7417_v57  ;;  %v7566_v57 = vpack.i.bf16 %v6441_v0, %v6440_v54  ;;  %v6445_v0 = vld [vmem:[%s6797_s15 + $0x58] sm:$0xff] }
 0x175   : > { %v7552_v15 = vadd.f32 %v723_v2, %v7391_v28  ;;  %v1326_v1 = vpack.c.bf16 %v6445_v0, %v6444_v36  ;;  %v7607_v61 = vpack.i.bf16 %v6445_v0, %v6444_v36  ;;  %v7643_v36 = vpop.permute.xlu2 %5755 }
 0x176   : > { %v7559_v18 = vpop.f32.mrf.mxu0  ;;  %5855 = vrot.lane.b32.xlu1 %v7566_v57, %s6645_s10  ;;  %v10841_v0 = vunpack.i.l.bf16 %v7643_v36 }
 0x177   : > { %v742_v38 = vpop.f32.mrf.mxu3  ;;  %1451 = vmatpush.bf16.msrb.mxu1 %v1326_v1 }
 0x178   : > { %v7564_v41 = vadd.f32 %v742_v38, %v7375_v9  ;;  %v7576_v9 = vpop.permute.xlu1 %5705  ;;  %v7628_v38 = vpop.permute.xlu0 %5745 }
 0x179   : > { %5045 = vmatmul.msk.bf16.gmra.mxu0 %vm577_vm1, %v7469_v42  ;;  %v7570_v28 = vpop.f32.mrf.mxu1 }
 0x17b   : > { %5895 = vrot.lane.b32.xlu0 %v7607_v61, %s6645_s10 }
 0x17c   : > { %v725_v58 = vpop.f32.mrf.mxu2 }
 0x17d   : > { %v7579_v59 = vadd.f32 %v725_v58, %v7419_v49  ;;  %v1331_v49 = vpack.c.bf16 %v7439_v20, %v7436_v19  ;;  %v5728_v20 = vunpack.i.h.bf16 %v7561_v24 }
 0x17e   : > { %v7585_v55 = vpop.f32.mrf.mxu0  ;;  %5870 = vrot.lane.b32.xlu1 %v5844_v48, %s6646_s21  ;;  %v5703_v48 = vunpack.i.h.bf16 %v7532_v3 }
 0x17f   : > { %v744_v54 = vpop.f32.mrf.mxu3  ;;  %1431 = vmatpush.bf16.msrb.mxu0 %v1331_v49  ;;  %v5732_v49 = vunpack.i.l.bf16 %v7583_v51 }
 0x180   : > { %v7590_v11 = vadd.f32 %v744_v54, %v7395_v16  ;;  %v7605_v16 = vpack.i.bf16 %v7479_v45, %v7476_v23  ;;  %v5721_v23 = vpop.permute.xlu1 %5720  ;;  %v1325_v45 = vpack.c.bf16 %v7493_v32, %v7490_v39  ;;  %v5702_v39 = vunpack.i.l.bf16 %v7532_v3 }
 0x181   : > { %v780_v52 = vpop.f32.mrf.mxu1  ;;  %v5722_v2 = vunpack.i.l.bf16 %v5721_v23  ;;  %v5707_v32 = vunpack.i.l.bf16 %v7576_v9  ;;  %v5733_v54 = vunpack.i.h.bf16 %v7583_v51 }
 0x182   : > { %5049 = vmatmul.msk.bf16.gmra.mxu2 %vm577_vm1, %v7469_v42  ;;  %v7601_v13 = vadd.f32 %v780_v52, %v7457_v30  ;;  %v10842_v30 = vunpack.i.l.bf16 %v7587_v62  ;;  %5860 = vrot.lane.b32.xlu2 %v7605_v16, %s6645_s10 }
 0x183   : > { %1432 = vmatpush.bf16.msrb.mxu0 %v1325_v45  ;;  %v1546_v45 = vsel %vm1535_vm5, %v5727_v12, %v5702_v39  ;;  %5910 = vrot.lane.b32.xlu0 %v7369_v8, %s6646_s21 }
 0x184   : > { %5051 = vmatmul.msk.bf16.gmra.mxu3 %vm577_vm1, %v7469_v42  ;;  %5062 = vmatmul.msk.bf16.vlgmr.msra.gmra.mxu1 %vm577_vm1, %v7592_v50  ;;  %v5723_v42 = vunpack.i.h.bf16 %v5721_v23 }
 0x185   : > { %v728_v19 = vpop.f32.mrf.mxu2 }
 0x186   : > { %v7621_v25 = vadd.f32 %v728_v19, %v7455_v29  ;;  %v761_v47 = vpop.f32.mrf.mxu0  ;;  %v5708_v29 = vunpack.i.h.bf16 %v7576_v9  ;;  %v1555_v52 = vsel %vm1535_vm5, %v10843_v7, %v5723_v42  ;;  %v10840_v9 = vunpack.i.h.bf16 %v7643_v36  ;;  %5885 = vrot.lane.b32.xlu1 %v7566_v57, %s6646_s21 }
 0x187   : > { %v7635_v24 = vadd.f32 %v761_v47, %v7449_v27  ;;  %v747_v58 = vpop.f32.mrf.mxu3  ;;  %v1554_v27 = vsel %vm1535_vm5, %v10842_v30, %v5722_v2  ;;  %v1551_v1 = vsel %vm1535_vm5, %v5723_v42, %v5728_v20  ;;  %v1552_v47 = vsel %vm1535_vm5, %v10841_v0, %v5732_v49  ;;  %v7687_v30 = vpop.permute.xlu0 %5760 }
 0x188   : > { %v7646_v3 = vadd.f32 %v747_v58, %v7423_v26  ;;  %v1550_v26 = vsel %vm1535_vm5, %v5722_v2, %v5727_v12  ;;  %v1571_v19 = vpack.c.bf16 %v1555_v52, %v1554_v27  ;;  %v1553_v42 = vsel %vm1535_vm5, %v10840_v9, %v5733_v54  ;;  %v5736_v58 = vpop.permute.xlu1 %5735 }
 0x189   : > { %5060 = vmatmul.msk.bf16.vlgmr.msra.gmra.mxu0 %vm577_vm1, %v7592_v50  ;;  %v782_v51 = vpop.f32.mrf.mxu1  ;;  %v1543_v12 = vsel %vm1535_vm5, %v5703_v48, %v5708_v29  ;;  %v1565_v57 = vpack.c.bf16 %v1553_v42, %v1552_v47  ;;  %v1572_v52 = vpack.c.bf16 %v1551_v1, %v1550_v26  ;;  %v5737_v9 = vunpack.i.l.bf16 %v5736_v58 }
 0x18a   : > { %v7661_v23 = vadd.f32 %v782_v51, %v7473_v44  ;;  %1599 = vmatpush.bf16.msrb.mxu2 %v1571_v19  ;;  %v1547_v44 = vsel %vm1535_vm5, %v5728_v20, %v5703_v48  ;;  %v1542_v51 = vsel %vm1535_vm5, %v5702_v39, %v5707_v32  ;;  %5875 = vrot.lane.b32.xlu2 %v7369_v8, %s6645_s10  ;;  %v5738_v19 = vunpack.i.h.bf16 %v5736_v58  ;;  %v5771_v39 = vpop.permute.xlu2 %5770 }
 0x18b   : > { %v5713_v0 = vunpack.i.h.bf16 %v7530_v43  ;;  %1618 = vmatpush.bf16.msrb.mxu3 %v1572_v52  ;;  %v5712_v48 = vunpack.i.l.bf16 %v7530_v43  ;;  %v5717_v26 = vunpack.i.l.bf16 %v7557_v14  ;;  %v1573_v47 = vpack.c.bf16 %v1547_v44, %v1546_v45  ;;  %5925 = vrot.lane.b32.xlu0 %v7443_v21, %s6646_s21 }
 0x18c   : > { %v5773_v58 = vunpack.i.h.bf16 %v5771_v39  ;;  %v5772_v7 = vunpack.i.l.bf16 %v5771_v39  ;;  %v1574_v60 = vpack.c.bf16 %v1543_v12, %v1542_v51  ;;  %v1548_v52 = vsel %vm1535_vm5, %v5732_v49, %v5737_v9 }
 0x18d   : > { %v730_v2 = vpop.f32.mrf.mxu2  ;;  %1637 = vmatpush.bf16.msra.mxu0 %v1573_v47  ;;  %v1549_v45 = vsel %vm1535_vm5, %v5733_v54, %v5738_v19  ;;  %v10891_v44 = vunpack.i.h.bf16 %v7587_v62  ;;  %v10892_v49 = vunpack.i.l.bf16 %v7587_v62  ;;  %v1545_v62 = vsel %vm1535_vm5, %v5738_v19, %v5713_v0 }
 0x18e   : > { %v7680_v27 = vadd.f32 %v730_v2, %v7471_v4  ;;  %v763_v20 = vpop.f32.mrf.mxu0  ;;  %1600 = vmatpush.bf16.msrb.mxu2 %v1565_v57  ;;  %v7697_v2 = vld [vmem:[#allocation5 + $0x48] sm:$0xff]  ;;  %v1538_v57 = vsel %vm1535_vm5, %v5707_v32, %v5772_v7  ;;  %1656 = vmatpush.bf16.msra.mxu1 %v1574_v60  ;;  %v5748_v8 = vunpack.i.h.bf16 %v7628_v38 }
 0x18f   : > { %v7691_v1 = vadd.f32 %v763_v20, %v7467_v22  ;;  %v749_v4 = vpop.f32.mrf.mxu3  ;;  %v5718_v22 = vunpack.i.h.bf16 %v7557_v14  ;;  %v1559_v12 = vsel %vm1535_vm5, %v5773_v58, %v10891_v44  ;;  %v1539_v14 = vsel %vm1535_vm5, %v5708_v29, %v5773_v58  ;;  %5900 = vrot.lane.b32.xlu1 %v7605_v16, %s6646_s21 }
 0x190   : > { %v7695_v42 = vadd.f32 %v749_v4, %v7461_v37  ;;  %v1558_v54 = vsel %vm1535_vm5, %v5772_v7, %v10892_v49  ;;  %v1575_v51 = vpack.c.bf16 %v1539_v14, %v1538_v57  ;;  %v1544_v20 = vsel %vm1535_vm5, %v5737_v9, %v5712_v48  ;;  %v7743_v19 = vpop.permute.xlu1 %5750 }
 0x191   : > { %v785_v43 = vpop.f32.mrf.mxu1  ;;  %v1576_v60 = vpack.c.bf16 %v1559_v12, %v1558_v54  ;;  %v1540_v7 = vsel %vm1535_vm5, %v5712_v48, %v5717_v26  ;;  %v1567_v29 = vpack.c.bf16 %v1545_v62, %v1544_v20  ;;  %v1541_v32 = vsel %vm1535_vm5, %v5713_v0, %v5718_v22  ;;  %v5776_v48 = vpop.permute.xlu0 %5775 }
 0x192   : > { %5064 = vmatmul.msk.bf16.vlgmr.msra.gmra.mxu2 %vm577_vm1, %v7592_v50  ;;  %v7707_v37 = vadd.f32 %v785_v43, %v7511_v56  ;;  %v1566_v56 = vpack.c.bf16 %v1549_v45, %v1548_v52  ;;  %v1568_v39 = vpack.c.bf16 %v1541_v32, %v1540_v7  ;;  %5890 = vrot.lane.b32.xlu2 %v7405_v35, %s6645_s10  ;;  %v5778_v43 = vunpack.i.h.bf16 %v5776_v48 }
 0x193   : > { %1675 = vmatpush.bf16.msra.mxu2 %v1575_v51  ;;  %1638 = vmatpush.bf16.msra.mxu0 %v1567_v29  ;;  %v5777_v52 = vunpack.i.l.bf16 %v5776_v48  ;;  %v5753_v62 = vunpack.i.h.bf16 %v7743_v19  ;;  %v5752_v7 = vunpack.i.l.bf16 %v7743_v19 }
 0x194   : > { %5063 = vmatmul.msk.bf16.gmra.mxu1 %vm577_vm1, %v7697_v2  ;;  %5066 = vmatmul.msk.bf16.vlgmr.msra.gmra.mxu3 %vm577_vm1, %v7592_v50 }
 0x195   : > { %v799_v4 = vpop.f32.mrf.mxu2  ;;  %1619 = vmatpush.bf16.msrb.mxu3 %v1566_v56  ;;  %1657 = vmatpush.bf16.msra.mxu1 %v1568_v39  ;;  %v1536_v45 = vsel %vm1535_vm5, %v5717_v26, %v5777_v52 }
 0x196   : > { %v7734_v16 = vadd.f32 %v799_v4, %v7509_v10  ;;  %v766_v9 = vpop.f32.mrf.mxu0 }
 0x197   : > { %v7739_v47 = vadd.f32 %v766_v9, %v7499_v5  ;;  %v818_v58 = vpop.f32.mrf.mxu3  ;;  %5915 = vrot.lane.b32.xlu1 %v7607_v61, %s6646_s21  ;;  %v10894_v9 = vunpack.i.h.bf16 %v7643_v36 }
 0x198   : > { %v7746_v10 = vadd.f32 %v818_v58, %v7487_v46  ;;  %v1537_v46 = vsel %vm1535_vm5, %v5718_v22, %v5778_v43  ;;  %v7765_v54 = vpop.permute.xlu1 %5765  ;;  %v7786_v22 = vpop.permute.xlu2 %5785 }
 0x199   : > { %1694 = vmatpush.bf16.msra.mxu3 %v1576_v60  ;;  %5061 = vmatmul.msk.bf16.gmra.mxu0 %vm577_vm1, %v7697_v2  ;;  %v787_v0 = vpop.f32.mrf.mxu1  ;;  %v1569_v12 = vpack.c.bf16 %v1537_v46, %v1536_v45  ;;  %v1557_v39 = vsel %vm1535_vm5, %v5778_v43, %v10894_v9  ;;  %v1795_v46 = vsel %vm1779_vm6, %v5748_v8, %v5753_v62 }
 0x19a   : > { %v7751_v5 = vadd.f32 %v787_v0, %v7536_v6  ;;  %5905 = vrot.lane.b32.xlu2 %v7405_v35, %s6646_s21  ;;  %v7829_v0 = vld [vmem:[#allocation5 + $0x50] sm:$0xff] }
 0x19b   : > { %1676 = vmatpush.bf16.msra.mxu2 %v1569_v12 }
 0x19d   : > { %v801_v44 = vpop.f32.mrf.mxu2 }
 0x19e   : > { %v7760_v57 = vadd.f32 %v801_v44, %v7534_v17  ;;  %v768_v14 = vpop.f32.mrf.mxu0 }
 0x19f   : > { %v7763_v49 = vadd.f32 %v768_v14, %v7521_v53  ;;  %v820_v6 = vpop.f32.mrf.mxu3  ;;  %5930 = vrot.lane.b32.xlu1 %v7545_v34, %s6646_s21 }
 0x1a0   : > { %v7768_v61 = vadd.f32 %v820_v6, %v7517_v63  ;;  %v7794_v20 = vpop.permute.xlu1 %5780  ;;  %v7831_v45 = vpop.permute.xlu2 %5800 }
 0x1a1   : > { %v962_v26 = vpop.f32.mrf.mxu1  ;;  %v5782_v60 = vunpack.i.l.bf16 %v7794_v20  ;;  %v5803_v43 = vunpack.i.h.bf16 %v7831_v45 }
 0x1a2   : > { %5065 = vmatmul.msk.bf16.gmra.mxu2 %vm577_vm1, %v7697_v2  ;;  %v7775_v17 = vadd.f32 %v962_v26, %v7564_v41  ;;  %v5747_v41 = vunpack.i.l.bf16 %v7628_v38  ;;  %5920 = vrot.lane.b32.xlu2 %v7433_v31, %s6646_s21 }
 0x1a3   : > { %v1791_v26 = vsel %vm1779_vm6, %v5753_v62, %v5803_v43 }
 0x1a4   : > { %5067 = vmatmul.msk.bf16.gmra.mxu3 %vm577_vm1, %v7697_v2  ;;  %5070 = vmatmul.msk.bf16.vlgmr.msrb.gmra.mxu1 %vm577_vm1, %v7592_v50  ;;  %v1798_v29 = vsel %vm1779_vm6, %v5782_v60, %v5747_v41 }
 0x1a5   : > { %v804_v53 = vpop.f32.mrf.mxu2 }
 0x1a6   : > { %v7784_v63 = vadd.f32 %v804_v53, %v7559_v18  ;;  %v943_v51 = vpop.f32.mrf.mxu0  ;;  %v5783_v18 = vunpack.i.h.bf16 %v7794_v20 }
 0x1a7   : > { %v7791_v56 = vadd.f32 %v943_v51, %v7552_v15  ;;  %v823_v34 = vpop.f32.mrf.mxu3  ;;  %v7861_v51 = vpop.permute.xlu0 %5790 }
 0x1a8   : > { %v7797_v4 = vadd.f32 %v823_v34, %v7542_v33  ;;  %v1799_v33 = vsel %vm1779_vm6, %v5783_v18, %v5748_v8  ;;  %v7842_v12 = vpop.permute.xlu1 %5795  ;;  %v5762_v34 = vunpack.i.l.bf16 %v7687_v30  ;;  %v5793_v62 = vunpack.i.h.bf16 %v7861_v51 }
 0x1a9   : > { %5068 = vmatmul.msk.bf16.vlgmr.msrb.gmra.mxu0 %vm577_vm1, %v7592_v50  ;;  %v964_v38 = vpop.f32.mrf.mxu1  ;;  %v1815_v32 = vpack.c.bf16 %v1799_v33, %v1798_v29  ;;  %v10893_v50 = vunpack.i.l.bf16 %v7643_v36  ;;  %v1794_v36 = vsel %vm1779_vm6, %v5747_v41, %v5752_v7  ;;  %v5763_v41 = vunpack.i.h.bf16 %v7687_v30 }
 0x1aa   : > { %v7805_v15 = vadd.f32 %v964_v38, %v7590_v11  ;;  %v1816_v8 = vpack.c.bf16 %v1795_v46, %v1794_v36  ;;  %v5767_v38 = vunpack.i.l.bf16 %v7765_v54  ;;  %v5768_v30 = vunpack.i.h.bf16 %v7765_v54 }
 0x1ab   : > { %v1556_v11 = vsel %vm1535_vm5, %v5777_v52, %v10893_v50  ;;  %1843 = vmatpush.bf16.msrb.mxu0 %v1815_v32  ;;  %v5802_v52 = vunpack.i.l.bf16 %v7831_v45  ;;  %v5797_v20 = vunpack.i.l.bf16 %v7842_v12 }
 0x1ac   : > { %v1570_v19 = vpack.c.bf16 %v1557_v39, %v1556_v11  ;;  %1862 = vmatpush.bf16.msrb.mxu1 %v1816_v8  ;;  %v1792_v54 = vsel %vm1779_vm6, %v5762_v34, %v5767_v38  ;;  %v1793_v46 = vsel %vm1779_vm6, %v5763_v41, %v5768_v30 }
 0x1ad   : > { %v806_v58 = vpop.f32.mrf.mxu2  ;;  %v1790_v6 = vsel %vm1779_vm6, %v5752_v7, %v5802_v52  ;;  %v5792_v7 = vunpack.i.l.bf16 %v7861_v51 }
 0x1ae   : > { %v7827_v48 = vadd.f32 %v806_v58, %v7585_v55  ;;  %v945_v35 = vpop.f32.mrf.mxu0  ;;  %1695 = vmatpush.bf16.msra.mxu3 %v1570_v19  ;;  %v1817_v53 = vpack.c.bf16 %v1791_v26, %v1790_v6  ;;  %v5788_v19 = vunpack.i.h.bf16 %v7786_v22 }
 0x1af   : > { %v7840_v55 = vadd.f32 %v945_v35, %v7579_v59  ;;  %v825_v44 = vpop.f32.mrf.mxu3  ;;  %v1796_v11 = vsel %vm1779_vm6, %v5792_v7, %v5762_v34  ;;  %v5787_v35 = vunpack.i.l.bf16 %v7786_v22 }
 0x1b0   : > { %v7845_v14 = vadd.f32 %v825_v44, %v7570_v28  ;;  %v7882_v50 = vpop.permute.xlu1 %5810 }
 0x1b1   : > { %v967_v59 = vpop.f32.mrf.mxu1  ;;  %v5813_v21 = vunpack.i.h.bf16 %v7882_v50  ;;  %v1802_v8 = vsel %vm1779_vm6, %v5787_v35, %v5782_v60 }
 0x1b2   : > { %5080 = vmatmul.msk.bf16.vlgmr.msrb.gmra.mxu2 %vm577_vm1, %v7829_v0  ;;  %v7859_v28 = vadd.f32 %v967_v59, %v7646_v3 }
 0x1b3   : > { %1881 = vmatpush.bf16.msrb.mxu2 %v1817_v53  ;;  %v1803_v53 = vsel %vm1779_vm6, %v5788_v19, %v5783_v18 }
 0x1b4   : > { %5071 = vmatmul.msk.bf16.gmra.mxu1 %vm577_vm1, %v7697_v2  ;;  %5082 = vmatmul.msk.bf16.vlgmr.msrb.gmra.mxu3 %vm577_vm1, %v7829_v0 }
 0x1b5   : > { %v981_v33 = vpop.f32.mrf.mxu2 }
 0x1b6   : > { %v7874_v3 = vadd.f32 %v981_v33, %v7635_v24  ;;  %v948_v29 = vpop.f32.mrf.mxu0  ;;  %v1797_v24 = vsel %vm1779_vm6, %v5793_v62, %v5763_v41  ;;  %v1820_v33 = vpack.c.bf16 %v1803_v53, %v1802_v8 }
 0x1b7   : > { %v7880_v31 = vadd.f32 %v948_v29, %v7621_v25  ;;  %v1000_v32 = vpop.f32.mrf.mxu3  ;;  %v5812_v25 = vunpack.i.l.bf16 %v7882_v50  ;;  %v1809_v39 = vpack.c.bf16 %v1797_v24, %v1796_v11 }
 0x1b8   : > { %v7893_v9 = vadd.f32 %v1000_v32, %v7601_v13  ;;  %v1810_v13 = vpack.c.bf16 %v1793_v46, %v1792_v54  ;;  %v5816_v32 = vpop.permute.xlu2 %5815 }
 0x1b9   : > { %5069 = vmatmul.msk.bf16.gmra.mxu0 %vm577_vm1, %v7697_v2  ;;  %v969_v58 = vpop.f32.mrf.mxu1  ;;  %v1788_v44 = vsel %vm1779_vm6, %v5767_v38, %v5812_v25  ;;  %v1789_v2 = vsel %vm1779_vm6, %v5768_v30, %v5813_v21 }
 0x1ba   : > { %v7904_v36 = vadd.f32 %v969_v58, %v7695_v42  ;;  %1844 = vmatpush.bf16.msrb.mxu0 %v1809_v39  ;;  %v1811_v6 = vpack.c.bf16 %v1789_v2, %v1788_v44  ;;  %1863 = vmatpush.bf16.msrb.mxu1 %v1810_v13  ;;  %v7917_v42 = vld [vmem:[#allocation5 + $0x58] sm:$0xff]  ;;  %v1800_v39 = vsel %vm1779_vm6, %v5797_v20, %v5792_v7  ;;  %v5818_v44 = vunpack.i.h.bf16 %v5816_v32 }
 0x1bb   : > { %v5817_v2 = vunpack.i.l.bf16 %v5816_v32 }
 0x1bc   : > { %1882 = vmatpush.bf16.msrb.mxu2 %v1811_v6  ;;  %v1785_v53 = vsel %vm1779_vm6, %v5813_v21, %v5818_v44 }
 0x1bd   : > { %v983_v22 = vpop.f32.mrf.mxu2  ;;  %v5806_v60 = vpop.permute.xlu0 %5805 }
 0x1be   : > { %v7915_v26 = vadd.f32 %v983_v22, %v7691_v1  ;;  %v950_v59 = vpop.f32.mrf.mxu0  ;;  %v5807_v11 = vunpack.i.l.bf16 %v5806_v60 }
 0x1bf   : > { %v7928_v41 = vadd.f32 %v950_v59, %v7680_v27  ;;  %v1002_v34 = vpop.f32.mrf.mxu3  ;;  %v5798_v27 = vunpack.i.h.bf16 %v7842_v12 }
 0x1c0   : > { %v7931_v1 = vadd.f32 %v1002_v34, %v7661_v23  ;;  %v1782_v46 = vsel %vm1779_vm6, %v5807_v11, %v5787_v35  ;;  %v7982_v59 = vpop.permute.xlu2 %5830 }
 0x1c1   : > { %v1038_v38 = vpop.f32.mrf.mxu1 }
 0x1c2   : > { %5081 = vmatmul.msk.bf16.gmra.mxu2 %vm577_vm1, %v7917_v42  ;;  %v7936_v30 = vadd.f32 %v1038_v38, %v7746_v10  ;;  %v5808_v10 = vunpack.i.h.bf16 %v5806_v60  ;;  %v10895_v38 = vld [vmem:[#allocation15_spill] sm:$0xff] }
 0x1c3   : > { %5935 = vrot.lane.b32.xlu2 %v10895_v38, %s6646_s21 }
 0x1c4   : > { %5083 = vmatmul.msk.bf16.gmra.mxu3 %vm577_vm1, %v7917_v42  ;;  %5086 = vmatmul.msk.bf16.vlgmr.msra.gmra.mxu1 %vm577_vm1, %v7829_v0  ;;  %v1787_v12 = vsel %vm1779_vm6, %v5803_v43, %v5808_v10 }
 0x1c5   : > { %v986_v18 = vpop.f32.mrf.mxu2  ;;  %1938 = vmatpush.bf16.msra.mxu1 %v1820_v33  ;;  %v5821_v22 = vpop.permute.xlu0 %5820 }
 0x1c6   : > { %v7944_v23 = vadd.f32 %v986_v18, %v7739_v47  ;;  %v1019_v29 = vpop.f32.mrf.mxu0  ;;  %v1783_v47 = vsel %vm1779_vm6, %v5808_v10, %v5788_v19  ;;  %v1801_v19 = vsel %vm1779_vm6, %v5798_v27, %v5793_v62  ;;  %v5823_v10 = vunpack.i.h.bf16 %v5821_v22 }
 0x1c7   : > { %v7948_v24 = vadd.f32 %v1019_v29, %v7734_v16  ;;  %v1005_v54 = vpop.f32.mrf.mxu3  ;;  %v1819_v7 = vpack.c.bf16 %v1783_v47, %v1782_v46  ;;  %v1814_v35 = vpack.c.bf16 %v1801_v19, %v1800_v39 }
 0x1c8   : > { %v7953_v58 = vadd.f32 %v1005_v54, %v7707_v37  ;;  %v1786_v37 = vsel %vm1779_vm6, %v5802_v52, %v5807_v11  ;;  %v5846_v33 = vpop.permute.xlu2 %5845  ;;  %v5822_v11 = vunpack.i.l.bf16 %v5821_v22  ;;  %v8026_v54 = vpop.permute.xlu1 %5825 }
 0x1c9   : > { %5084 = vmatmul.msk.bf16.vlgmr.msra.gmra.mxu0 %vm577_vm1, %v7829_v0  ;;  %v1040_v16 = vpop.f32.mrf.mxu1  ;;  %v1818_v13 = vpack.c.bf16 %v1787_v12, %v1786_v37  ;;  %1939 = vmatpush.bf16.msra.mxu1 %v1814_v35  ;;  %v5828_v47 = vunpack.i.h.bf16 %v8026_v54  ;;  %v5847_v35 = vunpack.i.l.bf16 %v5846_v33 }
 0x1ca   : > { %v7974_v43 = vadd.f32 %v1040_v16, %v7768_v61  ;;  %1919 = vmatpush.bf16.msra.mxu0 %v1819_v7  ;;  %v1784_v61 = vsel %vm1779_vm6, %v5812_v25, %v5817_v2  ;;  %v8050_v7 = vld [vmem:[#allocation5 + $0x60] sm:$0xff] }
 0x1cb   : > { %1900 = vmatpush.bf16.msrb.mxu3 %v1818_v13  ;;  %v1812_v8 = vpack.c.bf16 %v1785_v53, %v1784_v61  ;;  %v2031_v46 = vsel %vm2023_vm7, %v5823_v10, %v5828_v47  ;;  %v5848_v13 = vunpack.i.h.bf16 %v5846_v33 }
 0x1cd   : > { %v988_v6 = vpop.f32.mrf.mxu2  ;;  %v8015_v60 = vpop.permute.xlu0 %5835 }
 0x1ce   : > { %v7977_v45 = vadd.f32 %v988_v6, %v7763_v49  ;;  %v1021_v52 = vpop.f32.mrf.mxu0  ;;  %v2034_v6 = vsel %vm2023_vm7, %v5847_v35, %v5822_v11 }
 0x1cf   : > { %v7980_v51 = vadd.f32 %v1021_v52, %v7760_v57  ;;  %v1007_v62 = vpop.f32.mrf.mxu3  ;;  %1901 = vmatpush.bf16.msrb.mxu3 %v1812_v8 }
 0x1d0   : > { %v7993_v49 = vadd.f32 %v1007_v62, %v7751_v5  ;;  %v5841_v61 = vpop.permute.xlu1 %5840 }
 0x1d1   : > { %v1043_v57 = vpop.f32.mrf.mxu1  ;;  %v5843_v53 = vunpack.i.h.bf16 %v5841_v61 }
 0x1d2   : > { %5088 = vmatmul.msk.bf16.vlgmr.msra.gmra.mxu2 %vm577_vm1, %v7829_v0  ;;  %v7998_v34 = vadd.f32 %v1043_v57, %v7797_v4  ;;  %v5842_v57 = vunpack.i.l.bf16 %v5841_v61  ;;  %v5838_v61 = vunpack.i.h.bf16 %v8015_v60 }
 0x1d3   : > { %v2039_v33 = vsel %vm2023_vm7, %v5843_v53, %v5848_v13 }
 0x1d4   : > { %5087 = vmatmul.msk.bf16.gmra.mxu1 %vm577_vm1, %v7917_v42  ;;  %5090 = vmatmul.msk.bf16.vlgmr.msra.gmra.mxu3 %vm577_vm1, %v7829_v0  ;;  %v1780_v0 = vsel %vm1779_vm6, %v5817_v2, %v5797_v20  ;;  %v5827_v20 = vunpack.i.l.bf16 %v8026_v54 }
 0x1d5   : > { %v1187_v25 = vpop.f32.mrf.mxu2 }
 0x1d6   : > { %v8007_v5 = vadd.f32 %v1187_v25, %v7791_v56  ;;  %v1024_v50 = vpop.f32.mrf.mxu0  ;;  %v1781_v56 = vsel %vm1779_vm6, %v5818_v44, %v5798_v27 }
 0x1d7   : > { %v8010_v21 = vadd.f32 %v1024_v50, %v7784_v63  ;;  %v1206_v4 = vpop.f32.mrf.mxu3  ;;  %v1813_v32 = vpack.c.bf16 %v1781_v56, %v1780_v0 }
 0x1d8   : > { %v8013_v18 = vadd.f32 %v1206_v4, %v7775_v17 }
 0x1d9   : > { %5085 = vmatmul.msk.bf16.gmra.mxu0 %vm577_vm1, %v7917_v42  ;;  %v1045_v29 = vpop.f32.mrf.mxu1 }
 0x1da   : > { %v8024_v63 = vadd.f32 %v1045_v29, %v7845_v14  ;;  %1920 = vmatpush.bf16.msra.mxu0 %v1813_v32  ;;  %v2038_v29 = vsel %vm2023_vm7, %v5842_v57, %v5847_v35 }
 0x1db   : > { %v2060_v32 = vpack.c.bf16 %v2039_v33, %v2038_v29 }
 0x1dc   : > { %v8045_v16 = vpop.permute.xlu2 %5860 }
 0x1dd   : > { %v1189_v17 = vpop.f32.mrf.mxu2  ;;  %v5863_v52 = vunpack.i.h.bf16 %v8045_v16  ;;  %v5862_v62 = vunpack.i.l.bf16 %v8045_v16  ;;  %2106 = vmatpush.bf16.msra.mxu3 %v2060_v32 }
 0x1de   : > { %v8029_v39 = vadd.f32 %v1189_v17, %v7840_v55  ;;  %v1026_v12 = vpop.f32.mrf.mxu0  ;;  %v2030_v55 = vsel %vm2023_vm7, %v5822_v11, %v5827_v20 }
 0x1df   : > { %v8035_v14 = vadd.f32 %v1026_v12, %v7827_v48  ;;  %v1208_v27 = vpop.f32.mrf.mxu3  ;;  %v5851_v48 = vpop.permute.xlu0 %5850  ;;  %v2062_v44 = vpack.c.bf16 %v2031_v46, %v2030_v55 }
 0x1e0   : > { %v8048_v37 = vadd.f32 %v1208_v27, %v7805_v15  ;;  %v2035_v15 = vsel %vm2023_vm7, %v5848_v13, %v5823_v10  ;;  %v5853_v25 = vunpack.i.h.bf16 %v5851_v48  ;;  %v5852_v50 = vunpack.i.l.bf16 %v5851_v48 }
 0x1e1   : > { %v1244_v19 = vpop.f32.mrf.mxu1  ;;  %v2061_v38 = vpack.c.bf16 %v2035_v15, %v2034_v6  ;;  %v5833_v6 = vunpack.i.h.bf16 %v7982_v59  ;;  %v5832_v15 = vunpack.i.l.bf16 %v7982_v59  ;;  %v8124_v59 = vld [vmem:[#allocation5 + $0x68] sm:$0xff] }
 0x1e2   : > { %5089 = vmatmul.msk.bf16.gmra.mxu2 %vm577_vm1, %v7917_v42  ;;  %v8055_v2 = vadd.f32 %v1244_v19, %v7893_v9 }
 0x1e4   : > { %5091 = vmatmul.msk.bf16.gmra.mxu3 %vm577_vm1, %v7917_v42  ;;  %5102 = vmatmul.msk.bf16.vlgmr.msrb.gmra.mxu1 %vm577_vm1, %v8050_v7  ;;  %v8081_v0 = vpop.permute.xlu2 %5875 }
 0x1e5   : > { %v1192_v22 = vpop.f32.mrf.mxu2  ;;  %2144 = vmatpush.bf16.msrb.mxu1 %v2062_v44  ;;  %v5878_v10 = vunpack.i.h.bf16 %v8081_v0  ;;  %v5877_v27 = vunpack.i.l.bf16 %v8081_v0 }
 0x1e6   : > { %v8068_v9 = vadd.f32 %v1192_v22, %v7880_v31  ;;  %v1225_v8 = vpop.f32.mrf.mxu0  ;;  %v2043_v31 = vsel %vm2023_vm7, %v5863_v52, %v5843_v53 }
 0x1e7   : > { %v8071_v4 = vadd.f32 %v1225_v8, %v7874_v3  ;;  %v1211_v42 = vpop.f32.mrf.mxu3  ;;  %v2042_v3 = vsel %vm2023_vm7, %v5862_v62, %v5842_v57  ;;  %v8091_v11 = vpop.permute.xlu0 %5865  ;;  %v2040_v46 = vsel %vm2023_vm7, %v5877_v27, %v5852_v50  ;;  %v2041_v55 = vsel %vm2023_vm7, %v5878_v10, %v5853_v25 }
 0x1e8   : > { %v8084_v56 = vadd.f32 %v1211_v42, %v7859_v28  ;;  %v2059_v12 = vpack.c.bf16 %v2043_v31, %v2042_v3  ;;  %v5856_v19 = vpop.permute.xlu1 %5855  ;;  %v2053_v13 = vpack.c.bf16 %v2041_v55, %v2040_v46  ;;  %v5837_v8 = vunpack.i.l.bf16 %v8015_v60 }
 0x1e9   : > { %5100 = vmatmul.msk.bf16.vlgmr.msrb.gmra.mxu0 %vm577_vm1, %v8050_v7  ;;  %v1246_v17 = vpop.f32.mrf.mxu1  ;;  %v5857_v44 = vunpack.i.l.bf16 %v5856_v19 }
 0x1ea   : > { %v8097_v28 = vadd.f32 %v1246_v17, %v7931_v1  ;;  %2125 = vmatpush.bf16.msrb.mxu0 %v2061_v38  ;;  %2087 = vmatpush.bf16.msra.mxu2 %v2059_v12  ;;  %v5858_v1 = vunpack.i.h.bf16 %v5856_v19  ;;  %v2028_v32 = vsel %vm2023_vm7, %v5832_v15, %v5837_v8  ;;  %v2029_v17 = vsel %vm2023_vm7, %v5833_v6, %v5838_v61 }
 0x1ec   : > { %v2037_v38 = vsel %vm2023_vm7, %v5853_v25, %v5858_v1  ;;  %v5891_v60 = vpop.permute.xlu2 %5890  ;;  %v2033_v25 = vsel %vm2023_vm7, %v5858_v1, %v5833_v6 }
 0x1ed   : > { %v1194_v48 = vpop.f32.mrf.mxu2  ;;  %v5892_v3 = vunpack.i.l.bf16 %v5891_v60 }
 0x1ee   : > { %v8108_v35 = vadd.f32 %v1194_v48, %v7928_v41  ;;  %v1227_v22 = vpop.f32.mrf.mxu0  ;;  %2088 = vmatpush.bf16.msra.mxu2 %v2053_v13  ;;  %v2036_v41 = vsel %vm2023_vm7, %v5852_v50, %v5857_v44  ;;  %v5893_v50 = vunpack.i.h.bf16 %v5891_v60 }
 0x1ef   : > { %v8114_v53 = vadd.f32 %v1227_v22, %v7915_v26  ;;  %v1213_v57 = vpop.f32.mrf.mxu3  ;;  %v8126_v33 = vpop.permute.xlu0 %5880  ;;  %v2054_v31 = vpack.c.bf16 %v2037_v38, %v2036_v41  ;;  %v2046_v55 = vsel %vm2023_vm7, %v5892_v3, %v5862_v62  ;;  %v5868_v62 = vunpack.i.h.bf16 %v8091_v11 }
 0x1f0   : > { %v8122_v42 = vadd.f32 %v1213_v57, %v7904_v36  ;;  %v2032_v36 = vsel %vm2023_vm7, %v5857_v44, %v5832_v15  ;;  %v2027_v46 = vsel %vm2023_vm7, %v5828_v47, %v5893_v50  ;;  %v2047_v19 = vsel %vm2023_vm7, %v5893_v50, %v5863_v52  ;;  %v8164_v1 = vpop.permute.xlu1 %5870 }
 0x1f1   : > { %v1249_v26 = vpop.f32.mrf.mxu1  ;;  %2107 = vmatpush.bf16.msra.mxu3 %v2054_v31  ;;  %v2064_v44 = vpack.c.bf16 %v2047_v19, %v2046_v55  ;;  %v2056_v47 = vpack.c.bf16 %v2029_v17, %v2028_v32  ;;  %v5867_v41 = vunpack.i.l.bf16 %v8091_v11  ;;  %v5873_v38 = vunpack.i.h.bf16 %v8164_v1 }
 0x1f2   : > { %5104 = vmatmul.msk.bf16.vlgmr.msrb.gmra.mxu2 %vm577_vm1, %v8050_v7  ;;  %v8131_v29 = vadd.f32 %v1249_v26, %v7953_v58  ;;  %v2026_v58 = vsel %vm2023_vm7, %v5827_v20, %v5892_v3  ;;  %v2055_v20 = vpack.c.bf16 %v2033_v25, %v2032_v36 }
 0x1f3   : > { %v2063_v13 = vpack.c.bf16 %v2027_v46, %v2026_v58  ;;  %2145 = vmatpush.bf16.msrb.mxu1 %v2056_v47  ;;  %v2283_v36 = vsel %vm2267_vm8, %v5868_v62, %v5873_v38 }
 0x1f4   : > { %5103 = vmatmul.msk.bf16.gmra.mxu1 %vm577_vm1, %v8124_v59  ;;  %5106 = vmatmul.msk.bf16.vlgmr.msrb.gmra.mxu3 %vm577_vm1, %v8050_v7 }
 0x1f5   : > { %v1263_v12 = vpop.f32.mrf.mxu2  ;;  %2126 = vmatpush.bf16.msrb.mxu0 %v2055_v20  ;;  %2163 = vmatpush.bf16.msrb.mxu2 %v2063_v13 }
 0x1f6   : > { %v8158_v48 = vadd.f32 %v1263_v12, %v7948_v24  ;;  %v1230_v54 = vpop.f32.mrf.mxu0  ;;  %2182 = vmatpush.bf16.msrb.mxu3 %v2064_v44 }
 0x1f7   : > { %v8167_v6 = vadd.f32 %v1230_v54, %v7944_v23  ;;  %v1282_v15 = vpop.f32.mrf.mxu3  ;;  %v5896_v16 = vpop.permute.xlu0 %5895 }
 0x1f8   : > { %v8170_v24 = vadd.f32 %v1282_v15, %v7936_v30  ;;  %v5898_v22 = vunpack.i.h.bf16 %v5896_v16  ;;  %v5897_v57 = vunpack.i.l.bf16 %v5896_v16  ;;  %v5872_v30 = vunpack.i.l.bf16 %v8164_v1 }
 0x1f9   : > { %5101 = vmatmul.msk.bf16.gmra.mxu0 %vm577_vm1, %v8124_v59  ;;  %v1251_v52 = vpop.f32.mrf.mxu1 }
 0x1fa   : > { %v8176_v23 = vadd.f32 %v1251_v52, %v7993_v49  ;;  %v2024_v31 = vsel %vm2023_vm7, %v5837_v8, %v5897_v57  ;;  %v2025_v26 = vsel %vm2023_vm7, %v5838_v61, %v5898_v22  ;;  %v8189_v49 = vpop.permute.xlu1 %5885  ;;  %v2282_v25 = vsel %vm2267_vm8, %v5867_v41, %v5872_v30 }
 0x1fb   : > { %v2057_v50 = vpack.c.bf16 %v2025_v26, %v2024_v31  ;;  %v2304_v17 = vpack.c.bf16 %v2283_v36, %v2282_v25  ;;  %v2045_v15 = vsel %vm2023_vm7, %v5898_v22, %v5878_v10  ;;  %v5887_v36 = vunpack.i.l.bf16 %v8189_v49 }
 0x1fd   : > { %v1265_v60 = vpop.f32.mrf.mxu2  ;;  %2164 = vmatpush.bf16.msrb.mxu2 %v2057_v50 }
 0x1fe   : > { %v8187_v3 = vadd.f32 %v1265_v60, %v7980_v51  ;;  %v1232_v11 = vpop.f32.mrf.mxu0 }
 0x1ff   : > { %v8196_v8 = vadd.f32 %v1232_v11, %v7977_v45  ;;  %v1284_v32 = vpop.f32.mrf.mxu3  ;;  %v5882_v11 = vunpack.i.l.bf16 %v8126_v33 }
 0x200   : > { %v8199_v61 = vadd.f32 %v1284_v32, %v7974_v43  ;;  %v8213_v43 = vpop.permute.xlu2 %5905 }
 0x201   : > { %v1377_v51 = vpop.f32.mrf.mxu1 }
 0x202   : > { %5105 = vmatmul.msk.bf16.gmra.mxu2 %vm577_vm1, %v8124_v59  ;;  %v8204_v12 = vadd.f32 %v1377_v51, %v8013_v18  ;;  %v8215_v46 = vpop.permute.xlu1 %5900 }
 0x203   : > { %v5903_v19 = vunpack.i.h.bf16 %v8215_v46  ;;  %v5902_v18 = vunpack.i.l.bf16 %v8215_v46  ;;  %v2466_v46 = vld [vmem:[%s10833_s3 + $0x18] sm:$0xff] }
 0x204   : > { %5107 = vmatmul.msk.bf16.gmra.mxu3 %vm577_vm1, %v8124_v59  ;;  %5110 = vmatmul.msk.bf16.vlgmr.msra.gmra.mxu1 %vm577_vm1, %v8050_v7 }
 0x205   : > { %v1268_v58 = vpop.f32.mrf.mxu2  ;;  %2350 = vmatpush.bf16.msra.mxu1 %v2304_v17  ;;  %v2286_v54 = vsel %vm2267_vm8, %v5902_v18, %v5867_v41 }
 0x206   : > { %v8211_v45 = vadd.f32 %v1268_v58, %v8010_v21  ;;  %v1358_v55 = vpop.f32.mrf.mxu0  ;;  %v2287_v21 = vsel %vm2267_vm8, %v5903_v19, %v5868_v62  ;;  %v8249_v62 = vld [vmem:[#allocation5 + $0x70] sm:$0xff] }
 0x207   : > { %v8220_v13 = vadd.f32 %v1358_v55, %v8007_v5  ;;  %v1287_v20 = vpop.f32.mrf.mxu3  ;;  %v2303_v5 = vpack.c.bf16 %v2287_v21, %v2286_v54 }
 0x208   : > { %v8223_v1 = vadd.f32 %v1287_v20, %v7998_v34  ;;  %v2044_v34 = vsel %vm2023_vm7, %v5897_v57, %v5877_v27 }
 0x209   : > { %5108 = vmatmul.msk.bf16.vlgmr.msra.gmra.mxu0 %vm577_vm1, %v8050_v7  ;;  %v1379_v44 = vpop.f32.mrf.mxu1  ;;  %v2058_v16 = vpack.c.bf16 %v2045_v15, %v2044_v34  ;;  %v5908_v15 = vunpack.i.h.bf16 %v8213_v43 }
 0x20a   : > { %v8236_v47 = vadd.f32 %v1379_v44, %v8048_v37  ;;  %2331 = vmatpush.bf16.msra.mxu0 %v2303_v5  ;;  %v8251_v37 = vpop.permute.xlu2 %5920  ;;  %v8253_v41 = vpop.permute.xlu1 %5915 }
 0x20b   : > { %2183 = vmatpush.bf16.msrb.mxu3 %v2058_v16  ;;  %v5923_v27 = vunpack.i.h.bf16 %v8251_v37  ;;  %v5922_v0 = vunpack.i.l.bf16 %v8251_v37 }
 0x20d   : > { %v1270_v52 = vpop.f32.mrf.mxu2  ;;  %v2279_v26 = vsel %vm2267_vm8, %v5873_v38, %v5923_v27  ;;  %v5888_v38 = vunpack.i.h.bf16 %v8189_v49 }
 0x20e   : > { %v8247_v7 = vadd.f32 %v1270_v52, %v8035_v14  ;;  %v1360_v31 = vpop.f32.mrf.mxu0  ;;  %v2278_v14 = vsel %vm2267_vm8, %v5872_v30, %v5922_v0  ;;  %v8279_v30 = vpop.permute.xlu0 %5910 }
 0x20f   : > { %v8258_v10 = vadd.f32 %v1360_v31, %v8029_v39  ;;  %v1289_v22 = vpop.f32.mrf.mxu3  ;;  %v2305_v39 = vpack.c.bf16 %v2279_v26, %v2278_v14  ;;  %v5912_v32 = vunpack.i.l.bf16 %v8279_v30  ;;  %v5907_v31 = vunpack.i.l.bf16 %v8213_v43 }
 0x210   : > { %v8261_v57 = vadd.f32 %v1289_v22, %v8024_v63  ;;  %v5883_v63 = vunpack.i.h.bf16 %v8126_v33 }
 0x211   : > { %v1382_v60 = vpop.f32.mrf.mxu1  ;;  %v2284_v49 = vsel %vm2267_vm8, %v5912_v32, %v5882_v11 }
 0x212   : > { %5120 = vmatmul.msk.bf16.vlgmr.msra.gmra.mxu2 %vm577_vm1, %v8249_v62  ;;  %v8274_v50 = vadd.f32 %v1382_v60, %v8084_v56  ;;  %v5913_v56 = vunpack.i.h.bf16 %v8279_v30  ;;  %v8291_v51 = vpop.permute.xlu1 %5930  ;;  %v2281_v34 = vsel %vm2267_vm8, %v5883_v63, %v5888_v38  ;;  %v2291_v60 = vsel %vm2267_vm8, %v5908_v15, %v5903_v19 }
 0x213   : > { %2369 = vmatpush.bf16.msra.mxu2 %v2305_v39  ;;  %v5933_v58 = vunpack.i.h.bf16 %v8291_v51  ;;  %v5932_v55 = vunpack.i.l.bf16 %v8291_v51  ;;  %v2290_v39 = vsel %vm2267_vm8, %v5907_v31, %v5902_v18  ;;  %v5918_v19 = vunpack.i.h.bf16 %v8253_v41  ;;  %v2511_v51 = vld [vmem:[%s10834_s4] sm:$0xff] }
 0x214   : > { %5111 = vmatmul.msk.bf16.gmra.mxu1 %vm577_vm1, %v8124_v59  ;;  %5122 = vmatmul.msk.bf16.vlgmr.msra.gmra.mxu3 %vm577_vm1, %v8249_v62  ;;  %v2285_v54 = vsel %vm2267_vm8, %v5913_v56, %v5883_v63  ;;  %v2308_v30 = vpack.c.bf16 %v2291_v60, %v2290_v39  ;;  %v6647_v18 = vmov 0  }
 0x215   : > { %v1396_v25 = vpop.f32.mrf.mxu2  ;;  %v2297_v5 = vpack.c.bf16 %v2285_v54, %v2284_v49  ;;  %5940 = vset.pattern.permute.xlu1 %v6647_v18  ;;  %5939 = vset.pattern.permute.xlu0 %v6647_v18  ;;  %v2289_v54 = vsel %vm2267_vm8, %v5918_v19, %v5913_v56 }
 0x216   : > { %v8289_v33 = vadd.f32 %v1396_v25, %v8071_v4  ;;  %v1363_v17 = vpop.f32.mrf.mxu0  ;;  %v2280_v4 = vsel %vm2267_vm8, %v5882_v11, %v5887_v36  ;;  %2484 = vperm.xlu1 %5940, %v2466_v46   ;;  %5941 = vset.pattern.permute.xlu2 %v6647_v18 }
 0x217   : > { %v8296_v20 = vadd.f32 %v1363_v17, %v8068_v9  ;;  %v1415_v21 = vpop.f32.mrf.mxu3  ;;  %v2298_v16 = vpack.c.bf16 %v2281_v34, %v2280_v4  ;;  %2332 = vmatpush.bf16.msra.mxu0 %v2297_v5  ;;  %v5926_v4 = vpop.permute.xlu0 %5925 }
 0x218   : > { %v8305_v44 = vadd.f32 %v1415_v21, %v8055_v2  ;;  %v2276_v2 = vsel %vm2267_vm8, %v5887_v36, %v5932_v55  ;;  %v5928_v34 = vunpack.i.h.bf16 %v5926_v4 }
 0x219   : > { %5109 = vmatmul.msk.bf16.gmra.mxu0 %vm577_vm1, %v8124_v59  ;;  %v1384_v9 = vpop.f32.mrf.mxu1  ;;  %v2277_v59 = vsel %vm2267_vm8, %v5888_v38, %v5933_v58  ;;  %2351 = vmatpush.bf16.msra.mxu1 %v2298_v16 }
 0x21a   : > { %v8313_v52 = vadd.f32 %v1384_v9, %v8122_v42  ;;  %v2299_v22 = vpack.c.bf16 %v2277_v59, %v2276_v2  ;;  %v8327_v42 = vld [vmem:[#allocation5 + $0x78] sm:$0xff]  ;;  %v5927_v9 = vunpack.i.l.bf16 %v5926_v4  ;;  %v2275_v56 = vsel %vm2267_vm8, %v5923_v27, %v5928_v34 }
 0x21c   : > { %2370 = vmatpush.bf16.msra.mxu2 %v2299_v22  ;;  %v2270_v2 = vsel %vm2267_vm8, %v5927_v9, %v5907_v31 }
 0x21d   : > { %v1398_v14 = vpop.f32.mrf.mxu2 }
 0x21e   : > { %v8325_v26 = vadd.f32 %v1398_v14, %v8114_v53  ;;  %v1365_v43 = vpop.f32.mrf.mxu0 }
 0x21f   : > { %v8338_v63 = vadd.f32 %v1365_v43, %v8108_v35  ;;  %v1417_v11 = vpop.f32.mrf.mxu3  ;;  %v5917_v35 = vunpack.i.l.bf16 %v8253_v41  ;;  %v5936_v43 = vpop.permute.xlu2 %5935 }
 0x220   : > { %v8341_v53 = vadd.f32 %v1417_v11, %v8097_v28  ;;  %v5937_v39 = vunpack.i.l.bf16 %v5936_v43 }
 0x221   : > { %v1453_v36 = vpop.f32.mrf.mxu1  ;;  %v2288_v49 = vsel %vm2267_vm8, %v5917_v35, %v5912_v32  ;;  %v2514_v32 = vld [vmem:[%s10834_s4 + $0x18] sm:$0xff] }
 0x222   : > { %5121 = vmatmul.msk.bf16.gmra.mxu2 %vm577_vm1, %v8327_v42  ;;  %v8346_v25 = vadd.f32 %v1453_v36, %v8170_v24  ;;  %v2302_v5 = vpack.c.bf16 %v2289_v54, %v2288_v49  ;;  %2532 = vperm.xlu1 %5940, %v2514_v32  }
 0x224   : > { %5123 = vmatmul.msk.bf16.gmra.mxu3 %vm577_vm1, %v8327_v42  ;;  %5126 = vmatmul.msk.bf16.vlgmr.msrb.gmra.mxu1 %vm577_vm1, %v8249_v62 }
 0x225   : > { %v1401_v28 = vpop.f32.mrf.mxu2  ;;  %2426 = vmatpush.bf16.msrb.mxu1 %v2308_v30  ;;  %v2465_v30 = vld [vmem:[%s10833_s3 + $0x10] sm:$0xff] }
 0x226   : > { %v8358_v24 = vadd.f32 %v1401_v28, %v8167_v6  ;;  %v1434_v38 = vpop.f32.mrf.mxu0  ;;  %2479 = vperm.xlu0 %5939, %v2465_v30  }
 0x227   : > { %v8361_v17 = vadd.f32 %v1434_v38, %v8158_v48  ;;  %v1420_v21 = vpop.f32.mrf.mxu3 }
 0x228   : > { %v8372_v6 = vadd.f32 %v1420_v21, %v8131_v29  ;;  %v2271_v29 = vsel %vm2267_vm8, %v5928_v34, %v5908_v15  ;;  %v5938_v15 = vunpack.i.h.bf16 %v5936_v43  ;;  %v2464_v21 = vld [vmem:[%s10833_s3 + $0x8] sm:$0xff] }
 0x229   : > { %5124 = vmatmul.msk.bf16.vlgmr.msrb.gmra.mxu0 %vm577_vm1, %v8249_v62  ;;  %v1455_v48 = vpop.f32.mrf.mxu1  ;;  %2427 = vmatpush.bf16.msrb.mxu1 %v2302_v5  ;;  %v2307_v14 = vpack.c.bf16 %v2271_v29, %v2270_v2 }
 0x22a   : > { %v8377_v16 = vadd.f32 %v1455_v48, %v8199_v61  ;;  %v2274_v61 = vsel %vm2267_vm8, %v5922_v0, %v5927_v9  ;;  %v2272_v0 = vsel %vm2267_vm8, %v5932_v55, %v5937_v39  ;;  %2517 = vperm.xlu1 %5940, %v2511_v51  }
 0x22b   : > { %v2306_v22 = vpack.c.bf16 %v2275_v56, %v2274_v61  ;;  %2407 = vmatpush.bf16.msrb.mxu0 %v2307_v14  ;;  %v5353_v61 = vld [vmem:[#allocation5 + $0x88] sm:$0xff] }
 0x22d   : > { %v1403_v59 = vpop.f32.mrf.mxu2  ;;  %2388 = vmatpush.bf16.msra.mxu3 %v2306_v22 }
 0x22e   : > { %v8395_v60 = vadd.f32 %v1403_v59, %v8196_v8  ;;  %v1436_v11 = vpop.f32.mrf.mxu0  ;;  %v2273_v8 = vsel %vm2267_vm8, %v5933_v58, %v5938_v15  ;;  %2474 = vperm.xlu0 %5939, %v2464_v21   ;;  %v2512_v59 = vld [vmem:[%s10834_s4 + $0x8] sm:$0xff] }
 0x22f   : > { %v8398_v27 = vadd.f32 %v1436_v11, %v8187_v3  ;;  %v1422_v37 = vpop.f32.mrf.mxu3  ;;  %v2300_v36 = vpack.c.bf16 %v2273_v8, %v2272_v0 }
 0x230   : > { %v8409_v31 = vadd.f32 %v1422_v37, %v8176_v23 }
 0x231   : > { %v1458_v3 = vpop.f32.mrf.mxu1  ;;  %2389 = vmatpush.bf16.msra.mxu3 %v2300_v36 }
 0x232   : > { %5128 = vmatmul.msk.bf16.vlgmr.msrb.gmra.mxu2 %vm577_vm1, %v8249_v62  ;;  %v8417_v46 = vadd.f32 %v1458_v3, %v8223_v1 }
 0x234   : > { %5127 = vmatmul.msk.bf16.gmra.mxu1 %vm577_vm1, %v8327_v42  ;;  %5130 = vmatmul.msk.bf16.vlgmr.msrb.gmra.mxu3 %vm577_vm1, %v8249_v62 }
 0x235   : > { %v1602_v23 = vpop.f32.mrf.mxu2 }
 0x236   : > { %v8427_v58 = vadd.f32 %v1602_v23, %v8220_v13  ;;  %v1439_v55 = vpop.f32.mrf.mxu0  ;;  %v2268_v13 = vsel %vm2267_vm8, %v5937_v39, %v5917_v35  ;;  %v5352_v35 = vld [vmem:[#allocation5 + $0x80] sm:$0xff] }
 0x237   : > { %v1479_v1 = vadd.f32 %v1439_v55, %v8211_v45  ;;  %v1621_v18 = vpop.f32.mrf.mxu3  ;;  %v2269_v45 = vsel %vm2267_vm8, %v5938_v15, %v5918_v19 }
 0x238   : > { %v1708_v28 = vadd.f32 %v1621_v18, %v8204_v12  ;;  %v2301_v62 = vpack.c.bf16 %v2269_v45, %v2268_v13 }
 0x239   : > { %5125 = vmatmul.msk.bf16.gmra.mxu0 %vm577_vm1, %v8327_v42  ;;  %v1460_v38 = vpop.f32.mrf.mxu1 }
 0x23a   : > { %v8445_v12 = vadd.f32 %v1460_v38, %v8261_v57  ;;  %2408 = vmatpush.bf16.msrb.mxu0 %v2301_v62  ;;  %v2513_v57 = vld [vmem:[%s10834_s4 + $0x10] sm:$0xff] }
 0x23b   : > { %2527 = vperm.xlu2 %5941, %v2513_v57  }
 0x23d   : > { %v8447_v49 = vpop.f32.mrf.mxu2 }
 0x23e   : > { %v1441_v54 = vpop.f32.mrf.mxu0 }
 0x23f   : > { %v8450_v4 = vadd.f32 %v1441_v54, %v8247_v7  ;;  %v8452_v5 = vpop.f32.mrf.mxu3 }
 0x241   : > { %v1659_v41 = vpop.f32.mrf.mxu1 }
 0x242   : > { %5129 = vmatmul.msk.bf16.gmra.mxu2 %vm577_vm1, %v8327_v42  ;;  %v1710_v19 = vadd.f32 %v1659_v41, %v8305_v44  ;;  %v2463_v44 = vld [vmem:[%s10833_s3] sm:$0xff] }
 0x243   : > { %2469 = vperm.xlu2 %5941, %v2463_v44  }
 0x244   : > { %5131 = vmatmul.msk.bf16.gmra.mxu3 %vm577_vm1, %v8327_v42  ;;  %5142 = vmatmul.msk.bf16.vlgmr.msra.gmra.mxu1 %vm577_vm1, %v5352_v35 }
 0x245   : > { %v1607_v48 = vpop.f32.mrf.mxu2 }
 0x246   : > { %v1719_v7 = vadd.f32 %v1607_v48, %v8296_v20  ;;  %v1640_v34 = vpop.f32.mrf.mxu0 }
 0x247   : > { %v1709_v9 = vadd.f32 %v1640_v34, %v8289_v33  ;;  %v1626_v32 = vpop.f32.mrf.mxu3 }
 0x248   : > { %v1720_v29 = vadd.f32 %v1626_v32, %v8274_v50 }
 0x249   : > { %5140 = vmatmul.msk.bf16.vlgmr.msra.gmra.mxu0 %vm577_vm1, %v5352_v35  ;;  %v8467_v56 = vpop.f32.mrf.mxu1 }
 0x24b   : > { %2522 = vperm.xlu2 %5941, %v2512_v59  }
 0x24d   : > { %v8472_v42 = vpop.f32.mrf.mxu2 }
 0x24e   : > { %v8474_v2 = vpop.f32.mrf.mxu0 }
 0x24f   : > { %v8476_v20 = vpop.f32.mrf.mxu3 }
 0x251   : > { %v1664_v33 = vpop.f32.mrf.mxu1 }
 0x252   : > { %5144 = vmatmul.msk.bf16.vlgmr.msra.gmra.mxu2 %vm577_vm1, %v5352_v35  ;;  %v1722_v50 = vadd.f32 %v1664_v33, %v8372_v6 }
 0x254   : > { %5143 = vmatmul.msk.bf16.gmra.mxu1 %vm577_vm1, %v5353_v61  ;;  %5146 = vmatmul.msk.bf16.vlgmr.msra.gmra.mxu3 %vm577_vm1, %v5352_v35 }
 0x255   : > { %v1678_v22 = vpop.f32.mrf.mxu2 }
 0x256   : > { %v1711_v14 = vadd.f32 %v1678_v22, %v8361_v17  ;;  %v1645_v43 = vpop.f32.mrf.mxu0 }
 0x257   : > { %v1721_v15 = vadd.f32 %v1645_v43, %v8358_v24  ;;  %v1697_v39 = vpop.f32.mrf.mxu3 }
 0x258   : > { %v1712_v11 = vadd.f32 %v1697_v39, %v8346_v25 }
 0x259   : > { %5141 = vmatmul.msk.bf16.gmra.mxu0 %vm577_vm1, %v5353_v61  ;;  %v8489_v6 = vpop.f32.mrf.mxu1 }
 0x25d   : > { %v8491_v37 = vpop.f32.mrf.mxu2 }
 0x25e   : > { %v8493_v0 = vpop.f32.mrf.mxu0 }
 0x25f   : > { %v8495_v8 = vpop.f32.mrf.mxu3 }
 0x261   : > { %v1865_v36 = vpop.f32.mrf.mxu1 }
 0x262   : > { %5145 = vmatmul.msk.bf16.gmra.mxu2 %vm577_vm1, %v5353_v61  ;;  %v1952_v17 = vadd.f32 %v1865_v36, %v1708_v28 }
 0x264   : > { %5147 = vmatmul.msk.bf16.gmra.mxu3 %vm577_vm1, %v5353_v61  ;;  %5150 = vmatmul.msk.bf16.vlgmr.msrb.gmra.mxu1 %vm577_vm1, %v5352_v35 }
 0x265   : > { %v1683_v3 = vpop.f32.mrf.mxu2 }
 0x266   : > { %v1723_v25 = vadd.f32 %v1683_v3, %v1479_v1  ;;  %v1846_v24 = vpop.f32.mrf.mxu0 }
 0x267   : > { %v8501_v30 = vadd.f32 %v1846_v24, %v8427_v58  ;;  %v1702_v51 = vpop.f32.mrf.mxu3 }
 0x268   : > { %v1724_v23 = vadd.f32 %v1702_v51, %v8417_v46 }
 0x269   : > { %5148 = vmatmul.msk.bf16.vlgmr.msrb.gmra.mxu0 %vm577_vm1, %v5352_v35  ;;  %v8505_v55 = vpop.f32.mrf.mxu1 }
 0x26d   : > { %v8507_v18 = vpop.f32.mrf.mxu2 }
 0x26e   : > { %v8509_v28 = vpop.f32.mrf.mxu0 }
 0x26f   : > { %v8511_v38 = vpop.f32.mrf.mxu3 }
 0x271   : > { %v1870_v21 = vpop.f32.mrf.mxu1 }
 0x272   : > { %v8513_v13 = vadd.f32 %v1870_v21, %v1720_v29 }
 0x274   : > { %5151 = vmatmul.msk.bf16.gmra.mxu1 %vm577_vm1, %v5353_v61 }
 0x275   : > { %v1884_v1 = vpop.f32.mrf.mxu2 }
 0x276   : > { %v1953_v58 = vadd.f32 %v1884_v1, %v1709_v9  ;;  %v1851_v45 = vpop.f32.mrf.mxu0 }
 0x277   : > { %v8516_v62 = vadd.f32 %v1851_v45, %v1719_v7  ;;  %v1903_v46 = vpop.f32.mrf.mxu3 }
 0x278   : > { %v1954_v54 = vadd.f32 %v1903_v46, %v1710_v19 }
 0x279   : > { %5149 = vmatmul.msk.bf16.gmra.mxu0 %vm577_vm1, %v5353_v61  ;;  %v8519_v35 = vpop.f32.mrf.mxu1 }
 0x27d   : > { %v8521_v41 = vpop.f32.mrf.mxu2 }
 0x27e   : > { %v8523_v57 = vpop.f32.mrf.mxu0 }
 0x27f   : > { %v8525_v48 = vpop.f32.mrf.mxu3 }
 0x281   : > { %v1941_v34 = vpop.f32.mrf.mxu1 }
 0x282   : > { %v1956_v32 = vadd.f32 %v1941_v34, %v1712_v11 }
 0x285   : > { %v1889_v29 = vpop.f32.mrf.mxu2 }
 0x286   : > { %v1965_v44 = vadd.f32 %v1889_v29, %v1721_v15  ;;  %v1922_v9 = vpop.f32.mrf.mxu0 }
 0x287   : > { %v8527_v33 = vadd.f32 %v1922_v9, %v1711_v14  ;;  %v1908_v7 = vpop.f32.mrf.mxu3 }
 0x288   : > { %v8529_v59 = vadd.f32 %v1908_v7, %v1722_v50 }
 0x289   : > { %10896 = vst [vmem:[#allocation15_spill] sm:$0xff] %v8527_v33  ;;  %v8531_v19 = vpop.f32.mrf.mxu1 }
 0x28d   : > { %v8533_v61 = vpop.f32.mrf.mxu2 }
 0x28e   : > { %v8535_v22 = vpop.f32.mrf.mxu0 }
 0x28f   : > { %v8537_v43 = vpop.f32.mrf.mxu3 }
 0x291   : > { %v1946_v39 = vpop.f32.mrf.mxu1 }
 0x292   : > { %v8539_v36 = vadd.f32 %v1946_v39, %v1724_v23 }
 0x294   : > { %10897 = vst [vmem:[#allocation16_spill] sm:$0xff] %v8539_v36 }
 0x295   : > { %v2090_v11 = vpop.f32.mrf.mxu2 }
 0x296   : > { %v1927_v3 = vpop.f32.mrf.mxu0 }
 0x297   : > { %v8541_v15 = vadd.f32 %v1927_v3, %v1723_v25  ;;  %v2109_v14 = vpop.f32.mrf.mxu3 }
 0x298   : > { %v2196_v24 = vadd.f32 %v2109_v14, %v1952_v17  ;;  %v8567_v14 = vpop.permute.xlu1 %2484 }
 0x299   : > { %10898 = vst [vmem:[#allocation17_spill] sm:$0xff] %v8541_v15  ;;  %v8543_v51 = vpop.f32.mrf.mxu1  ;;  %v8577_v15 = vpop.permute.xlu2 %2527 }
 0x29a   : > { %10902 = vst [vmem:[#allocation21_spill] sm:$0xff] %v8567_v14  ;;  %v8587_v14 = vpop.permute.xlu0 %2479 }
 0x29b   : > { %10906 = vst [vmem:[#allocation25_spill] sm:$0xff] %v8577_v15 }
 0x29d   : > { %v8545_v50 = vpop.f32.mrf.mxu2 }
 0x29e   : > { %v8547_v21 = vpop.f32.mrf.mxu0 }
 0x29f   : > { %v2111_v1 = vpop.f32.mrf.mxu3 }
 0x2a1   : > { %v2147_v45 = vpop.f32.mrf.mxu1 }
 0x2a2   : > { %v8549_v46 = vadd.f32 %v2147_v45, %v1954_v54 }
 0x2a4   : > { %10899 = vst [vmem:[#allocation18_spill] sm:$0xff] %v8549_v46 }
 0x2a5   : > { %v8551_v34 = vpop.f32.mrf.mxu2 }
 0x2a6   : > { %v2128_v23 = vpop.f32.mrf.mxu0 }
 0x2a7   : > { %v8553_v29 = vadd.f32 %v2128_v23, %v1953_v58  ;;  %v8555_v9 = vpop.f32.mrf.mxu3 }
 0x2a9   : > { %10900 = vst [vmem:[#allocation19_spill] sm:$0xff] %v8553_v29  ;;  %v8557_v25 = vpop.f32.mrf.mxu1  ;;  %v8581_v29 = vpop.permute.xlu1 %2532 }
 0x2aa   : > { %10907 = vst [vmem:[#allocation26_spill] sm:$0xff] %v8581_v29 }
 0x2ad   : > { %v8559_v17 = vpop.f32.mrf.mxu2 }
 0x2ae   : > { %v8561_v7 = vpop.f32.mrf.mxu0 }
 0x2af   : > { %v8563_v39 = vpop.f32.mrf.mxu3 }
 0x2b1   : > { %v8565_v3 = vpop.f32.mrf.mxu1 }
 0x2b2   : > { %10901 = vst [vmem:[#allocation20_spill] sm:$0xff] %v8565_v3 }
 0x2b5   : > { %v8569_v54 = vpop.f32.mrf.mxu2 }
 0x2b6   : > { %10903 = vst [vmem:[#allocation22_spill] sm:$0xff] %v8569_v54  ;;  %v2133_v45 = vpop.f32.mrf.mxu0 }
 0x2b7   : > { %v8571_v40 = vadd.f32 %v2133_v45, %v1965_v44  ;;  %v2185_v58 = vpop.f32.mrf.mxu3  ;;  %v8589_v45 = vpop.permute.xlu2 %2469 }
 0x2b8   : > { %v8573_v23 = vadd.f32 %v2185_v58, %v1956_v32  ;;  %v1714_v32 = vadd.f32 %v8452_v5, %v8236_v47  ;;  %v1715_v47 = vadd.f32 %v8474_v2, %v8325_v26  ;;  %v8606_v5 = vpop.permute.xlu1 %2517  ;;  %v1718_v26 = vadd.f32 %v8495_v8, %v8377_v16 }
 0x2b9   : > { %10904 = vst [vmem:[#allocation23_spill] sm:$0xff] %v8571_v40  ;;  %v8575_v36 = vpop.f32.mrf.mxu1  ;;  %v2195_v40 = vadd.f32 %v2090_v11, %v8501_v30 }
 0x2ba   : > { %10905 = vst [vmem:[#allocation24_spill] sm:$0xff] %v8573_v23  ;;  %v1713_v23 = vadd.f32 %v8447_v49, %v8258_v10  ;;  %v1958_v29 = vadd.f32 %v8505_v55, %v1714_v32  ;;  %v1726_v10 = vadd.f32 %v8476_v20, %v8313_v52  ;;  %v1728_v49 = vadd.f32 %v8489_v6, %v8409_v31  ;;  %v8623_v52 = vpop.permute.xlu0 %2474 }
 0x2bb   : > { %v1730_v31 = vadd.f32 %v8511_v38, %v8445_v12  ;;  %v1959_v16 = vadd.f32 %v8521_v41, %v1715_v47  ;;  %v1962_v12 = vadd.f32 %v8531_v19, %v1718_v26 }
 0x2bd   : > { %v8579_v46 = vpop.f32.mrf.mxu2  ;;  %v8648_v41 = vadd.f32 %v8543_v51, %v1730_v31  ;;  %v2208_v51 = vadd.f32 %v8555_v9, %v8513_v13  ;;  %v10910_v13 = vld [vmem:[#allocation15_spill] sm:$0xff]  ;;  %v10911_v9 = vld [vmem:[#allocation22_spill] sm:$0xff] }
 0x2be   : > { %v8583_v33 = vpop.f32.mrf.mxu0 }
 0x2bf   : > { %v8585_v3 = vpop.f32.mrf.mxu3  ;;  %v8638_v8 = vpop.permute.xlu2 %2522 }
 0x2c0   : > { %10908 = vst [vmem:[#allocation27_spill] sm:$0xff] %v8585_v3 }
 0x2c1   : > { %v2353_v54 = vpop.f32.mrf.mxu1 }
 0x2c2   : > { %v2440_v44 = vadd.f32 %v2353_v54, %v2196_v24  ;;  %v1716_v24 = vadd.f32 %v8467_v56, %v8341_v53  ;;  %v1725_v54 = vadd.f32 %v8472_v42, %v8338_v63  ;;  %v1717_v53 = vadd.f32 %v8491_v37, %v8398_v27 }
 0x2c3   : > { %v2202_v56 = vadd.f32 %v2111_v1, %v1958_v29  ;;  %v1727_v63 = vadd.f32 %v8493_v0, %v8395_v60  ;;  %v1957_v42 = vadd.f32 %v8509_v28, %v1713_v23  ;;  %v1970_v60 = vadd.f32 %v8519_v35, %v1726_v10  ;;  %v8636_v0 = vld [vmem:[%s10837_s7] sm:$0x3f] }
 0x2c4   : > { %v2488_v15 = vmul.f32 %v8589_v45, %v2440_v44  ;;  %v1969_v37 = vadd.f32 %v8523_v57, %v1725_v54  ;;  %v1972_v35 = vadd.f32 %v8537_v43, %v1728_v49  ;;  %v8655_v19 = vperm.slane %v8636_v0, 1 }
 0x2c5   : > { %v8593_v58 = vpop.f32.mrf.mxu2  ;;  %v1971_v55 = vadd.f32 %v8533_v61, %v1727_v63  ;;  %v2201_v57 = vadd.f32 %v8545_v50, %v1957_v42  ;;  %v2207_v43 = vadd.f32 %v8551_v34, %v8516_v62  ;;  %v2203_v23 = vadd.f32 %v8561_v7, %v1959_v16  ;;  %v10909_v62 = vld [vmem:[#allocation20_spill] sm:$0xff]  ;;  %v10912_v42 = vld [vmem:[#allocation19_spill] sm:$0xff] }
 0x2c6   : > { %v2334_v3 = vpop.f32.mrf.mxu0  ;;  %v2536_v27 = vadd.f32 %v8606_v5, %v2488_v15  ;;  %v8671_v44 = vperm.slane %v8636_v0, 0  ;;  %v8676_v34 = vadd.f32 %v10909_v62, %v8529_v59  ;;  %v10917_v62 = vld [vmem:[#allocation21_spill] sm:$0xff] }
 0x2c7   : > { %v2439_v30 = vadd.f32 %v2334_v3, %v2195_v40  ;;  %v8608_v11 = vpop.f32.mrf.mxu3  ;;  %v1729_v40 = vadd.f32 %v8507_v18, %v8450_v4  ;;  %v1960_v4 = vadd.f32 %v8525_v48, %v1716_v24  ;;  %v1961_v18 = vadd.f32 %v8535_v22, %v1717_v53 }
 0x2c8   : > { %v2560_v61 = vmax.f32 %v2536_v27, 0.0  ;;  %v2213_v3 = vadd.f32 %v8559_v17, %v1969_v37  ;;  %v2214_v24 = vadd.f32 %v8563_v39, %v1970_v60  ;;  %v8690_v39 = vadd.f32 %v8575_v36, %v1972_v35  ;;  %v10913_v37 = vld [vmem:[#allocation27_spill] sm:$0xff] }
 0x2c9   : > { %v2355_v2 = vpop.f32.mrf.mxu1  ;;  %v2487_v20 = vmul.f32 %v8589_v45, %v2439_v30  ;;  %v8652_v48 = vadd.f32 %v8547_v21, %v1729_v40  ;;  %v8664_v50 = vadd.f32 %v8557_v25, %v1960_v4  ;;  %v8680_v25 = vadd.f32 %v10911_v9, %v10910_v13 }
 0x2ca   : > { %v2446_v6 = vadd.f32 %v2355_v2, %v2202_v56  ;;  %v8684_v17 = vmul.f32 %v8655_v19, %v2560_v61  ;;  %v8693_v59 = vadd.f32 %v8579_v46, %v1961_v18  ;;  %v8697_v53 = vperm.slane %v8636_v0, 2  ;;  %v10914_v18 = vld [vmem:[#allocation18_spill] sm:$0xff] }
 0x2cb   : > { %v2535_v22 = vadd.f32 %v8606_v5, %v2487_v20  ;;  %v8715_v16 = vadd.f32 %v8583_v33, %v1971_v55  ;;  %v8718_v4 = vadd.f32 %v10913_v37, %v1962_v12  ;;  %v8722_v35 = vperm.slane %v8636_v0, 3 }
 0x2cc   : > { %v2494_v28 = vmul.f32 %v8623_v52, %v2446_v6  ;;  %v8756_v37 = vperm.slane %v8636_v0, 4 }
 0x2cd   : > { %v8644_v38 = vpop.f32.mrf.mxu2  ;;  %v2559_v7 = vmax.f32 %v2535_v22, 0.0 }
 0x2ce   : > { %v2542_v15 = vadd.f32 %v8638_v8, %v2494_v28  ;;  %v2336_v1 = vpop.f32.mrf.mxu0 }
 0x2cf   : > { %v2445_v21 = vadd.f32 %v2336_v1, %v2201_v57  ;;  %v8666_v29 = vpop.f32.mrf.mxu3  ;;  %v8706_v36 = vmul.f32 %v8671_v44, %v2559_v7  ;;  %v10915_v57 = vld [vmem:[#allocation25_spill] sm:$0xff] }
 0x2d0   : > { %v2566_v32 = vmax.f32 %v2542_v15, 0.0 }
 0x2d1   : > { %v2493_v54 = vmul.f32 %v8623_v52, %v2445_v21  ;;  %v2358_v47 = vpop.f32.mrf.mxu1 }
 0x2d2   : > { %v8687_v30 = vmul.f32 %v8655_v19, %v2566_v32  ;;  %v2452_v10 = vadd.f32 %v2358_v47, %v2208_v51 }
 0x2d3   : > { %v2541_v49 = vadd.f32 %v8638_v8, %v2493_v54  ;;  %v10918_v54 = vld [vmem:[#allocation16_spill] sm:$0xff] }
 0x2d4   : > { %v2500_v56 = vmul.f32 %v8587_v14, %v2452_v10  ;;  %v8702_v26 = vpack.i.bf16 %v8687_v30, %v8684_v17  ;;  %v8741_v47 = vadd.f32 %v8608_v11, %v10918_v54  ;;  %v8752_v11 = vadd.f32 %v8644_v38, %v8652_v48 }
 0x2d5   : > { %v2372_v63 = vpop.f32.mrf.mxu2  ;;  %v2565_v40 = vmax.f32 %v2541_v49, 0.0 }
 0x2d6   : > { %v2441_v2 = vadd.f32 %v2372_v63, %v10912_v42  ;;  %v2339_v46 = vpop.f32.mrf.mxu0  ;;  %v2548_v61 = vadd.f32 %v10915_v57, %v2500_v56  ;;  %v10919_v56 = vld [vmem:[#allocation26_spill] sm:$0xff] }
 0x2d7   : > { %v8709_v31 = vmul.f32 %v8671_v44, %v2565_v40  ;;  %v2451_v20 = vadd.f32 %v2339_v46, %v2207_v43  ;;  %v2391_v6 = vpop.f32.mrf.mxu3  ;;  %v10916_v43 = vld [vmem:[#allocation17_spill] sm:$0xff] }
 0x2d8   : > { %v2489_v27 = vmul.f32 %v8589_v45, %v2441_v2  ;;  %v2442_v28 = vadd.f32 %v2391_v6, %v10914_v18  ;;  %v8734_v51 = vadd.f32 %v8593_v58, %v10916_v43  ;;  %v2572_v7 = vmax.f32 %v2548_v61, 0.0 }
 0x2d9   : > { %v2499_v22 = vmul.f32 %v8587_v14, %v2451_v20  ;;  %v2360_v15 = vpop.f32.mrf.mxu1  ;;  %v8728_v1 = vpack.i.bf16 %v8709_v31, %v8706_v36  ;;  %v8745_v58 = vperm.slane %v8636_v0, 5  ;;  %v8760_v18 = vadd.f32 %v8666_v29, %v8648_v41 }
 0x2da   : > { %v2537_v33 = vadd.f32 %v8606_v5, %v2489_v27  ;;  %v2490_v55 = vmul.f32 %v8589_v45, %v2442_v28  ;;  %v2458_v12 = vadd.f32 %v2360_v15, %v2214_v24  ;;  %v8763_v28 = vmul.f32 %v8655_v19, %v2572_v7 }
 0x2db   : > { %v2547_v21 = vadd.f32 %v10915_v57, %v2499_v22 }
 0x2dc   : > { %v2538_v32 = vadd.f32 %v8606_v5, %v2490_v55  ;;  %v2506_v13 = vmul.f32 %v10917_v62, %v2458_v12  ;;  %v2561_v49 = vmax.f32 %v2537_v33, 0.0 }
 0x2dd   : > { %v2374_v9 = vpop.f32.mrf.mxu2  ;;  %v2571_v42 = vmax.f32 %v2547_v21, 0.0 }
 0x2de   : > { %v2447_v10 = vadd.f32 %v2374_v9, %v2203_v23  ;;  %v2554_v24 = vadd.f32 %v10919_v56, %v2506_v13  ;;  %v2341_v63 = vpop.f32.mrf.mxu0  ;;  %v2562_v2 = vmax.f32 %v2538_v32, 0.0  ;;  %v8768_v38 = vmul.f32 %v8697_v53, %v2561_v49  ;;  %v10922_v9 = vld [vmem:[#allocation23_spill] sm:$0xff] }
 0x2df   : > { %v2457_v27 = vadd.f32 %v2341_v63, %v2213_v3  ;;  %v2393_v20 = vpop.f32.mrf.mxu3  ;;  %v8776_v41 = vmul.f32 %v8671_v44, %v2571_v42 }
 0x2e0   : > { %v2495_v46 = vmul.f32 %v8623_v52, %v2447_v10  ;;  %v2578_v23 = vmax.f32 %v2554_v24, 0.0  ;;  %v2448_v6 = vadd.f32 %v2393_v20, %v8664_v50  ;;  %v10920_v50 = vld [vmem:[#allocation24_spill] sm:$0xff]  ;;  %v8779_v29 = vmul.f32 %v8722_v35, %v2562_v2 }
 0x2e1   : > { %v2505_v61 = vmul.f32 %v10917_v62, %v2457_v27  ;;  %v2429_v22 = vpop.f32.mrf.mxu1 }
 0x2e2   : > { %v2543_v3 = vadd.f32 %v8638_v8, %v2495_v46  ;;  %v8771_v48 = vmul.f32 %v8655_v19, %v2578_v23  ;;  %v2496_v0 = vmul.f32 %v8623_v52, %v2448_v6  ;;  %v2444_v15 = vadd.f32 %v2429_v22, %v10920_v50  ;;  %10921 = vst [vmem:[#allocation20_spill] sm:$0xff] %v8779_v29 }
 0x2e3   : > { %v2553_v55 = vadd.f32 %v10919_v56, %v2505_v61 }
 0x2e4   : > { %v2567_v33 = vmax.f32 %v2543_v3, 0.0  ;;  %v2544_v12 = vadd.f32 %v8638_v8, %v2496_v0  ;;  %v2492_v43 = vmul.f32 %v8589_v45, %v2444_v15  ;;  %v8786_v19 = vpack.i.bf16 %v8771_v48, %v8763_v28 }
 0x2e5   : > { %v2377_v21 = vpop.f32.mrf.mxu2  ;;  %v2577_v13 = vmax.f32 %v2553_v55, 0.0 }
 0x2e6   : > { %v8789_v32 = vmul.f32 %v8697_v53, %v2567_v33  ;;  %v2453_v54 = vadd.f32 %v2377_v21, %v10922_v9  ;;  %v2568_v7 = vmax.f32 %v2544_v12, 0.0  ;;  %v2540_v10 = vadd.f32 %v8606_v5, %v2492_v43  ;;  %v2410_v49 = vpop.f32.mrf.mxu0  ;;  %5953 = vrot.lane.b32.xlu1 %v8786_v19, %s6639_s11 }
 0x2e7   : > { %v8796_v24 = vmul.f32 %v8671_v44, %v2577_v13  ;;  %v2443_v42 = vadd.f32 %v2410_v49, %v8680_v25  ;;  %v2396_v2 = vpop.f32.mrf.mxu3 }
 0x2e8   : > { %v2501_v63 = vmul.f32 %v8587_v14, %v2453_v54  ;;  %v8802_v46 = vpack.i.bf16 %v8789_v32, %v8768_v38  ;;  %v8805_v27 = vmul.f32 %v8722_v35, %v2568_v7  ;;  %v2564_v20 = vmax.f32 %v2540_v10, 0.0 }
 0x2e9   : > { %v2454_v23 = vadd.f32 %v2396_v2, %v8676_v34  ;;  %v2491_v44 = vmul.f32 %v8589_v45, %v2443_v42  ;;  %v2431_v3 = vpop.f32.mrf.mxu1  ;;  %v8812_v61 = vpack.i.bf16 %v8796_v24, %v8776_v41 }
 0x2ea   : > { %10923 = vst [vmem:[#allocation15_spill] sm:$0xff] %v8805_v27  ;;  %v2549_v6 = vadd.f32 %v10915_v57, %v2501_v63  ;;  %v8815_v25 = vmul.f32 %v8745_v58, %v2564_v20  ;;  %v2450_v0 = vadd.f32 %v2431_v3, %v8718_v4  ;;  %v8821_v50 = vpack.i.bf16 %v8805_v27, %v8779_v29 }
 0x2eb   : > { %v2502_v22 = vmul.f32 %v8587_v14, %v2454_v23  ;;  %v2539_v15 = vadd.f32 %v8606_v5, %v2491_v44  ;;  %5943 = vrot.lane.b32.xlu0 %v8812_v61, %s6639_s11 }
 0x2ec   : > { %v2573_v34 = vmax.f32 %v2549_v6, 0.0  ;;  %v2498_v33 = vmul.f32 %v8623_v52, %v2450_v0 }
 0x2ed   : > { %v2550_v45 = vadd.f32 %v10915_v57, %v2502_v22  ;;  %v2379_v55 = vpop.f32.mrf.mxu2  ;;  %v2563_v43 = vmax.f32 %v2539_v15, 0.0 }
 0x2ee   : > { %v8829_v12 = vmul.f32 %v8697_v53, %v2573_v34  ;;  %v2459_v4 = vadd.f32 %v2379_v55, %v8715_v16  ;;  %v2546_v13 = vadd.f32 %v8638_v8, %v2498_v33  ;;  %v2412_v9 = vpop.f32.mrf.mxu0  ;;  %5958 = vrot.lane.b32.xlu1 %v8702_v26, %s6639_s11 }
 0x2ef   : > { %v2574_v21 = vmax.f32 %v2550_v45, 0.0  ;;  %v8836_v5 = vmul.f32 %v8756_v37, %v2563_v43  ;;  %v2449_v7 = vadd.f32 %v2412_v9, %v8693_v59  ;;  %v2398_v10 = vpop.f32.mrf.mxu3 }
 0x2f0   : > { %v2507_v54 = vmul.f32 %v10917_v62, %v2459_v4  ;;  %v2570_v63 = vmax.f32 %v2546_v13, 0.0  ;;  %v2460_v16 = vadd.f32 %v2398_v10, %v8690_v39 }
 0x2f1   : > { %v8841_v49 = vmul.f32 %v8722_v35, %v2574_v21  ;;  %v2497_v2 = vmul.f32 %v8623_v52, %v2449_v7  ;;  %v2434_v20 = vpop.f32.mrf.mxu1 }
 0x2f2   : > { %v2555_v42 = vadd.f32 %v10919_v56, %v2507_v54  ;;  %v8847_v23 = vmul.f32 %v8745_v58, %v2570_v63  ;;  %v2508_v6 = vmul.f32 %v10917_v62, %v2460_v16  ;;  %v2456_v44 = vadd.f32 %v2434_v20, %v8741_v47 }
 0x2f3   : > { %v2545_v3 = vadd.f32 %v8638_v8, %v2497_v2  ;;  %5948 = vrot.lane.b32.xlu0 %v8728_v1, %s6639_s11 }
 0x2f4   : > { %v2579_v59 = vmax.f32 %v2555_v42, 0.0  ;;  %v2556_v39 = vadd.f32 %v10919_v56, %v2508_v6  ;;  %v2504_v22 = vmul.f32 %v8587_v14, %v2456_v44  ;;  %v8858_v52 = vpack.i.bf16 %v8847_v23, %v8815_v25 }
 0x2f5   : > { %v2569_v34 = vmax.f32 %v2545_v3, 0.0 }
 0x2f6   : > { %v8861_v0 = vmul.f32 %v8697_v53, %v2579_v59  ;;  %v2580_v15 = vmax.f32 %v2556_v39, 0.0  ;;  %v2552_v47 = vadd.f32 %v10915_v57, %v2504_v22  ;;  %v2415_v45 = vpop.f32.mrf.mxu0  ;;  %v9037_v39 = vld [vmem:[#allocation7 + $0x10] sm:$0xff] }
 0x2f7   : > { %v8865_v8 = vmul.f32 %v8756_v37, %v2569_v34  ;;  %v2455_v33 = vadd.f32 %v2415_v45, %v8734_v51 }
 0x2f8   : > { %v8870_v55 = vpack.i.bf16 %v8861_v0, %v8829_v12  ;;  %v8873_v43 = vmul.f32 %v8722_v35, %v2580_v15  ;;  %v2576_v4 = vmax.f32 %v2552_v47, 0.0 }
 0x2f9   : > { %v2503_v53 = vmul.f32 %v8587_v14, %v2455_v33  ;;  %v2436_v21 = vpop.f32.mrf.mxu1  ;;  %v8878_v13 = vpack.i.bf16 %v8865_v8, %v8836_v5 }
 0x2fa   : > { %v8881_v9 = vmul.f32 %v8745_v58, %v2576_v4  ;;  %v2462_v51 = vadd.f32 %v2436_v21, %v8760_v18  ;;  %v8886_v54 = vpack.i.bf16 %v8873_v43, %v8841_v49 }
 0x2fb   : > { %v2551_v35 = vadd.f32 %v10915_v57, %v2503_v53 }
 0x2fc   : > { %v2510_v7 = vmul.f32 %v10917_v62, %v2462_v51  ;;  %5973 = vrot.lane.b32.xlu0 %v8886_v54, %s6639_s11 }
 0x2fd   : > { %v2575_v14 = vmax.f32 %v2551_v35, 0.0 }
 0x2fe   : > { %v2558_v10 = vadd.f32 %v10919_v56, %v2510_v7  ;;  %v2417_v63 = vpop.f32.mrf.mxu0 }
 0x2ff   : > { %v8894_v16 = vmul.f32 %v8756_v37, %v2575_v14  ;;  %v2461_v18 = vadd.f32 %v2417_v63, %v8752_v11 }
 0x300   : > { %v2582_v42 = vmax.f32 %v2558_v10, 0.0 }
 0x301   : > { %v2509_v2 = vmul.f32 %v10917_v62, %v2461_v18 }
 0x302   : > { %v8899_v20 = vmul.f32 %v8745_v58, %v2582_v42 }
 0x303   : > { %v2557_v6 = vadd.f32 %v10919_v56, %v2509_v2 }
 0x304   : > { %5983 = vrot.lane.b32.xlu0 %v8878_v13, %s6639_s11  ;;  %v8910_v11 = vpack.i.bf16 %v8899_v20, %v8881_v9 }
 0x305   : > { %v2581_v59 = vmax.f32 %v2557_v6, 0.0 }
 0x306   : > { %5963 = vrot.lane.b32.xlu2 %v8910_v11, %s6639_s11 }
 0x307   : > { %v8919_v58 = vmul.f32 %v8756_v37, %v2581_v59 }
 0x309   : > { %v8933_v47 = vpack.i.bf16 %v8919_v58, %v8894_v16 }
 0x30b   : > { %5988 = vrot.lane.b32.xlu1 %v8933_v47, %s6639_s11 }
 0x30c   : > { %6003 = vrot.lane.b32.xlu0 %v8786_v19, %s6640_s16 }
 0x30e   : > { %5968 = vrot.lane.b32.xlu2 %v8858_v52, %s6639_s11 }
 0x313   : > { %5993 = vrot.lane.b32.xlu1 %v8870_v55, %s6639_s11 }
 0x314   : > { %6018 = vrot.lane.b32.xlu0 %v8702_v26, %s6640_s16 }
 0x316   : > { %5978 = vrot.lane.b32.xlu2 %v8821_v50, %s6639_s11 }
 0x31b   : > { %6008 = vrot.lane.b32.xlu1 %v8870_v55, %s6640_s16 }
 0x31c   : > { %6033 = vrot.lane.b32.xlu0 %v8812_v61, %s6640_s16 }
 0x31e   : > { %5998 = vrot.lane.b32.xlu2 %v8802_v46, %s6639_s11 }
 0x323   : > { %6023 = vrot.lane.b32.xlu1 %v8802_v46, %s6640_s16 }
 0x324   : > { %6048 = vrot.lane.b32.xlu0 %v8858_v52, %s6640_s16 }
 0x326   : > { %6013 = vrot.lane.b32.xlu2 %v8886_v54, %s6640_s16 }
 0x32b   : > { %6038 = vrot.lane.b32.xlu1 %v8910_v11, %s6640_s16 }
 0x32c   : > { %6073 = vrot.lane.b32.xlu0 %v8910_v11, %s6641_s20 }
 0x32e   : > { %6028 = vrot.lane.b32.xlu2 %v8821_v50, %s6640_s16 }
 0x333   : > { %6053 = vrot.lane.b32.xlu1 %v8812_v61, %s6641_s20 }
 0x334   : > { %6078 = vrot.lane.b32.xlu0 %v8858_v52, %s6641_s20 }
 0x336   : > { %6043 = vrot.lane.b32.xlu2 %v8728_v1, %s6640_s16 }
 0x33b   : > { %6063 = vrot.lane.b32.xlu1 %v8728_v1, %s6641_s20 }
 0x33c   : > { %6093 = vrot.lane.b32.xlu0 %v8886_v54, %s6641_s20 }
 0x33e   : > { %6058 = vrot.lane.b32.xlu2 %v8786_v19, %s6641_s20 }
 0x343   : > { %6083 = vrot.lane.b32.xlu1 %v8933_v47, %s6640_s16 }
 0x344   : > { %6103 = vrot.lane.b32.xlu0 %v8878_v13, %s6641_s20 }
 0x346   : > { %6068 = vrot.lane.b32.xlu2 %v8702_v26, %s6641_s20 }
 0x34b   : > { %6108 = vrot.lane.b32.xlu1 %v8933_v47, %s6641_s20 }
 0x34c   : > { %6123 = vrot.lane.b32.xlu0 %v8786_v19, %s6642_s24 }
 0x34e   : > { %6088 = vrot.lane.b32.xlu2 %v8878_v13, %s6640_s16 }
 0x353   : > { %6113 = vrot.lane.b32.xlu1 %v8870_v55, %s6641_s20 }
 0x354   : > { %6138 = vrot.lane.b32.xlu0 %v8702_v26, %s6642_s24 }
 0x356   : > { %6098 = vrot.lane.b32.xlu2 %v8821_v50, %s6641_s20 }
 0x358   : > { %v8997_v45 = vpop.permute.xlu1 %5953 }
 0x359   : > { %v10853_v4 = vunpack.i.h.bf16 %v8997_v45  ;;  %v10852_v53 = vunpack.i.l.bf16 %v8997_v45 }
 0x35b   : > { %6128 = vrot.lane.b32.xlu1 %v8870_v55, %s6642_s24 }
 0x35c   : > { %6153 = vrot.lane.b32.xlu0 %v8812_v61, %s6642_s24 }
 0x35d   : > { %v5944_v33 = vpop.permute.xlu0 %5943 }
 0x35e   : > { %v5946_v21 = vunpack.i.h.bf16 %v5944_v33  ;;  %v5945_v51 = vunpack.i.l.bf16 %v5944_v33  ;;  %6118 = vrot.lane.b32.xlu2 %v8802_v46, %s6641_s20  ;;  %s10654_s20 = scalar_lea.vmem [#allocation8], %s5374_s1  ;;  %s5372_s1 = smul.u32 48, %s6717_s9 }
 0x360   : > { %v2776_v7 = vsel %vm525_vm0, %v5946_v21, %v10853_v4  ;;  %v2775_v14 = vsel %vm525_vm0, %v5945_v51, %v10852_v53  ;;  %v5964_v10 = vpop.permute.xlu2 %5963  ;;  %v9015_v2 = vpop.permute.xlu1 %5958 }
 0x361   : > { %v2793_v63 = vpack.c.bf16 %v2776_v7, %v2775_v14  ;;  %v5966_v18 = vunpack.i.h.bf16 %v5964_v10  ;;  %v5965_v42 = vunpack.i.l.bf16 %v5964_v10  ;;  %v10850_v7 = vunpack.i.h.bf16 %v9015_v2 }
 0x362   : > { %v10851_v14 = vunpack.i.l.bf16 %v9015_v2 }
 0x363   : > { %v2780_v6 = vsel %vm525_vm0, %v5966_v18, %v5946_v21  ;;  %2839 = vmatpush.bf16.msrb.mxu3 %v2793_v63  ;;  %6143 = vrot.lane.b32.xlu1 %v8802_v46, %s6642_s24  ;;  %v2779_v59 = vsel %vm525_vm0, %v5965_v42, %v5945_v51 }
 0x364   : > { %6168 = vrot.lane.b32.xlu0 %v8858_v52, %s6642_s24  ;;  %v2792_v33 = vpack.c.bf16 %v2780_v6, %v2779_v59 }
 0x365   : > { %v5949_v34 = vpop.permute.xlu0 %5948 }
 0x366   : > { %v5951_v10 = vunpack.i.h.bf16 %v5949_v34  ;;  %v5950_v22 = vunpack.i.l.bf16 %v5949_v34  ;;  %6133 = vrot.lane.b32.xlu2 %v8886_v54, %s6642_s24  ;;  %2820 = vmatpush.bf16.msrb.mxu2 %v2792_v33 }
 0x368   : > { %v5969_v21 = vpop.permute.xlu2 %5968  ;;  %v2773_v51 = vsel %vm525_vm0, %v5950_v22, %v10851_v14  ;;  %v2774_v63 = vsel %vm525_vm0, %v5951_v10, %v10850_v7 }
 0x369   : > { %v5971_v6 = vunpack.i.h.bf16 %v5969_v21  ;;  %v5970_v59 = vunpack.i.l.bf16 %v5969_v21  ;;  %v2787_v15 = vpack.c.bf16 %v2774_v63, %v2773_v51  ;;  %v9059_v51 = vld [vmem:[#allocation7 + $0x18] sm:$0xff] }
 0x36b   : > { %2840 = vmatpush.bf16.msrb.mxu3 %v2787_v15  ;;  %6158 = vrot.lane.b32.xlu1 %v8910_v11, %s6642_s24  ;;  %v2777_v34 = vsel %vm525_vm0, %v5970_v59, %v5950_v22  ;;  %v2778_v33 = vsel %vm525_vm0, %v5971_v6, %v5951_v10 }
 0x36c   : > { %6183 = vrot.lane.b32.xlu0 %v8870_v55, %s6643_s25  ;;  %v2786_v3 = vpack.c.bf16 %v2778_v33, %v2777_v34 }
 0x36e   : > { %5162 = vmatmul.msk.bf16.vlgmr.msrb.gmra.mxu3 %vm577_vm1, %v9037_v39  ;;  %v5974_v21 = vpop.permute.xlu0 %5973  ;;  %2821 = vmatpush.bf16.msrb.mxu2 %v2786_v3 }
 0x36f   : > { %6148 = vrot.lane.b32.xlu2 %v8821_v50, %s6642_s24  ;;  %v5976_v3 = vunpack.i.h.bf16 %v5974_v21  ;;  %v5975_v63 = vunpack.i.l.bf16 %v5974_v21 }
 0x370   : > { %v5979_v15 = vpop.permute.xlu2 %5978 }
 0x371   : > { %5160 = vmatmul.msk.bf16.vlgmr.msrb.gmra.mxu2 %vm577_vm1, %v9037_v39  ;;  %v5981_v60 = vunpack.i.h.bf16 %v5979_v15  ;;  %v5980_v44 = vunpack.i.l.bf16 %v5979_v15 }
 0x373   : > { %6173 = vrot.lane.b32.xlu1 %v8933_v47, %s6642_s24 }
 0x374   : > { %6193 = vrot.lane.b32.xlu0 %v8802_v46, %s6643_s25 }
 0x376   : > { %v5984_v22 = vpop.permute.xlu0 %5983 }
 0x377   : > { %6163 = vrot.lane.b32.xlu2 %v8728_v1, %s6642_s24  ;;  %v5986_v33 = vunpack.i.h.bf16 %v5984_v22  ;;  %v5985_v56 = vunpack.i.l.bf16 %v5984_v22 }
 0x378   : > { %v5999_v10 = vpop.permute.xlu2 %5998 }
 0x379   : > { %v2761_v15 = vsel %vm525_vm0, %v5980_v44, %v5985_v56 }
 0x37b   : > { %6188 = vrot.lane.b32.xlu1 %v8886_v54, %s6643_s25 }
 0x37c   : > { %6213 = vrot.lane.b32.xlu0 %v8812_v61, %s6643_s25 }
 0x37d   : > { %v5989_v34 = vpop.permute.xlu1 %5988 }
 0x37e   : > { %v5991_v37 = vunpack.i.h.bf16 %v5989_v34  ;;  %v5990_v62 = vunpack.i.l.bf16 %v5989_v34  ;;  %5163 = vmatmul.msk.bf16.gmra.mxu3 %vm577_vm1, %v9059_v51  ;;  %v9067_v40 = vpop.permute.xlu0 %6003 }
 0x37f   : > { %6178 = vrot.lane.b32.xlu2 %v8878_v13, %s6642_s24 }
 0x380   : > { %v2760_v57 = vsel %vm525_vm0, %v5991_v37, %v5966_v18  ;;  %v2764_v21 = vsel %vm525_vm0, %v5976_v3, %v5991_v37  ;;  %v2759_v22 = vsel %vm525_vm0, %v5990_v62, %v5965_v42  ;;  %v2763_v34 = vsel %vm525_vm0, %v5975_v63, %v5990_v62  ;;  %v9079_v7 = vpop.permute.xlu2 %6013 }
 0x381   : > { %v2796_v14 = vpack.c.bf16 %v2764_v21, %v2763_v34  ;;  %v2797_v53 = vpack.c.bf16 %v2760_v57, %v2759_v22  ;;  %5161 = vmatmul.msk.bf16.gmra.mxu2 %vm577_vm1, %v9059_v51  ;;  %v2762_v18 = vsel %vm525_vm0, %v5981_v60, %v5986_v33  ;;  %v2757_v62 = vsel %vm525_vm0, %v5985_v56, %v5970_v59 }
 0x382   : > { %v2758_v37 = vsel %vm525_vm0, %v5986_v33, %v5971_v6  ;;  %v6001_v57 = vunpack.i.h.bf16 %v5999_v10  ;;  %v2790_v21 = vpack.c.bf16 %v2762_v18, %v2761_v15  ;;  %v6000_v22 = vunpack.i.l.bf16 %v5999_v10 }
 0x383   : > { %6198 = vrot.lane.b32.xlu1 %v8821_v50, %s6643_s25  ;;  %2896 = vmatpush.bf16.msra.mxu2 %v2796_v14  ;;  %v2791_v27 = vpack.c.bf16 %v2758_v37, %v2757_v62  ;;  %v10926_v59 = vunpack.i.l.bf16 %v8997_v45  ;;  %v10928_v37 = vunpack.i.h.bf16 %v9015_v2 }
 0x384   : > { %2915 = vmatpush.bf16.msra.mxu3 %v2797_v53  ;;  %6228 = vrot.lane.b32.xlu0 %v8702_v26, %s6643_s25  ;;  %v10925_v53 = vunpack.i.h.bf16 %v8997_v45  ;;  %v2765_v45 = vsel %vm525_vm0, %v6000_v22, %v5980_v44  ;;  %v6016_v44 = vunpack.i.h.bf16 %v9079_v7 }
 0x385   : > { %v5994_v42 = vpop.permute.xlu1 %5993 }
 0x386   : > { %v5996_v34 = vunpack.i.h.bf16 %v5994_v42  ;;  %v5995_v4 = vunpack.i.l.bf16 %v5994_v42  ;;  %v9095_v29 = vpop.permute.xlu0 %6018 }
 0x387   : > { %6203 = vrot.lane.b32.xlu2 %v8933_v47, %s6643_s25  ;;  %2897 = vmatpush.bf16.msra.mxu2 %v2790_v21 }
 0x388   : > { %v2768_v56 = vsel %vm525_vm0, %v5996_v34, %v5976_v3  ;;  %v2772_v14 = vsel %vm525_vm0, %v10925_v53, %v5996_v34  ;;  %v2767_v6 = vsel %vm525_vm0, %v5995_v4, %v5975_v63  ;;  %v2771_v10 = vsel %vm525_vm0, %v10926_v59, %v5995_v4  ;;  %2916 = vmatpush.bf16.msra.mxu3 %v2791_v27  ;;  %v9111_v33 = vpop.permute.xlu2 %6028 }
 0x389   : > { %v2794_v15 = vpack.c.bf16 %v2772_v14, %v2771_v10  ;;  %v2795_v18 = vpack.c.bf16 %v2768_v56, %v2767_v6  ;;  %v10927_v3 = vunpack.i.l.bf16 %v9015_v2  ;;  %v2770_v63 = vsel %vm525_vm0, %v10928_v37, %v6001_v57 }
 0x38a   : > { %v2766_v27 = vsel %vm525_vm0, %v6001_v57, %v5981_v60  ;;  %v6006_v4 = vunpack.i.h.bf16 %v9067_v40  ;;  %v6005_v2 = vunpack.i.l.bf16 %v9067_v40  ;;  %v6021_v53 = vunpack.i.h.bf16 %v9095_v29 }
 0x38b   : > { %v2769_v62 = vsel %vm525_vm0, %v10927_v3, %v6000_v22  ;;  %6218 = vrot.lane.b32.xlu1 %v8786_v19, %s6643_s25  ;;  %2858 = vmatpush.bf16.msra.mxu0 %v2794_v15  ;;  %v2789_v34 = vpack.c.bf16 %v2766_v27, %v2765_v45  ;;  %v6015_v22 = vunpack.i.l.bf16 %v9079_v7  ;;  %v6020_v45 = vunpack.i.l.bf16 %v9095_v29 }
 0x38c   : > { %2877 = vmatpush.bf16.msra.mxu1 %v2795_v18  ;;  %6243 = vrot.lane.b32.xlu0 %v8870_v55, %s6644_s13  ;;  %v2788_v21 = vpack.c.bf16 %v2770_v63, %v2769_v62 }
 0x38d   : > { %v6009_v42 = vpop.permute.xlu1 %6008 }
 0x38e   : > { %v6011_v60 = vunpack.i.h.bf16 %v6009_v42  ;;  %v6010_v57 = vunpack.i.l.bf16 %v6009_v42  ;;  %5170 = vmatmul.msk.bf16.vlgmr.msra.gmra.mxu3 %vm577_vm1, %v9037_v39  ;;  %v6034_v56 = vpop.permute.xlu0 %6033 }
 0x38f   : > { %v6036_v14 = vunpack.i.h.bf16 %v6034_v56  ;;  %v6035_v6 = vunpack.i.l.bf16 %v6034_v56  ;;  %6208 = vrot.lane.b32.xlu2 %v8878_v13, %s6643_s25  ;;  %2859 = vmatpush.bf16.msra.mxu0 %v2788_v21 }
 0x390   : > { %v2680_v40 = vsel %vm436_vm2, %v6011_v60, %v6016_v44  ;;  %v2684_v59 = vsel %vm436_vm2, %v6006_v4, %v6011_v60  ;;  %v2679_v10 = vsel %vm436_vm2, %v6010_v57, %v6015_v22  ;;  %v2683_v15 = vsel %vm436_vm2, %v6005_v2, %v6010_v57  ;;  %2878 = vmatpush.bf16.msra.mxu1 %v2789_v34  ;;  %v6044_v18 = vpop.permute.xlu2 %6043 }
 0x391   : > { %v2705_v3 = vpack.c.bf16 %v2684_v59, %v2683_v15  ;;  %v2706_v62 = vpack.c.bf16 %v2680_v40, %v2679_v10  ;;  %v2687_v37 = vsel %vm436_vm2, %v6035_v6, %v6005_v2  ;;  %v2688_v63 = vsel %vm436_vm2, %v6036_v14, %v6006_v4  ;;  %5168 = vmatmul.msk.bf16.vlgmr.msra.gmra.mxu2 %vm577_vm1, %v9037_v39 }
 0x392   : > { %v2704_v27 = vpack.c.bf16 %v2688_v63, %v2687_v37  ;;  %v6046_v42 = vunpack.i.h.bf16 %v6044_v18  ;;  %v6045_v21 = vunpack.i.l.bf16 %v6044_v18  ;;  %5164 = vmatmul.msk.bf16.vlgmr.msra.gmra.mxu0 %vm577_vm1, %v9037_v39  ;;  %v6031_v34 = vunpack.i.h.bf16 %v9111_v33 }
 0x393   : > { %5166 = vmatmul.msk.bf16.vlgmr.msra.gmra.mxu1 %vm577_vm1, %v9037_v39  ;;  %6233 = vrot.lane.b32.xlu1 %v8812_v61, %s6644_s13  ;;  %v6030_v39 = vunpack.i.l.bf16 %v9111_v33 }
 0x394   : > { %2988 = vmatpush.bf16.msrb.mxu2 %v2705_v3  ;;  %3007 = vmatpush.bf16.msrb.mxu3 %v2706_v62  ;;  %v2685_v4 = vsel %vm436_vm2, %v6045_v21, %v6020_v45  ;;  %v2686_v29 = vsel %vm436_vm2, %v6046_v42, %v6021_v53 }
 0x395   : > { %6258 = vrot.lane.b32.xlu0 %v8802_v46, %s6644_s13  ;;  %v6024_v2 = vpop.permute.xlu1 %6023  ;;  %2969 = vmatpush.bf16.msrb.mxu1 %v2704_v27  ;;  %v2698_v40 = vpack.c.bf16 %v2686_v29, %v2685_v4 }
 0x396   : > { %v6026_v60 = vunpack.i.h.bf16 %v6024_v2  ;;  %v6025_v57 = vunpack.i.l.bf16 %v6024_v2  ;;  %v9171_v56 = vpop.permute.xlu0 %6048 }
 0x397   : > { %6223 = vrot.lane.b32.xlu2 %v8728_v1, %s6643_s25  ;;  %v10856_v63 = vunpack.i.h.bf16 %v9171_v56  ;;  %v10929_v7 = vunpack.i.l.bf16 %v9171_v56 }
 0x398   : > { %v9175_v59 = vpop.permute.xlu2 %6058  ;;  %v2681_v10 = vsel %vm436_vm2, %v6020_v45, %v6025_v57  ;;  %v2682_v15 = vsel %vm436_vm2, %v6021_v53, %v6026_v60  ;;  %v2677_v18 = vsel %vm436_vm2, %v6025_v57, %v6030_v39  ;;  %v2678_v3 = vsel %vm436_vm2, %v6026_v60, %v6031_v34 }
 0x399   : > { %2970 = vmatpush.bf16.msrb.mxu1 %v2698_v40  ;;  %v2699_v62 = vpack.c.bf16 %v2682_v15, %v2681_v10  ;;  %v2700_v37 = vpack.c.bf16 %v2678_v3, %v2677_v18  ;;  %v10861_v45 = vunpack.i.l.bf16 %v9171_v56  ;;  %v10858_v15 = vunpack.i.l.bf16 %v9175_v59 }
 0x39b   : > { %6248 = vrot.lane.b32.xlu1 %v8728_v1, %s6644_s13  ;;  %2989 = vmatpush.bf16.msrb.mxu2 %v2699_v62  ;;  %v2689_v10 = vsel %vm436_vm2, %v10861_v45, %v6045_v21 }
 0x39c   : > { %3008 = vmatpush.bf16.msrb.mxu3 %v2700_v37 }
 0x39d   : > { %6278 = vrot.lane.b32.xlu0 %v8933_v47, %s6644_s13  ;;  %v9193_v53 = vpop.permute.xlu1 %6038 }
 0x39e   : > { %v6041_v27 = vunpack.i.h.bf16 %v9193_v53  ;;  %v6040_v4 = vunpack.i.l.bf16 %v9193_v53  ;;  %5171 = vmatmul.msk.bf16.gmra.mxu3 %vm577_vm1, %v9059_v51  ;;  %v9201_v29 = vpop.permute.xlu0 %6073 }
 0x39f   : > { %6238 = vrot.lane.b32.xlu2 %v8786_v19, %s6644_s13  ;;  %v10859_v3 = vunpack.i.h.bf16 %v9201_v29 }
 0x3a0   : > { %v2692_v2 = vsel %vm436_vm2, %v6041_v27, %v6036_v14  ;;  %v2691_v60 = vsel %vm436_vm2, %v6040_v4, %v6035_v6  ;;  %v9213_v57 = vpop.permute.xlu2 %6068  ;;  %v2690_v14 = vsel %vm436_vm2, %v10856_v63, %v6046_v42  ;;  %v10857_v6 = vunpack.i.h.bf16 %v9175_v59 }
 0x3a1   : > { %v2703_v40 = vpack.c.bf16 %v2692_v2, %v2691_v60  ;;  %5169 = vmatmul.msk.bf16.gmra.mxu2 %vm577_vm1, %v9059_v51  ;;  %v2697_v18 = vpack.c.bf16 %v2690_v14, %v2689_v10  ;;  %v10860_v42 = vunpack.i.l.bf16 %v9201_v29 }
 0x3a2   : > { %5165 = vmatmul.msk.bf16.gmra.mxu0 %vm577_vm1, %v9059_v51 }
 0x3a3   : > { %5167 = vmatmul.msk.bf16.gmra.mxu1 %vm577_vm1, %v9059_v51  ;;  %6263 = vrot.lane.b32.xlu1 %v8910_v11, %s6643_s25 }
 0x3a4   : > { %2950 = vmatpush.bf16.msrb.mxu0 %v2703_v40 }
 0x3a5   : > { %6283 = vrot.lane.b32.xlu0 %v8858_v52, %s6644_s13  ;;  %v6054_v21 = vpop.permute.xlu1 %6053 }
 0x3a6   : > { %v6056_v62 = vunpack.i.h.bf16 %v6054_v21  ;;  %v6055_v37 = vunpack.i.l.bf16 %v6054_v21  ;;  %v9237_v51 = vpop.permute.xlu0 %6078 }
 0x3a7   : > { %6253 = vrot.lane.b32.xlu2 %v8702_v26, %s6644_s13 }
 0x3a8   : > { %v3125_v2 = vsel %vm876_vm3, %v6056_v62, %v10857_v6  ;;  %v3129_v60 = vsel %vm876_vm3, %v10859_v3, %v6056_v62  ;;  %v3124_v40 = vsel %vm876_vm3, %v6055_v37, %v10858_v15  ;;  %v3128_v10 = vsel %vm876_vm3, %v10860_v42, %v6055_v37  ;;  %2951 = vmatpush.bf16.msrb.mxu0 %v2697_v18  ;;  %v6089_v14 = vpop.permute.xlu2 %6088  ;;  %v9257_v6 = vld [vmem:[#allocation7] sm:$0xff] }
 0x3a9   : > { %v3141_v21 = vpack.c.bf16 %v3129_v60, %v3128_v10  ;;  %v3142_v63 = vpack.c.bf16 %v3125_v2, %v3124_v40  ;;  %v10863_v62 = vunpack.i.h.bf16 %v9213_v57  ;;  %v10864_v15 = vunpack.i.l.bf16 %v9213_v57 }
 0x3aa   : > { %v10865_v18 = vunpack.i.h.bf16 %v9237_v51  ;;  %v10862_v37 = vunpack.i.l.bf16 %v9237_v51 }
 0x3ab   : > { %6288 = vrot.lane.b32.xlu1 %v8910_v11, %s6644_s13  ;;  %3169 = vmatpush.bf16.msra.mxu2 %v3141_v21 }
 0x3ac   : > { %3188 = vmatpush.bf16.msra.mxu3 %v3142_v63 }
 0x3ad   : > { %6303 = vrot.lane.b32.xlu0 %v8870_v55, %s6645_s10  ;;  %v6064_v3 = vpop.permute.xlu1 %6063 }
 0x3ae   : > { %v6066_v2 = vunpack.i.h.bf16 %v6064_v3  ;;  %v6065_v60 = vunpack.i.l.bf16 %v6064_v3  ;;  %5186 = vmatmul.msk.bf16.vlgmr.msrb.gmra.mxu3 %vm577_vm1, %v9257_v6  ;;  %v9269_v40 = vpop.permute.xlu0 %6093 }
 0x3af   : > { %6268 = vrot.lane.b32.xlu2 %v8858_v52, %s6643_s25  ;;  %s4867_s25 = scalar_lea.hbm %s10838_s8, %s5372_s1 }
 0x3b0   : > { %v9273_v63 = vpop.permute.xlu2 %6098  ;;  %v3126_v10 = vsel %vm876_vm3, %v10862_v37, %v6065_v60  ;;  %v3127_v3 = vsel %vm876_vm3, %v10865_v18, %v6066_v2  ;;  %v3122_v21 = vsel %vm876_vm3, %v6065_v60, %v10864_v15  ;;  %v3123_v42 = vsel %vm876_vm3, %v6066_v2, %v10863_v62 }
 0x3b1   : > { %5184 = vmatmul.msk.bf16.vlgmr.msrb.gmra.mxu2 %vm577_vm1, %v9257_v6  ;;  %v3135_v45 = vpack.c.bf16 %v3127_v3, %v3126_v10  ;;  %v3136_v37 = vpack.c.bf16 %v3123_v42, %v3122_v21  ;;  %v6091_v60 = vunpack.i.h.bf16 %v6089_v14  ;;  %v6090_v62 = vunpack.i.l.bf16 %v6089_v14 }
 0x3b2   : > { %5180 = vmatmul.msk.bf16.vlgmr.msrb.gmra.mxu0 %vm577_vm1, %v9257_v6 }
 0x3b3   : > { %5182 = vmatmul.msk.bf16.vlgmr.msrb.gmra.mxu1 %vm577_vm1, %v9257_v6  ;;  %6293 = vrot.lane.b32.xlu1 %v8886_v54, %s6644_s13  ;;  %v2674_v53 = vsel %vm436_vm2, %v6031_v34, %v6091_v60 }
 0x3b4   : > { %3170 = vmatpush.bf16.msra.mxu2 %v3135_v45  ;;  %3189 = vmatpush.bf16.msra.mxu3 %v3136_v37 }
 0x3b5   : > { %6313 = vrot.lane.b32.xlu0 %v8802_v46, %s6645_s10  ;;  %v6084_v2 = vpop.permute.xlu1 %6083 }
 0x3b6   : > { %v6086_v15 = vunpack.i.h.bf16 %v6084_v2  ;;  %v6085_v10 = vunpack.i.l.bf16 %v6084_v2  ;;  %v6104_v42 = vpop.permute.xlu0 %6103 }
 0x3b7   : > { %6273 = vrot.lane.b32.xlu2 %v8878_v13, %s6644_s13 }
 0x3b8   : > { %v2676_v3 = vsel %vm436_vm2, %v6016_v44, %v6086_v15  ;;  %v2671_v45 = vsel %vm436_vm2, %v6085_v10, %v6040_v4  ;;  %v2672_v14 = vsel %vm436_vm2, %v6086_v15, %v6041_v27  ;;  %v2675_v37 = vsel %vm436_vm2, %v6015_v22, %v6085_v10  ;;  %v9319_v21 = vpop.permute.xlu2 %6118  ;;  %v9321_v44 = vld [vmem:[#allocation7 + $0x8] sm:$0xff] }
 0x3b9   : > { %v2707_v2 = vpack.c.bf16 %v2676_v3, %v2675_v37  ;;  %v2708_v18 = vpack.c.bf16 %v2672_v14, %v2671_v45  ;;  %v2673_v4 = vsel %vm436_vm2, %v6030_v39, %v6090_v62  ;;  %v2669_v22 = vsel %vm436_vm2, %v6090_v62, %v10929_v7 }
 0x3ba   : > { %v10930_v27 = vunpack.i.h.bf16 %v9171_v56  ;;  %v2701_v34 = vpack.c.bf16 %v2674_v53, %v2673_v4  ;;  %v6096_v10 = vunpack.i.h.bf16 %v9269_v40  ;;  %v6095_v62 = vunpack.i.l.bf16 %v9269_v40 }
 0x3bb   : > { %6308 = vrot.lane.b32.xlu1 %v8886_v54, %s6645_s10  ;;  %3026 = vmatpush.bf16.msra.mxu0 %v2707_v2  ;;  %v6106_v45 = vunpack.i.h.bf16 %v6104_v42  ;;  %v6105_v14 = vunpack.i.l.bf16 %v6104_v42  ;;  %v10932_v2 = vunpack.i.l.bf16 %v9201_v29  ;;  %v6101_v7 = vunpack.i.h.bf16 %v9273_v63 }
 0x3bc   : > { %v2670_v15 = vsel %vm436_vm2, %v6091_v60, %v10930_v27  ;;  %3045 = vmatpush.bf16.msra.mxu1 %v2708_v18  ;;  %v10931_v18 = vunpack.i.h.bf16 %v9201_v29 }
 0x3bd   : > { %6333 = vrot.lane.b32.xlu0 %v8812_v61, %s6645_s10  ;;  %v6109_v33 = vpop.permute.xlu1 %6108  ;;  %v2702_v39 = vpack.c.bf16 %v2670_v15, %v2669_v22  ;;  %v6100_v22 = vunpack.i.l.bf16 %v9273_v63  ;;  %v3111_v63 = vsel %vm876_vm3, %v6101_v7, %v6106_v45 }
 0x3be   : > { %v6111_v3 = vunpack.i.h.bf16 %v6109_v33  ;;  %v6110_v56 = vunpack.i.l.bf16 %v6109_v33  ;;  %5187 = vmatmul.msk.bf16.gmra.mxu3 %vm577_vm1, %v9321_v44  ;;  %v9347_v60 = vpop.permute.xlu0 %6123  ;;  %v10933_v33 = vunpack.i.l.bf16 %v9237_v51 }
 0x3bf   : > { %6298 = vrot.lane.b32.xlu2 %v8821_v50, %s6644_s13  ;;  %3027 = vmatpush.bf16.msra.mxu0 %v2701_v34  ;;  %v3110_v29 = vsel %vm876_vm3, %v6100_v22, %v6105_v14  ;;  %s4868_s13 = sshll.u32 %s10654_s20, 4  ;;  %s4869_s13 = int_to_ptr.vmem [resolvable:$true] %s4868_s13 }
 0x3c0   : > { %v3109_v37 = vsel %vm876_vm3, %v6111_v3, %v10931_v18  ;;  %v3113_v40 = vsel %vm876_vm3, %v6096_v10, %v6111_v3  ;;  %v3108_v4 = vsel %vm876_vm3, %v6110_v56, %v10932_v2  ;;  %v3112_v42 = vsel %vm876_vm3, %v6095_v62, %v6110_v56  ;;  %3046 = vmatpush.bf16.msra.mxu1 %v2702_v39  ;;  %v9363_v53 = vpop.permute.xlu2 %6133 }
 0x3c1   : > { %v3145_v27 = vpack.c.bf16 %v3113_v40, %v3112_v42  ;;  %v3146_v15 = vpack.c.bf16 %v3109_v37, %v3108_v4  ;;  %5185 = vmatmul.msk.bf16.gmra.mxu2 %vm577_vm1, %v9321_v44  ;;  %v3106_v34 = vsel %vm876_vm3, %v6105_v14, %v10933_v33  ;;  %v10934_v39 = vunpack.i.h.bf16 %v9237_v51 }
 0x3c2   : > { %5181 = vmatmul.msk.bf16.gmra.mxu0 %vm577_vm1, %v9321_v44  ;;  %v6121_v56 = vunpack.i.h.bf16 %v9319_v21  ;;  %v6120_v37 = vunpack.i.l.bf16 %v9319_v21  ;;  %v3139_v42 = vpack.c.bf16 %v3111_v63, %v3110_v29  ;;  %v10935_v14 = vunpack.i.h.bf16 %v9175_v59 }
 0x3c3   : > { %5183 = vmatmul.msk.bf16.gmra.mxu1 %vm577_vm1, %v9321_v44  ;;  %6318 = vrot.lane.b32.xlu1 %v8821_v50, %s6645_s10  ;;  %v3107_v3 = vsel %vm876_vm3, %v6106_v45, %v10934_v39  ;;  %v10937_v39 = vunpack.i.l.bf16 %v9213_v57 }
 0x3c4   : > { %3245 = vmatpush.bf16.msrb.mxu2 %v3145_v27  ;;  %3264 = vmatpush.bf16.msrb.mxu3 %v3146_v15  ;;  %v3140_v51 = vpack.c.bf16 %v3107_v3, %v3106_v34  ;;  %v10936_v15 = vunpack.i.l.bf16 %v9175_v59 }
 0x3c5   : > { %6348 = vrot.lane.b32.xlu0 %v8702_v26, %s6645_s10  ;;  %v6114_v18 = vpop.permute.xlu1 %6113  ;;  %v3118_v3 = vsel %vm876_vm3, %v10937_v39, %v6120_v37 }
 0x3c6   : > { %v6116_v40 = vunpack.i.h.bf16 %v6114_v18  ;;  %v6115_v2 = vunpack.i.l.bf16 %v6114_v18  ;;  %v9391_v4 = vpop.permute.xlu0 %6138  ;;  %v3114_v18 = vsel %vm876_vm3, %v6120_v37, %v6100_v22  ;;  %v6136_v22 = vunpack.i.h.bf16 %v9363_v53 }
 0x3c7   : > { %6323 = vrot.lane.b32.xlu2 %v8933_v47, %s6645_s10  ;;  %v6135_v37 = vunpack.i.l.bf16 %v9363_v53 }
 0x3c8   : > { %v3117_v45 = vsel %vm876_vm3, %v6116_v40, %v6096_v10  ;;  %v3121_v27 = vsel %vm876_vm3, %v10935_v14, %v6116_v40  ;;  %v3116_v21 = vsel %vm876_vm3, %v6115_v2, %v6095_v62  ;;  %v3120_v29 = vsel %vm876_vm3, %v10936_v15, %v6115_v2  ;;  %3246 = vmatpush.bf16.msrb.mxu2 %v3139_v42  ;;  %v9409_v10 = vld [vmem:[#allocation7 + $0x20] sm:$0xff] }
 0x3c9   : > { %v3143_v63 = vpack.c.bf16 %v3121_v27, %v3120_v29  ;;  %v3144_v33 = vpack.c.bf16 %v3117_v45, %v3116_v21  ;;  %3265 = vmatpush.bf16.msrb.mxu3 %v3140_v51  ;;  %v9407_v34 = vpop.permute.xlu2 %6148  ;;  %v10938_v62 = vunpack.i.h.bf16 %v9213_v57  ;;  %v3115_v40 = vsel %vm876_vm3, %v6121_v56, %v6101_v7 }
 0x3ca   : > { %v6126_v2 = vunpack.i.h.bf16 %v9347_v60  ;;  %v6125_v42 = vunpack.i.l.bf16 %v9347_v60  ;;  %v3138_v45 = vpack.c.bf16 %v3115_v40, %v3114_v18  ;;  %v6141_v27 = vunpack.i.h.bf16 %v9391_v4 }
 0x3cb   : > { %v3119_v59 = vsel %vm876_vm3, %v10938_v62, %v6121_v56  ;;  %6338 = vrot.lane.b32.xlu1 %v8786_v19, %s6645_s10  ;;  %3207 = vmatpush.bf16.msrb.mxu0 %v3143_v63  ;;  %v6140_v18 = vunpack.i.l.bf16 %v9391_v4 }
 0x3cc   : > { %3226 = vmatpush.bf16.msrb.mxu1 %v3144_v33  ;;  %v3137_v51 = vpack.c.bf16 %v3119_v59, %v3118_v3 }
 0x3cd   : > { %6363 = vrot.lane.b32.xlu0 %v8870_v55, %s6646_s21  ;;  %v6129_v57 = vpop.permute.xlu1 %6128 }
 0x3ce   : > { %v6131_v7 = vunpack.i.h.bf16 %v6129_v57  ;;  %v6130_v56 = vunpack.i.l.bf16 %v6129_v57  ;;  %5202 = vmatmul.msk.bf16.vlgmr.msra.gmra.mxu3 %vm577_vm1, %v9409_v10  ;;  %v6154_v14 = vpop.permute.xlu0 %6153 }
 0x3cf   : > { %v6156_v21 = vunpack.i.h.bf16 %v6154_v14  ;;  %v6155_v60 = vunpack.i.l.bf16 %v6154_v14  ;;  %6328 = vrot.lane.b32.xlu2 %v8878_v13, %s6645_s10  ;;  %3208 = vmatpush.bf16.msrb.mxu0 %v3137_v51 }
 0x3d0   : > { %v3360_v55 = vsel %vm1120_vm4, %v6131_v7, %v6136_v22  ;;  %v3364_v15 = vsel %vm1120_vm4, %v6126_v2, %v6131_v7  ;;  %v3359_v29 = vsel %vm1120_vm4, %v6130_v56, %v6135_v37  ;;  %v3363_v63 = vsel %vm1120_vm4, %v6125_v42, %v6130_v56  ;;  %3227 = vmatpush.bf16.msrb.mxu1 %v3138_v45 }
 0x3d1   : > { %v3386_v33 = vpack.c.bf16 %v3364_v15, %v3363_v63  ;;  %v3387_v39 = vpack.c.bf16 %v3360_v55, %v3359_v29  ;;  %v3367_v3 = vsel %vm1120_vm4, %v6155_v60, %v6125_v42  ;;  %v3368_v62 = vsel %vm1120_vm4, %v6156_v21, %v6126_v2  ;;  %v6164_v59 = vpop.permute.xlu2 %6163  ;;  %5200 = vmatmul.msk.bf16.vlgmr.msra.gmra.mxu2 %vm577_vm1, %v9409_v10 }
 0x3d2   : > { %v3385_v40 = vpack.c.bf16 %v3368_v62, %v3367_v3  ;;  %v6166_v57 = vunpack.i.h.bf16 %v6164_v59  ;;  %v6165_v51 = vunpack.i.l.bf16 %v6164_v59  ;;  %5188 = vmatmul.msk.bf16.vlgmr.msra.gmra.mxu0 %vm577_vm1, %v9257_v6  ;;  %v6151_v45 = vunpack.i.h.bf16 %v9407_v34 }
 0x3d3   : > { %5190 = vmatmul.msk.bf16.vlgmr.msra.gmra.mxu1 %vm577_vm1, %v9257_v6  ;;  %6353 = vrot.lane.b32.xlu1 %v8812_v61, %s6646_s21  ;;  %v6150_v6 = vunpack.i.l.bf16 %v9407_v34 }
 0x3d4   : > { %3450 = vmatpush.bf16.msra.mxu2 %v3386_v33  ;;  %3469 = vmatpush.bf16.msra.mxu3 %v3387_v39  ;;  %v3365_v2 = vsel %vm1120_vm4, %v6165_v51, %v6140_v18  ;;  %v3366_v4 = vsel %vm1120_vm4, %v6166_v57, %v6141_v27  ;;  %v9483_v33 = vld [vmem:[#allocation7 + $0x28] sm:$0xff] }
 0x3d5   : > { %6378 = vrot.lane.b32.xlu0 %v8802_v46, %s6646_s21  ;;  %v6144_v42 = vpop.permute.xlu1 %6143  ;;  %3431 = vmatpush.bf16.msra.mxu1 %v3385_v40  ;;  %v3379_v61 = vpack.c.bf16 %v3366_v4, %v3365_v2 }
 0x3d6   : > { %v6146_v7 = vunpack.i.h.bf16 %v6144_v42  ;;  %v6145_v56 = vunpack.i.l.bf16 %v6144_v42  ;;  %v4687_v42 = vld [vmem:[%s10835_s5] sm:$0xff] }
 0x3d7   : > { %6343 = vrot.lane.b32.xlu2 %v8728_v1, %s6645_s10 }
 0x3d8   : > { %v3361_v14 = vsel %vm1120_vm4, %v6140_v18, %v6145_v56  ;;  %v3362_v55 = vsel %vm1120_vm4, %v6141_v27, %v6146_v7  ;;  %v3357_v46 = vsel %vm1120_vm4, %v6145_v56, %v6150_v6  ;;  %v3358_v15 = vsel %vm1120_vm4, %v6146_v7, %v6151_v45  ;;  %v6169_v27 = vpop.permute.xlu0 %6168 }
 0x3d9   : > { %3432 = vmatpush.bf16.msra.mxu1 %v3379_v61  ;;  %v3380_v29 = vpack.c.bf16 %v3362_v55, %v3361_v14  ;;  %v3381_v63 = vpack.c.bf16 %v3358_v15, %v3357_v46  ;;  %v6171_v59 = vunpack.i.h.bf16 %v6169_v27  ;;  %v6170_v18 = vunpack.i.l.bf16 %v6169_v27  ;;  %v9610_v27 = vld [vmem:[#allocation7 + $0x30] sm:$0xff] }
 0x3da   : > { %v10939_v14 = vpack.c.bf16 %v8771_v48, %v8763_v28  ;;  %v10940_v55 = vpack.c.bf16 %v8796_v24, %v8776_v41  ;;  %v4690_v28 = vld [vmem:[%s10835_s5 + $0x18] sm:$0xff]  ;;  %v10941_v46 = vpack.c.bf16 %v8687_v30, %v8684_v17  ;;  %v4688_v17 = vld [vmem:[%s10835_s5 + $0x8] sm:$0xff]  ;;  %v4737_v30 = vld [vmem:[%s10836_s6 + $0x10] sm:$0xff] }
 0x3db   : > { %6368 = vrot.lane.b32.xlu1 %v8728_v1, %s6646_s21  ;;  %3451 = vmatpush.bf16.msra.mxu2 %v3380_v29 }
 0x3dc   : > { %3470 = vmatpush.bf16.msra.mxu3 %v3381_v63  ;;  %v4738_v63 = vld [vmem:[%s10836_s6 + $0x18] sm:$0xff] }
 0x3dd   : > { %6398 = vrot.lane.b32.xlu0 %v8933_v47, %s6646_s21  ;;  %v6159_v39 = vpop.permute.xlu1 %6158  ;;  %v3370_v47 = vsel %vm1120_vm4, %v6171_v59, %v6166_v57 }
 0x3de   : > { %v6161_v3 = vunpack.i.h.bf16 %v6159_v39  ;;  %v6160_v62 = vunpack.i.l.bf16 %v6159_v39  ;;  %5203 = vmatmul.msk.bf16.gmra.mxu3 %vm577_vm1, %v9483_v33 }
 0x3df   : > { %6358 = vrot.lane.b32.xlu2 %v8786_v19, %s6646_s21  ;;  %v3369_v19 = vsel %vm1120_vm4, %v6170_v18, %v6165_v51  ;;  %v6179_v51 = vpop.permute.xlu2 %6178 }
 0x3e0   : > { %v3372_v1 = vsel %vm1120_vm4, %v6161_v3, %v6156_v21  ;;  %v3371_v40 = vsel %vm1120_vm4, %v6160_v62, %v6155_v60  ;;  %v3378_v21 = vpack.c.bf16 %v3370_v47, %v3369_v19  ;;  %v6181_v57 = vunpack.i.h.bf16 %v6179_v51  ;;  %v9612_v39 = vpop.permute.xlu0 %6183 }
 0x3e1   : > { %v3384_v2 = vpack.c.bf16 %v3372_v1, %v3371_v40  ;;  %5201 = vmatmul.msk.bf16.gmra.mxu2 %vm577_vm1, %v9483_v33  ;;  %v6180_v7 = vunpack.i.l.bf16 %v6179_v51  ;;  %v10944_v40 = vpack.c.bf16 %v8919_v58, %v8894_v16  ;;  %v10947_v19 = vpack.c.bf16 %v8847_v23, %v8815_v25 }
 0x3e2   : > { %5189 = vmatmul.msk.bf16.gmra.mxu0 %vm577_vm1, %v9321_v44  ;;  %v3350_v24 = vsel %vm1120_vm4, %v6181_v57, %v6171_v59  ;;  %v10948_v58 = vpack.c.bf16 %v8865_v8, %v8836_v5 }
 0x3e3   : > { %5191 = vmatmul.msk.bf16.gmra.mxu1 %vm577_vm1, %v9321_v44  ;;  %6383 = vrot.lane.b32.xlu1 %v8910_v11, %s6645_s10  ;;  %v3353_v48 = vsel %vm1120_vm4, %v6150_v6, %v6180_v7  ;;  %v3349_v41 = vsel %vm1120_vm4, %v6180_v7, %v6170_v18 }
 0x3e4   : > { %3412 = vmatpush.bf16.msra.mxu0 %v3384_v2 }
 0x3e5   : > { %6403 = vrot.lane.b32.xlu0 %v8858_v52, %s6646_s21  ;;  %v6174_v60 = vpop.permute.xlu1 %6173 }
 0x3e6   : > { %v6176_v44 = vunpack.i.h.bf16 %v6174_v60  ;;  %v6175_v4 = vunpack.i.l.bf16 %v6174_v60 }
 0x3e7   : > { %6373 = vrot.lane.b32.xlu2 %v8702_v26, %s6646_s21 }
 0x3e8   : > { %3413 = vmatpush.bf16.msra.mxu0 %v3378_v21  ;;  %v3356_v56 = vsel %vm1120_vm4, %v6136_v22, %v6176_v44  ;;  %v3355_v26 = vsel %vm1120_vm4, %v6135_v37, %v6175_v4  ;;  %v3351_v61 = vsel %vm1120_vm4, %v6175_v4, %v6160_v62  ;;  %v10943_v62 = vpack.c.bf16 %v8899_v20, %v8881_v9  ;;  %v9650_v16 = vpop.permute.xlu0 %6193  ;;  %v9655_v21 = vpop.permute.xlu2 %6203 }
 0x3e9   : > { %v3388_v53 = vpack.c.bf16 %v3356_v56, %v3355_v26  ;;  %v10945_v9 = vpack.c.bf16 %v8861_v0, %v8829_v12  ;;  %v10946_v20 = vpack.c.bf16 %v8873_v43, %v8841_v49  ;;  %v10949_v12 = vpack.c.bf16 %v8789_v32, %v8768_v38  ;;  %v10950_v0 = vld [vmem:[#allocation15_spill] sm:$0xff]  ;;  %v10951_v43 = vld [vmem:[#allocation20_spill] sm:$0xff] }
 0x3ea   : > { %v10952_v25 = vpack.c.bf16 %v10950_v0, %v10951_v43  ;;  %v6206_v26 = vunpack.i.h.bf16 %v9655_v21 }
 0x3eb   : > { %6408 = vrot.lane.b32.xlu1 %v8910_v11, %s6646_s21  ;;  %v3352_v11 = vsel %vm1120_vm4, %v6176_v44, %v6161_v3  ;;  %v9669_v44 = vld [vmem:[#allocation7 + $0x38] sm:$0xff] }
 0x3ec   : > { %v3389_v37 = vpack.c.bf16 %v3352_v11, %v3351_v61  ;;  %v6205_v61 = vunpack.i.l.bf16 %v9655_v21 }
 0x3ed   : > { %4693 = vperm.xlu0 %5939, %v4687_v42   ;;  %v6189_v2 = vpop.permute.xlu1 %6188 }
 0x3ee   : > { %5210 = vmatmul.msk.bf16.vlgmr.msrb.gmra.mxu3 %vm577_vm1, %v9409_v10  ;;  %v6191_v7 = vunpack.i.h.bf16 %v6189_v2  ;;  %v6190_v56 = vunpack.i.l.bf16 %v6189_v2 }
 0x3ef   : > { %3602 = vmatpush.bf16.msrb.mxu3 %v10939_v14  ;;  %6388 = vrot.lane.b32.xlu2 %v8858_v52, %s6645_s10  ;;  %v3354_v52 = vsel %vm1120_vm4, %v6151_v45, %v6181_v57  ;;  %v10942_v45 = vpack.c.bf16 %v8709_v31, %v8706_v36  ;;  %v4735_v31 = vld [vmem:[%s10836_s6] sm:$0xff]  ;;  %s4870_s10 = sshll.u32 %s4867_s25, 4  ;;  %s4871_s10 = int_to_ptr.hbm [resolvable:$true] %s4870_s10 }
 0x3f0   : > { %v3382_v34 = vpack.c.bf16 %v3354_v52, %v3353_v48  ;;  %v9677_v32 = vpop.permute.xlu0 %6213  ;;  %v9681_v42 = vpop.permute.xlu2 %6208  ;;  %s6574_s19 = sshra.s32 %s4871_s10, 4  ;;  %s6575_s19 = int_to_ptr.hbm [resolvable:$true] %s6574_s19 }
 0x3f1   : > { %v9537_v22 = vpop.f32.mrf.mxu3  ;;  %5208 = vmatmul.msk.bf16.vlgmr.msrb.gmra.mxu2 %vm577_vm1, %v9409_v10  ;;  %s6576_s17 = scalar_lea.hbm %s6575_s19, 192  ;;  %p6581_p7 = scmp.lt.s32.totalorder %s6575_s19, %s10838_s8 }
 0x3f2   : > { %5204 = vmatmul.msk.bf16.vlgmr.msrb.gmra.mxu0 %vm577_vm1, %v9409_v10  ;;  %3583 = vmatpush.bf16.msrb.mxu2 %v10940_v55  ;;  %v3770_v55 = vsel %vm1535_vm5, %v6191_v7, %v6206_v26  ;;  %p6577_p1 = scmp.ne.s32.totalorder %s6575_s19, %s6576_s17 }
 0x3f3   : > { %5206 = vmatmul.msk.bf16.vlgmr.msrb.gmra.mxu1 %vm577_vm1, %v9409_v10  ;;  %3488 = vmatpush.bf16.msrb.mxu0 %v3388_v53  ;;  %v3383_v10 = vpack.c.bf16 %v3350_v24, %v3349_v41 }
 0x3f4   : > { %3507 = vmatpush.bf16.msrb.mxu1 %v3389_v37  ;;  %3603 = vmatpush.bf16.msrb.mxu3 %v10941_v46  ;;  %v9566_v6 = vpop.f32.mrf.mxu2  ;;  %v6186_v37 = vunpack.i.h.bf16 %v9612_v39  ;;  %p6578_p4 = pnand %p6577_p1, %p6761_p0 }
 0x3f5   : > { %6413 = vrot.lane.b32.xlu1 %v8886_v54, %s6646_s21  ;;  %4708 = vperm.xlu0 %5939, %v4690_v28   ;;  %v6199_v8 = vpop.permute.xlu1 %6198  ;;  %v3769_v28 = vsel %vm1535_vm5, %v6190_v56, %v6205_v61 }
 0x3f6   : > { %3584 = vmatpush.bf16.msrb.mxu2 %v10942_v45  ;;  %v6201_v52 = vunpack.i.h.bf16 %v6199_v8  ;;  %v6200_v41 = vunpack.i.l.bf16 %v6199_v8  ;;  %v6185_v45 = vunpack.i.l.bf16 %v9612_v39  ;;  %p6579_p8 = pneg %p6578_p4 }
 0x3f7   : > { %3489 = vmatpush.bf16.msrb.mxu0 %v3382_v34  ;;  %6393 = vrot.lane.b32.xlu2 %v8878_v13, %s6646_s21 }
 0x3f8   : > { %3508 = vmatpush.bf16.msrb.mxu1 %v3383_v10  ;;  %v6229_v24 = vpop.permute.xlu0 %6228  ;;  %v9710_v10 = vld [vmem:[#allocation7 + $0x40] sm:$0xff]  ;;  %v3773_v39 = vsel %vm1535_vm5, %v6185_v45, %v6190_v56 }
 0x3f9   : > { %v9575_v15 = vpop.f32.mrf.mxu3 }
 0x3fc   : > { %v9583_v54 = vpop.f32.mrf.mxu2 }
 0x3fd   : > { %4698 = vperm.xlu1 %5940, %v4688_v17   ;;  %4751 = vperm.xlu0 %5939, %v4737_v30   ;;  %v6219_v11 = vpop.permute.xlu1 %6218  ;;  %v6196_v17 = vunpack.i.h.bf16 %v9650_v16  ;;  %v6195_v30 = vunpack.i.l.bf16 %v9650_v16 }
 0x3fe   : > { %5211 = vmatmul.msk.bf16.gmra.mxu3 %vm577_vm1, %v9483_v33  ;;  %v6221_v46 = vunpack.i.h.bf16 %v6219_v11  ;;  %v6220_v34 = vunpack.i.l.bf16 %v6219_v11 }
 0x3ff   : > { %6418 = vrot.lane.b32.xlu2 %v8821_v50, %s6646_s21  ;;  %v4689_v50 = vld [vmem:[%s10835_s5 + $0x10] sm:$0xff]  ;;  %s6580_s21 = scalar_lea.hbm %s10838_s8, 768 }
 0x400   : > { %v3778_v8 = vsel %vm1535_vm5, %v6221_v46, %v6186_v37  ;;  %p6582_p2 = scmp.lt.s32.totalorder %s6580_s21, %s6576_s17 }
 0x401   : > { %v9589_v36 = vpop.f32.mrf.mxu3  ;;  %5209 = vmatmul.msk.bf16.gmra.mxu2 %vm577_vm1, %v9483_v33 }
 0x402   : > { %5205 = vmatmul.msk.bf16.gmra.mxu0 %vm577_vm1, %v9483_v33  ;;  %p6583_p9 = por %p6582_p2, %p6581_p7 }
 0x403   : > { %5207 = vmatmul.msk.bf16.gmra.mxu1 %vm577_vm1, %v9483_v33  ;;  %v4736_v33 = vld [vmem:[%s10836_s6 + $0x8] sm:$0xff] }
 0x404   : > { %v9600_v13 = vpop.f32.mrf.mxu2  ;;  %p6584_p10 = pnand %p6583_p9, %p6579_p8 }
 0x405   : > { %4741 = vperm.xlu1 %5940, %v4735_v31   ;;  %v10866_v31 = vunpack.i.h.bf16 %v9681_v42 }
 0x407   : > { %4703 = vperm.xlu2 %5941, %v4689_v50   ;;  %v9716_v50 = vpop.permute.xlu2 %6223  ;;  %v3768_v0 = vsel %vm1535_vm5, %v6201_v52, %v10866_v31 }
 0x408   : > { %v6226_v43 = vunpack.i.h.bf16 %v9716_v50 }
 0x409   : > { %v9605_v29 = vpop.f32.mrf.mxu3 }
 0x40c   : > { %v9614_v3 = vpop.f32.mrf.mxu2 }
 0x40d   : > { %4756 = vperm.xlu1 %5940, %v4738_v63   ;;  %v10867_v63 = vunpack.i.l.bf16 %v9681_v42 }
 0x40e   : > { %5226 = vmatmul.msk.bf16.vlgmr.msra.gmra.mxu3 %vm577_vm1, %v9610_v27 }
 0x40f   : > { %3678 = vmatpush.bf16.msra.mxu3 %v10943_v62  ;;  %4746 = vperm.xlu2 %5941, %v4736_v33   ;;  %v9624_v59 = vpop.f32.mrf.mxu0  ;;  %v3774_v33 = vsel %vm1535_vm5, %v6186_v37, %v6191_v7  ;;  %v6216_v62 = vunpack.i.h.bf16 %v9677_v32  ;;  %v3777_v7 = vsel %vm1535_vm5, %v6220_v34, %v6185_v45  ;;  %v9773_v45 = vpop.permute.xlu1 %6233 }
 0x410   : > { %v9626_v18 = vpop.f32.mrf.mxu1  ;;  %v3800_v11 = vpack.c.bf16 %v3774_v33, %v3773_v39 }
 0x411   : > { %v9628_v1 = vpop.f32.mrf.mxu3  ;;  %5224 = vmatmul.msk.bf16.vlgmr.msra.gmra.mxu2 %vm577_vm1, %v9610_v27  ;;  %v3782_v16 = vsel %vm1535_vm5, %v6216_v62, %v6221_v46 }
 0x412   : > { %5220 = vmatmul.msk.bf16.vlgmr.msra.gmra.mxu0 %vm577_vm1, %v9610_v27  ;;  %3659 = vmatpush.bf16.msra.mxu2 %v10944_v40  ;;  %v10868_v40 = vunpack.i.l.bf16 %v9677_v32 }
 0x413   : > { %5222 = vmatmul.msk.bf16.vlgmr.msra.gmra.mxu1 %vm577_vm1, %v9610_v27  ;;  %3621 = vmatpush.bf16.msra.mxu0 %v10945_v9  ;;  %v3801_v9 = vpack.c.bf16 %v3770_v55, %v3769_v28  ;;  %v3771_v28 = vsel %vm1535_vm5, %v6195_v30, %v6200_v41 }
 0x414   : > { %3640 = vmatpush.bf16.msra.mxu1 %v10946_v20  ;;  %3679 = vmatpush.bf16.msra.mxu3 %v10947_v19  ;;  %v9648_v47 = vpop.f32.mrf.mxu2  ;;  %v6231_v20 = vunpack.i.h.bf16 %v6229_v24  ;;  %v6230_v19 = vunpack.i.l.bf16 %v6229_v24  ;;  %v3772_v24 = vsel %vm1535_vm5, %v6196_v17, %v6201_v52 }
 0x416   : > { %3660 = vmatpush.bf16.msra.mxu2 %v10948_v58  ;;  %v3781_v58 = vsel %vm1535_vm5, %v10868_v40, %v6220_v34  ;;  %v3780_v46 = vsel %vm1535_vm5, %v6226_v43, %v6231_v20 }
 0x417   : > { %3622 = vmatpush.bf16.msra.mxu0 %v10949_v12  ;;  %v9660_v49 = vpop.f32.mrf.mxu0  ;;  %v3767_v12 = vsel %vm1535_vm5, %v6200_v41, %v10867_v63  ;;  %v3798_v31 = vpack.c.bf16 %v3782_v16, %v3781_v58  ;;  %v3799_v41 = vpack.c.bf16 %v3778_v8, %v3777_v7  ;;  %v6239_v16 = vpop.permute.xlu2 %6238 }
 0x418   : > { %3641 = vmatpush.bf16.msra.mxu1 %v10952_v25  ;;  %v9665_v23 = vpop.f32.mrf.mxu1  ;;  %v6225_v25 = vunpack.i.l.bf16 %v9716_v50  ;;  %v3795_v40 = vpack.c.bf16 %v3768_v0, %v3767_v12  ;;  %v9800_v0 = vpop.permute.xlu1 %6248 }
 0x419   : > { %v9667_v60 = vpop.f32.mrf.mxu3 }
 0x41a   : > { %v3779_v37 = vsel %vm1535_vm5, %v6225_v25, %v6230_v19 }
 0x41c   : > { %v9671_v5 = vpop.f32.mrf.mxu2 }
 0x41e   : > { %5227 = vmatmul.msk.bf16.gmra.mxu3 %vm577_vm1, %v9669_v44 }
 0x41f   : > { %v9675_v38 = vpop.f32.mrf.mxu0 }
 0x420   : > { %v9679_v4 = vpop.f32.mrf.mxu1 }
 0x421   : > { %v9683_v51 = vpop.f32.mrf.mxu3  ;;  %5225 = vmatmul.msk.bf16.gmra.mxu2 %vm577_vm1, %v9669_v44 }
 0x422   : > { %5221 = vmatmul.msk.bf16.gmra.mxu0 %vm577_vm1, %v9669_v44 }
 0x423   : > { %5223 = vmatmul.msk.bf16.gmra.mxu1 %vm577_vm1, %v9669_v44 }
 0x424   : > { %v9691_v57 = vpop.f32.mrf.mxu2 }
 0x427   : > { %v9695_v14 = vpop.f32.mrf.mxu0 }
 0x428   : > { %v9697_v53 = vpop.f32.mrf.mxu1 }
 0x429   : > { %v9708_v48 = vpop.f32.mrf.mxu3 }
 0x42c   : > { %v9723_v2 = vpop.f32.mrf.mxu2 }
 0x42e   : > { %5242 = vmatmul.msk.bf16.vlgmr.msrb.gmra.mxu3 %vm577_vm1, %v9710_v10 }
 0x42f   : > { %3883 = vmatpush.bf16.msrb.mxu3 %v3801_v9  ;;  %v2953_v56 = vpop.f32.mrf.mxu0  ;;  %v3794_v9 = vpack.c.bf16 %v3772_v24, %v3771_v28 }
 0x430   : > { %v2972_v55 = vpop.f32.mrf.mxu1  ;;  %v9766_v34 = vadd.f32 %v2953_v56, %v9566_v6  ;;  %v3775_v6 = vsel %vm1535_vm5, %v6230_v19, %v6195_v30  ;;  %v9796_v19 = vld [vmem:[#allocation7 + $0x48] sm:$0xff] }
 0x431   : > { %v3010_v63 = vpop.f32.mrf.mxu3  ;;  %5240 = vmatmul.msk.bf16.vlgmr.msrb.gmra.mxu2 %vm577_vm1, %v9710_v10  ;;  %v9769_v52 = vadd.f32 %v2972_v55, %v9537_v22  ;;  %v3776_v22 = vsel %vm1535_vm5, %v6231_v20, %v6196_v17 }
 0x432   : > { %5228 = vmatmul.msk.bf16.vlgmr.msrb.gmra.mxu0 %vm577_vm1, %v9610_v27  ;;  %3864 = vmatpush.bf16.msrb.mxu2 %v3800_v11  ;;  %v9776_v33 = vadd.f32 %v3010_v63, %v9626_v18  ;;  %v3792_v18 = vpack.c.bf16 %v3780_v46, %v3779_v37  ;;  %v3793_v63 = vpack.c.bf16 %v3776_v22, %v3775_v6  ;;  %v6240_v37 = vunpack.i.l.bf16 %v6239_v16 }
 0x433   : > { %5230 = vmatmul.msk.bf16.vlgmr.msrb.gmra.mxu1 %vm577_vm1, %v9610_v27  ;;  %3826 = vmatpush.bf16.msrb.mxu0 %v3798_v31  ;;  %v6241_v46 = vunpack.i.h.bf16 %v6239_v16  ;;  %v10873_v22 = vunpack.i.h.bf16 %v9773_v45 }
 0x434   : > { %3845 = vmatpush.bf16.msrb.mxu1 %v3799_v41  ;;  %3884 = vmatpush.bf16.msrb.mxu3 %v3795_v40  ;;  %v2991_v39 = vpop.f32.mrf.mxu2 }
 0x435   : > { %v9785_v58 = vadd.f32 %v2991_v39, %v9624_v59  ;;  %v9798_v59 = vpop.permute.xlu0 %6243  ;;  %v6235_v39 = vunpack.i.l.bf16 %v9773_v45 }
 0x436   : > { %3865 = vmatpush.bf16.msrb.mxu2 %v3794_v9  ;;  %v10872_v28 = vunpack.i.h.bf16 %v9798_v59 }
 0x437   : > { %3827 = vmatpush.bf16.msrb.mxu0 %v3792_v18  ;;  %v2955_v27 = vpop.f32.mrf.mxu0 }
 0x438   : > { %3846 = vmatpush.bf16.msrb.mxu1 %v3793_v63  ;;  %v9788_v31 = vadd.f32 %v2955_v27, %v9583_v54  ;;  %v2974_v30 = vpop.f32.mrf.mxu1  ;;  %v9807_v54 = vpop.permute.xlu2 %6253 }
 0x439   : > { %v9791_v17 = vadd.f32 %v2974_v30, %v9575_v15  ;;  %v3012_v40 = vpop.f32.mrf.mxu3 }
 0x43a   : > { %v9794_v20 = vadd.f32 %v3012_v40, %v9665_v23  ;;  %v6255_v40 = vunpack.i.l.bf16 %v9807_v54 }
 0x43c   : > { %v2993_v12 = vpop.f32.mrf.mxu2 }
 0x43d   : > { %v9803_v8 = vadd.f32 %v2993_v12, %v9660_v49  ;;  %v10871_v49 = vunpack.i.l.bf16 %v9798_v59 }
 0x43e   : > { %5243 = vmatmul.msk.bf16.gmra.mxu3 %vm577_vm1, %v9796_v19 }
 0x43f   : > { %v2958_v15 = vpop.f32.mrf.mxu0  ;;  %v4020_v41 = vsel %vm1779_vm6, %v6240_v37, %v10871_v49  ;;  %v10954_v49 = vunpack.i.l.bf16 %v9681_v42 }
 0x440   : > { %v2977_v7 = vpop.f32.mrf.mxu1  ;;  %v9812_v23 = vadd.f32 %v2958_v15, %v9600_v13  ;;  %v9826_v13 = vpop.permute.xlu0 %6258 }
 0x441   : > { %v3015_v56 = vpop.f32.mrf.mxu3  ;;  %5241 = vmatmul.msk.bf16.gmra.mxu2 %vm577_vm1, %v9796_v19  ;;  %v9815_v11 = vadd.f32 %v2977_v7, %v9589_v36  ;;  %v10869_v16 = vunpack.i.h.bf16 %v9826_v13  ;;  %v6269_v18 = vpop.permute.xlu2 %6268 }
 0x442   : > { %5229 = vmatmul.msk.bf16.gmra.mxu0 %vm577_vm1, %v9669_v44  ;;  %v9821_v55 = vadd.f32 %v3015_v56, %v9679_v4  ;;  %v6264_v4 = vpop.permute.xlu1 %6263 }
 0x443   : > { %5231 = vmatmul.msk.bf16.gmra.mxu1 %vm577_vm1, %v9669_v44  ;;  %v4021_v44 = vsel %vm1779_vm6, %v6241_v46, %v10872_v28  ;;  %v6266_v12 = vunpack.i.h.bf16 %v6264_v4  ;;  %v6265_v15 = vunpack.i.l.bf16 %v6264_v4 }
 0x444   : > { %v2996_v24 = vpop.f32.mrf.mxu2  ;;  %v4042_v56 = vpack.c.bf16 %v4021_v44, %v4020_v41  ;;  %v6251_v41 = vunpack.i.h.bf16 %v9800_v0 }
 0x445   : > { %v9829_v36 = vadd.f32 %v2996_v24, %v9675_v38  ;;  %v10870_v38 = vunpack.i.l.bf16 %v9826_v13  ;;  %v6256_v24 = vunpack.i.h.bf16 %v9807_v54  ;;  %v6250_v54 = vunpack.i.l.bf16 %v9800_v0 }
 0x446   : > { %v3766_v44 = vsel %vm1535_vm5, %v6206_v26, %v6266_v12 }
 0x447   : > { %v2960_v6 = vpop.f32.mrf.mxu0 }
 0x448   : > { %v2979_v9 = vpop.f32.mrf.mxu1  ;;  %v9844_v63 = vadd.f32 %v2960_v6, %v9614_v3  ;;  %v4025_v3 = vsel %vm1779_vm6, %v10873_v22, %v6241_v46  ;;  %v6270_v6 = vunpack.i.l.bf16 %v6269_v18  ;;  %v4019_v46 = vsel %vm1779_vm6, %v6256_v24, %v10869_v16 }
 0x449   : > { %v9847_v27 = vadd.f32 %v2979_v9, %v9605_v29  ;;  %v3017_v30 = vpop.f32.mrf.mxu3  ;;  %v4024_v29 = vsel %vm1779_vm6, %v6235_v39, %v6240_v37  ;;  %v6271_v37 = vunpack.i.h.bf16 %v6269_v18  ;;  %v10953_v18 = vunpack.i.l.bf16 %v9677_v32 }
 0x44a   : > { %v9851_v7 = vadd.f32 %v3017_v30, %v9697_v53  ;;  %v4018_v53 = vsel %vm1779_vm6, %v6255_v40, %v10870_v38  ;;  %v3765_v30 = vsel %vm1535_vm5, %v6205_v61, %v6265_v15  ;;  %v4041_v16 = vpack.c.bf16 %v4025_v3, %v4024_v29 }
 0x44b   : > { %v4036_v38 = vpack.c.bf16 %v4019_v46, %v4018_v53  ;;  %v3763_v28 = vsel %vm1535_vm5, %v10954_v49, %v6270_v6  ;;  %v3802_v22 = vpack.c.bf16 %v3766_v44, %v3765_v30  ;;  %v9951_v46 = vpop.permute.xlu2 %6273 }
 0x44c   : > { %v2998_v9 = vpop.f32.mrf.mxu2 }
 0x44d   : > { %v9869_v4 = vadd.f32 %v2998_v9, %v9695_v14  ;;  %v3786_v14 = vsel %vm1535_vm5, %v6266_v12, %v6216_v62  ;;  %v3785_v9 = vsel %vm1535_vm5, %v6265_v15, %v10953_v18  ;;  %v4023_v12 = vsel %vm1779_vm6, %v6251_v41, %v6256_v24 }
 0x44e   : > { %5250 = vmatmul.msk.bf16.vlgmr.msra.gmra.mxu3 %vm577_vm1, %v9710_v10  ;;  %v3803_v15 = vpack.c.bf16 %v3786_v14, %v3785_v9 }
 0x44f   : > { %4088 = vmatpush.bf16.msra.mxu3 %v4042_v56  ;;  %v3029_v26 = vpop.f32.mrf.mxu0 }
 0x450   : > { %v9894_v21 = vadd.f32 %v3029_v26, %v9648_v47  ;;  %v3048_v61 = vpop.f32.mrf.mxu1  ;;  %v4022_v47 = vsel %vm1779_vm6, %v6250_v54, %v6255_v40  ;;  %v3783_v40 = vsel %vm1535_vm5, %v6270_v6, %v6225_v25 }
 0x451   : > { %v9901_v62 = vadd.f32 %v3048_v61, %v9628_v1  ;;  %v3191_v32 = vpop.f32.mrf.mxu3  ;;  %5248 = vmatmul.msk.bf16.vlgmr.msra.gmra.mxu2 %vm577_vm1, %v9710_v10  ;;  %v10955_v1 = vunpack.i.h.bf16 %v9681_v42 }
 0x452   : > { %v9914_v49 = vadd.f32 %v3191_v32, %v9769_v52  ;;  %5244 = vmatmul.msk.bf16.vlgmr.msra.gmra.mxu0 %vm577_vm1, %v9710_v10  ;;  %4069 = vmatpush.bf16.msra.mxu2 %v4041_v16  ;;  %v3784_v52 = vsel %vm1535_vm5, %v6271_v37, %v6226_v43  ;;  %v4035_v16 = vpack.c.bf16 %v4023_v12, %v4022_v47 }
 0x453   : > { %v3764_v56 = vsel %vm1535_vm5, %v10955_v1, %v6271_v37  ;;  %5246 = vmatmul.msk.bf16.vlgmr.msra.gmra.mxu1 %vm577_vm1, %v9710_v10  ;;  %3902 = vmatpush.bf16.msra.mxu0 %v3802_v22  ;;  %v3797_v10 = vpack.c.bf16 %v3784_v52, %v3783_v40  ;;  %v9935_v22 = vpop.permute.xlu0 %6278  ;;  %v6299_v12 = vpop.permute.xlu2 %6298 }
 0x454   : > { %3921 = vmatpush.bf16.msra.mxu1 %v3803_v15  ;;  %4089 = vmatpush.bf16.msra.mxu3 %v4036_v38  ;;  %v3172_v42 = vpop.f32.mrf.mxu2  ;;  %v3796_v3 = vpack.c.bf16 %v3764_v56, %v3763_v28  ;;  %v6289_v28 = vpop.permute.xlu1 %6288 }
 0x455   : > { %v9933_v24 = vadd.f32 %v3172_v42, %v9766_v34  ;;  %v6291_v18 = vunpack.i.h.bf16 %v6289_v28  ;;  %v9985_v42 = vld [vmem:[#allocation7 + $0x50] sm:$0xff] }
 0x456   : > { %4070 = vmatpush.bf16.msra.mxu2 %v4035_v16 }
 0x457   : > { %3903 = vmatpush.bf16.msra.mxu0 %v3796_v3  ;;  %v3031_v29 = vpop.f32.mrf.mxu0 }
 0x458   : > { %3922 = vmatpush.bf16.msra.mxu1 %v3797_v10  ;;  %v3050_v25 = vpop.f32.mrf.mxu1  ;;  %v9938_v6 = vadd.f32 %v3031_v29, %v9671_v5  ;;  %v6300_v10 = vunpack.i.l.bf16 %v6299_v12 }
 0x459   : > { %v3193_v50 = vpop.f32.mrf.mxu3  ;;  %v9941_v43 = vadd.f32 %v3050_v25, %v9667_v60 }
 0x45a   : > { %v9944_v38 = vadd.f32 %v3193_v50, %v9791_v17 }
 0x45b   : > { %v6284_v5 = vpop.permute.xlu0 %6283 }
 0x45c   : > { %v3174_v34 = vpop.f32.mrf.mxu2  ;;  %v6294_v9 = vpop.permute.xlu1 %6293  ;;  %v6286_v26 = vunpack.i.h.bf16 %v6284_v5  ;;  %v6285_v61 = vunpack.i.l.bf16 %v6284_v5 }
 0x45d   : > { %v9947_v53 = vadd.f32 %v3174_v34, %v9788_v31  ;;  %v6296_v40 = vunpack.i.h.bf16 %v6294_v9  ;;  %v6295_v52 = vunpack.i.l.bf16 %v6294_v9 }
 0x45e   : > { %5251 = vmatmul.msk.bf16.gmra.mxu3 %vm577_vm1, %v9796_v19  ;;  %v4026_v29 = vsel %vm1779_vm6, %v6285_v61, %v6250_v54  ;;  %v4027_v25 = vsel %vm1779_vm6, %v6286_v26, %v6251_v41  ;;  %v10957_v54 = vunpack.i.h.bf16 %v9798_v59  ;;  %v10958_v41 = vunpack.i.l.bf16 %v9798_v59 }
 0x45f   : > { %v3034_v37 = vpop.f32.mrf.mxu0 }
 0x460   : > { %v3053_v44 = vpop.f32.mrf.mxu1  ;;  %v9954_v30 = vadd.f32 %v3034_v37, %v9691_v57  ;;  %v6301_v37 = vunpack.i.h.bf16 %v6299_v12  ;;  %v4017_v0 = vsel %vm1779_vm6, %v10957_v54, %v6296_v40 }
 0x461   : > { %v9957_v60 = vadd.f32 %v3053_v44, %v9683_v51  ;;  %v3196_v17 = vpop.f32.mrf.mxu3  ;;  %5249 = vmatmul.msk.bf16.gmra.mxu2 %vm577_vm1, %v9796_v19  ;;  %v6290_v51 = vunpack.i.l.bf16 %v6289_v28  ;;  %v6275_v28 = vunpack.i.l.bf16 %v9951_v46  ;;  %v4016_v44 = vsel %vm1779_vm6, %v10958_v41, %v6295_v52 }
 0x462   : > { %v9962_v31 = vadd.f32 %v3196_v17, %v9815_v11  ;;  %5245 = vmatmul.msk.bf16.gmra.mxu0 %vm577_vm1, %v9796_v19  ;;  %v4043_v9 = vpack.c.bf16 %v4017_v0, %v4016_v44 }
 0x463   : > { %5247 = vmatmul.msk.bf16.gmra.mxu1 %vm577_vm1, %v9796_v19  ;;  %v4028_v19 = vsel %vm1779_vm6, %v6290_v51, %v6235_v39  ;;  %v9989_v16 = vpop.permute.xlu0 %6303  ;;  %v6276_v39 = vunpack.i.h.bf16 %v9951_v46  ;;  %v4006_v59 = vsel %vm1779_vm6, %v6275_v28, %v6285_v61 }
 0x464   : > { %v3177_v14 = vpop.f32.mrf.mxu2 }
 0x465   : > { %v9969_v57 = vadd.f32 %v3177_v14, %v9812_v23  ;;  %v10956_v23 = vunpack.i.h.bf16 %v9773_v45 }
 0x467   : > { %v3036_v32 = vpop.f32.mrf.mxu0  ;;  %v4029_v56 = vsel %vm1779_vm6, %v6291_v18, %v10956_v23 }
 0x468   : > { %v3055_v47 = vpop.f32.mrf.mxu1  ;;  %v9972_v11 = vadd.f32 %v3036_v32, %v9723_v2  ;;  %v6281_v2 = vunpack.i.h.bf16 %v9935_v22  ;;  %v4046_v50 = vpack.c.bf16 %v4029_v56, %v4028_v19  ;;  %v4010_v56 = vsel %vm1779_vm6, %v6300_v10, %v6275_v28 }
 0x469   : > { %v9975_v15 = vadd.f32 %v3055_v47, %v9708_v48  ;;  %v3198_v1 = vpop.f32.mrf.mxu3  ;;  %v6280_v48 = vunpack.i.l.bf16 %v9935_v22 }
 0x46a   : > { %v9992_v3 = vadd.f32 %v3198_v1, %v9847_v27  ;;  %v4009_v22 = vsel %vm1779_vm6, %v6281_v2, %v6291_v18  ;;  %v4040_v18 = vpack.c.bf16 %v4027_v25, %v4026_v29  ;;  %v10959_v1 = vunpack.i.l.bf16 %v9826_v13  ;;  %v10063_v29 = vpop.permute.xlu2 %6323 }
 0x46b   : > { %v4008_v27 = vsel %vm1779_vm6, %v6280_v48, %v6290_v51  ;;  %v4012_v46 = vsel %vm1779_vm6, %v6295_v52, %v6280_v48  ;;  %v4007_v51 = vsel %vm1779_vm6, %v6276_v39, %v6286_v26  ;;  %v10050_v26 = vpop.permute.xlu1 %6308 }
 0x46c   : > { %v3179_v45 = vpop.f32.mrf.mxu2  ;;  %v4045_v5 = vpack.c.bf16 %v4009_v22, %v4008_v27  ;;  %v4014_v19 = vsel %vm1779_vm6, %v10959_v1, %v6300_v10  ;;  %v4039_v52 = vpack.c.bf16 %v4007_v51, %v4006_v59 }
 0x46d   : > { %v10008_v34 = vadd.f32 %v3179_v45, %v9844_v63  ;;  %v4013_v63 = vsel %vm1779_vm6, %v6296_v40, %v6281_v2 }
 0x46e   : > { %5266 = vmatmul.msk.bf16.vlgmr.msrb.gmra.mxu3 %vm577_vm1, %v9985_v42  ;;  %v4044_v61 = vpack.c.bf16 %v4013_v63, %v4012_v46  ;;  %v6311_v46 = vunpack.i.h.bf16 %v10050_v26 }
 0x46f   : > { %4164 = vmatpush.bf16.msrb.mxu3 %v4046_v50  ;;  %v3210_v17 = vpop.f32.mrf.mxu0 }
 0x470   : > { %v3229_v14 = vpop.f32.mrf.mxu1  ;;  %v10030_v32 = vadd.f32 %v3210_v17, %v9785_v58  ;;  %v6326_v17 = vunpack.i.h.bf16 %v10063_v29 }
 0x471   : > { %v10033_v47 = vadd.f32 %v3229_v14, %v9776_v33  ;;  %v3267_v12 = vpop.f32.mrf.mxu3  ;;  %5264 = vmatmul.msk.bf16.vlgmr.msrb.gmra.mxu2 %vm577_vm1, %v9985_v42  ;;  %v10960_v33 = vunpack.i.h.bf16 %v9826_v13  ;;  %v10058_v13 = vpop.permute.xlu0 %6313  ;;  %v6325_v14 = vunpack.i.l.bf16 %v10063_v29 }
 0x472   : > { %v10042_v23 = vadd.f32 %v3267_v12, %v9901_v62  ;;  %5260 = vmatmul.msk.bf16.vlgmr.msrb.gmra.mxu0 %vm577_vm1, %v9985_v42  ;;  %4145 = vmatpush.bf16.msrb.mxu2 %v4045_v5  ;;  %v4011_v62 = vsel %vm1779_vm6, %v6301_v37, %v6276_v39  ;;  %v10085_v41 = vpop.permute.xlu2 %6328  ;;  %v4256_v59 = vsel %vm2023_vm7, %v6311_v46, %v6326_v17 }
 0x473   : > { %v4015_v58 = vsel %vm1779_vm6, %v10960_v33, %v6301_v37  ;;  %5262 = vmatmul.msk.bf16.vlgmr.msrb.gmra.mxu1 %vm577_vm1, %v9985_v42  ;;  %4107 = vmatpush.bf16.msrb.mxu0 %v4043_v9  ;;  %v4038_v45 = vpack.c.bf16 %v4011_v62, %v4010_v56  ;;  %v10076_v37 = vpop.permute.xlu1 %6318 }
 0x474   : > { %4126 = vmatpush.bf16.msrb.mxu1 %v4044_v61  ;;  %4165 = vmatpush.bf16.msrb.mxu3 %v4040_v18  ;;  %v3248_v40 = vpop.f32.mrf.mxu2  ;;  %v4037_v48 = vpack.c.bf16 %v4015_v58, %v4014_v19  ;;  %v6306_v18 = vunpack.i.h.bf16 %v9989_v16  ;;  %v6321_v12 = vunpack.i.h.bf16 %v10076_v37  ;;  %v6320_v1 = vunpack.i.l.bf16 %v10076_v37 }
 0x475   : > { %v10061_v2 = vadd.f32 %v3248_v40, %v9894_v21  ;;  %v10074_v21 = vld [vmem:[#allocation7 + $0x58] sm:$0xff]  ;;  %v6305_v58 = vunpack.i.l.bf16 %v9989_v16 }
 0x476   : > { %4146 = vmatpush.bf16.msrb.mxu2 %v4039_v52  ;;  %v10130_v52 = vld [vmem:[#allocation7 + $0x60] sm:$0xff] }
 0x477   : > { %4108 = vmatpush.bf16.msrb.mxu0 %v4037_v48  ;;  %v3212_v10 = vpop.f32.mrf.mxu0  ;;  %v6316_v48 = vunpack.i.h.bf16 %v10058_v13 }
 0x478   : > { %4127 = vmatpush.bf16.msrb.mxu1 %v4038_v45  ;;  %v3231_v25 = vpop.f32.mrf.mxu1  ;;  %v10066_v39 = vadd.f32 %v3212_v10, %v9803_v8  ;;  %v10874_v45 = vunpack.i.h.bf16 %v10085_v41 }
 0x479   : > { %v10069_v22 = vadd.f32 %v3231_v25, %v9794_v20  ;;  %v3269_v27 = vpop.f32.mrf.mxu3  ;;  %v10083_v8 = vpop.permute.xlu0 %6333 }
 0x47a   : > { %v10072_v50 = vadd.f32 %v3269_v27, %v9941_v43  ;;  %v10137_v10 = vpop.permute.xlu2 %6343  ;;  %v6335_v27 = vunpack.i.l.bf16 %v10083_v8 }
 0x47c   : > { %v3250_v28 = vpop.f32.mrf.mxu2 }
 0x47d   : > { %v10079_v54 = vadd.f32 %v3250_v28, %v9938_v6 }
 0x47e   : > { %5267 = vmatmul.msk.bf16.gmra.mxu3 %vm577_vm1, %v10074_v21 }
 0x47f   : > { %v3215_v0 = vpop.f32.mrf.mxu0 }
 0x480   : > { %v3234_v20 = vpop.f32.mrf.mxu1  ;;  %v10088_v43 = vadd.f32 %v3215_v0, %v9829_v36  ;;  %v6310_v36 = vunpack.i.l.bf16 %v10050_v26 }
 0x481   : > { %v10091_v44 = vadd.f32 %v3234_v20, %v9821_v55  ;;  %v3272_v63 = vpop.f32.mrf.mxu3  ;;  %5265 = vmatmul.msk.bf16.gmra.mxu2 %vm577_vm1, %v10074_v21  ;;  %v6349_v26 = vpop.permute.xlu0 %6348 }
 0x482   : > { %v10096_v6 = vadd.f32 %v3272_v63, %v9957_v60  ;;  %5261 = vmatmul.msk.bf16.gmra.mxu0 %vm577_vm1, %v10074_v21  ;;  %v6339_v60 = vpop.permute.xlu1 %6338  ;;  %v4255_v51 = vsel %vm2023_vm7, %v6310_v36, %v6325_v14  ;;  %v4259_v16 = vsel %vm2023_vm7, %v6305_v58, %v6310_v36  ;;  %v6350_v37 = vunpack.i.l.bf16 %v6349_v26 }
 0x483   : > { %5263 = vmatmul.msk.bf16.gmra.mxu1 %vm577_vm1, %v10074_v21  ;;  %v6341_v56 = vunpack.i.h.bf16 %v6339_v60  ;;  %v6340_v62 = vunpack.i.l.bf16 %v6339_v60  ;;  %v4287_v25 = vpack.c.bf16 %v4256_v59, %v4255_v51  ;;  %v4254_v63 = vsel %vm2023_vm7, %v6321_v12, %v10874_v45 }
 0x484   : > { %v3253_v5 = vpop.f32.mrf.mxu2  ;;  %v6351_v36 = vunpack.i.h.bf16 %v6349_v26  ;;  %v6345_v59 = vunpack.i.l.bf16 %v10137_v10 }
 0x485   : > { %v10105_v55 = vadd.f32 %v3253_v5, %v9954_v30  ;;  %v4263_v51 = vsel %vm2023_vm7, %v6340_v62, %v6305_v58 }
 0x487   : > { %v3217_v9 = vpop.f32.mrf.mxu0 }
 0x488   : > { %v3236_v30 = vpop.f32.mrf.mxu1  ;;  %v10121_v19 = vadd.f32 %v3217_v9, %v9869_v4  ;;  %v6330_v4 = vunpack.i.l.bf16 %v10085_v41  ;;  %v6346_v9 = vunpack.i.h.bf16 %v10137_v10 }
 0x489   : > { %v10124_v61 = vadd.f32 %v3236_v30, %v9851_v7  ;;  %v3274_v33 = vpop.f32.mrf.mxu3  ;;  %v4260_v7 = vsel %vm2023_vm7, %v6306_v18, %v6311_v46  ;;  %v6315_v46 = vunpack.i.l.bf16 %v10058_v13  ;;  %v4264_v13 = vsel %vm2023_vm7, %v6341_v56, %v6306_v18 }
 0x48a   : > { %v10128_v40 = vadd.f32 %v3274_v33, %v9975_v15  ;;  %v6336_v15 = vunpack.i.h.bf16 %v10083_v8  ;;  %v4253_v20 = vsel %vm2023_vm7, %v6320_v1, %v6330_v4  ;;  %v4286_v60 = vpack.c.bf16 %v4260_v7, %v4259_v16 }
 0x48b   : > { %v4281_v26 = vpack.c.bf16 %v4254_v63, %v4253_v20  ;;  %v4258_v7 = vsel %vm2023_vm7, %v6316_v48, %v6321_v12  ;;  %v4261_v12 = vsel %vm2023_vm7, %v6350_v37, %v6315_v46  ;;  %v6359_v63 = vpop.permute.xlu2 %6358 }
 0x48c   : > { %v3255_v28 = vpop.f32.mrf.mxu2  ;;  %v4268_v5 = vsel %vm2023_vm7, %v6336_v15, %v6341_v56  ;;  %v4265_v56 = vsel %vm2023_vm7, %v6345_v59, %v6350_v37 }
 0x48d   : > { %v10144_v0 = vadd.f32 %v3255_v28, %v9972_v11  ;;  %v4267_v11 = vsel %vm2023_vm7, %v6335_v27, %v6340_v62  ;;  %v4257_v28 = vsel %vm2023_vm7, %v6315_v46, %v6320_v1  ;;  %v4285_v1 = vpack.c.bf16 %v4264_v13, %v4263_v51  ;;  %v10216_v51 = vld [vmem:[#allocation7 + $0x68] sm:$0xff] }
 0x48e   : > { %5282 = vmatmul.msk.bf16.vlgmr.msra.gmra.mxu3 %vm577_vm1, %v10130_v52  ;;  %v4284_v16 = vpack.c.bf16 %v4268_v5, %v4267_v11  ;;  %v4280_v20 = vpack.c.bf16 %v4258_v7, %v4257_v28 }
 0x48f   : > { %4369 = vmatpush.bf16.msra.mxu3 %v4287_v25  ;;  %v3415_v30 = vpop.f32.mrf.mxu0 }
 0x490   : > { %v3434_v33 = vpop.f32.mrf.mxu1  ;;  %v10176_v45 = vadd.f32 %v3415_v30, %v9933_v24  ;;  %v10196_v24 = vpop.permute.xlu1 %6353 }
 0x491   : > { %v10179_v18 = vadd.f32 %v3434_v33, %v9914_v49  ;;  %v3472_v58 = vpop.f32.mrf.mxu3  ;;  %5280 = vmatmul.msk.bf16.vlgmr.msra.gmra.mxu2 %vm577_vm1, %v10130_v52  ;;  %v4266_v49 = vsel %vm2023_vm7, %v6346_v9, %v6351_v36 }
 0x492   : > { %v10188_v62 = vadd.f32 %v3472_v58, %v10033_v47  ;;  %5268 = vmatmul.msk.bf16.vlgmr.msra.gmra.mxu0 %vm577_vm1, %v9985_v42  ;;  %4350 = vmatpush.bf16.msra.mxu2 %v4286_v60  ;;  %v4262_v47 = vsel %vm2023_vm7, %v6351_v36, %v6316_v48  ;;  %v4278_v11 = vpack.c.bf16 %v4266_v49, %v4265_v56  ;;  %v6360_v49 = vunpack.i.l.bf16 %v6359_v63 }
 0x493   : > { %5270 = vmatmul.msk.bf16.vlgmr.msra.gmra.mxu1 %vm577_vm1, %v9985_v42  ;;  %4312 = vmatpush.bf16.msra.mxu0 %v4284_v16  ;;  %v4279_v60 = vpack.c.bf16 %v4262_v47, %v4261_v12 }
 0x494   : > { %4331 = vmatpush.bf16.msra.mxu1 %v4285_v1  ;;  %4370 = vmatpush.bf16.msra.mxu3 %v4281_v26  ;;  %v3453_v25 = vpop.f32.mrf.mxu2  ;;  %v6361_v1 = vunpack.i.h.bf16 %v6359_v63 }
 0x495   : > { %v10205_v5 = vadd.f32 %v3453_v25, %v10030_v32  ;;  %v10218_v32 = vpop.permute.xlu0 %6363  ;;  %v6356_v25 = vunpack.i.h.bf16 %v10196_v24 }
 0x496   : > { %4351 = vmatpush.bf16.msra.mxu2 %v4280_v20  ;;  %v10876_v58 = vunpack.i.h.bf16 %v10218_v32 }
 0x497   : > { %4313 = vmatpush.bf16.msra.mxu0 %v4278_v11  ;;  %v3417_v42 = vpop.f32.mrf.mxu0 }
 0x498   : > { %4332 = vmatpush.bf16.msra.mxu1 %v4279_v60  ;;  %v3436_v13 = vpop.f32.mrf.mxu1  ;;  %v10208_v37 = vadd.f32 %v3417_v42, %v9947_v53  ;;  %v10220_v33 = vpop.permute.xlu1 %6368 }
 0x499   : > { %v10211_v48 = vadd.f32 %v3436_v13, %v9944_v38  ;;  %v3474_v46 = vpop.f32.mrf.mxu3  ;;  %v10227_v53 = vpop.permute.xlu2 %6373 }
 0x49a   : > { %v10214_v36 = vadd.f32 %v3474_v46, %v10069_v22 }
 0x49c   : > { %v3455_v30 = vpop.f32.mrf.mxu2 }
 0x49d   : > { %v10223_v26 = vadd.f32 %v3455_v30, %v10066_v39  ;;  %v10249_v12 = vpop.permute.xlu0 %6378 }
 0x49e   : > { %5283 = vmatmul.msk.bf16.gmra.mxu3 %vm577_vm1, %v10216_v51  ;;  %v10877_v63 = vunpack.i.h.bf16 %v10249_v12  ;;  %v6380_v60 = vunpack.i.l.bf16 %v10249_v12 }
 0x49f   : > { %v3420_v38 = vpop.f32.mrf.mxu0 }
 0x4a0   : > { %v3439_v28 = vpop.f32.mrf.mxu1  ;;  %v10230_v22 = vadd.f32 %v3420_v38, %v9969_v57  ;;  %v10875_v57 = vunpack.i.l.bf16 %v10218_v32 }
 0x4a1   : > { %v10233_v7 = vadd.f32 %v3439_v28, %v9962_v31  ;;  %v3477_v16 = vpop.f32.mrf.mxu3  ;;  %5281 = vmatmul.msk.bf16.gmra.mxu2 %vm577_vm1, %v10216_v51  ;;  %v6389_v42 = vpop.permute.xlu2 %6388 }
 0x4a2   : > { %v10238_v39 = vadd.f32 %v3477_v16, %v10091_v44  ;;  %5269 = vmatmul.msk.bf16.gmra.mxu0 %vm577_vm1, %v10074_v21  ;;  %v6384_v44 = vpop.permute.xlu1 %6383  ;;  %v4506_v47 = vsel %vm2267_vm8, %v6360_v49, %v10875_v57  ;;  %v6376_v57 = vunpack.i.h.bf16 %v10227_v53 }
 0x4a3   : > { %5271 = vmatmul.msk.bf16.gmra.mxu1 %vm577_vm1, %v10074_v21  ;;  %v4507_v21 = vsel %vm2267_vm8, %v6361_v1, %v10876_v58  ;;  %v6386_v38 = vunpack.i.h.bf16 %v6384_v44  ;;  %v6385_v28 = vunpack.i.l.bf16 %v6384_v44  ;;  %v6375_v58 = vunpack.i.l.bf16 %v10227_v53 }
 0x4a4   : > { %v3458_v56 = vpop.f32.mrf.mxu2  ;;  %v6370_v44 = vunpack.i.l.bf16 %v10220_v33 }
 0x4a5   : > { %v10247_v31 = vadd.f32 %v3458_v56, %v10088_v43  ;;  %v6355_v43 = vunpack.i.l.bf16 %v10196_v24  ;;  %v4528_v56 = vpack.c.bf16 %v4507_v21, %v4506_v47  ;;  %v6371_v47 = vunpack.i.h.bf16 %v10220_v33 }
 0x4a6   : > { %v4504_v53 = vsel %vm2267_vm8, %v6375_v58, %v6380_v60 }
 0x4a7   : > { %v3422_v20 = vpop.f32.mrf.mxu0 }
 0x4a8   : > { %v3441_v11 = vpop.f32.mrf.mxu1  ;;  %v10264_v13 = vadd.f32 %v3422_v20, %v10008_v34  ;;  %v4511_v34 = vsel %vm2267_vm8, %v6356_v25, %v6361_v1  ;;  %v6390_v20 = vunpack.i.l.bf16 %v6389_v42  ;;  %v4505_v1 = vsel %vm2267_vm8, %v6376_v57, %v10877_v63 }
 0x4a9   : > { %v10267_v46 = vadd.f32 %v3441_v11, %v9992_v3  ;;  %v3479_v30 = vpop.f32.mrf.mxu3  ;;  %v4510_v3 = vsel %vm2267_vm8, %v6355_v43, %v6360_v49  ;;  %v6391_v49 = vunpack.i.h.bf16 %v6389_v42  ;;  %v4252_v11 = vsel %vm2023_vm7, %v6326_v17, %v6386_v38 }
 0x4aa   : > { %v10270_v16 = vadd.f32 %v3479_v30, %v10124_v61  ;;  %v4272_v30 = vsel %vm2023_vm7, %v6386_v38, %v6336_v15  ;;  %v4271_v42 = vsel %vm2023_vm7, %v6385_v28, %v6335_v27  ;;  %v4527_v17 = vpack.c.bf16 %v4511_v34, %v4510_v3 }
 0x4ab   : > { %v4522_v63 = vpack.c.bf16 %v4505_v1, %v4504_v53  ;;  %v4508_v15 = vsel %vm2267_vm8, %v6370_v44, %v6375_v58  ;;  %v4269_v58 = vsel %vm2023_vm7, %v6390_v20, %v6345_v59 }
 0x4ac   : > { %v3460_v61 = vpop.f32.mrf.mxu2 }
 0x4ad   : > { %v10285_v21 = vadd.f32 %v3460_v61, %v10121_v19  ;;  %v4251_v19 = vsel %vm2023_vm7, %v6325_v14, %v6385_v28  ;;  %v4249_v14 = vsel %vm2023_vm7, %v6330_v4, %v6390_v20  ;;  %v4509_v4 = vsel %vm2267_vm8, %v6371_v47, %v6376_v57  ;;  %v6399_v20 = vpop.permute.xlu0 %6398 }
 0x4ae   : > { %5290 = vmatmul.msk.bf16.vlgmr.msrb.gmra.mxu3 %vm577_vm1, %v10130_v52  ;;  %v4288_v38 = vpack.c.bf16 %v4252_v11, %v4251_v19  ;;  %v4521_v57 = vpack.c.bf16 %v4509_v4, %v4508_v15 }
 0x4af   : > { %4574 = vmatpush.bf16.msrb.mxu3 %v4528_v56  ;;  %v3491_v61 = vpop.f32.mrf.mxu0  ;;  %v4289_v56 = vpack.c.bf16 %v4272_v30, %v4271_v42  ;;  %v10369_v30 = vpop.permute.xlu2 %6393 }
 0x4b0   : > { %v3510_v29 = vpop.f32.mrf.mxu1  ;;  %v10322_v8 = vadd.f32 %v3491_v61, %v10061_v2 }
 0x4b1   : > { %v10325_v27 = vadd.f32 %v3510_v29, %v10042_v23  ;;  %v3605_v28 = vpop.f32.mrf.mxu3  ;;  %5288 = vmatmul.msk.bf16.vlgmr.msrb.gmra.mxu2 %vm577_vm1, %v10130_v52  ;;  %v10961_v23 = vunpack.i.h.bf16 %v10085_v41 }
 0x4b2   : > { %v10334_v34 = vadd.f32 %v3605_v28, %v10179_v18  ;;  %5284 = vmatmul.msk.bf16.vlgmr.msrb.gmra.mxu0 %vm577_vm1, %v10130_v52  ;;  %4555 = vmatpush.bf16.msrb.mxu2 %v4527_v17  ;;  %v4270_v18 = vsel %vm2023_vm7, %v6391_v49, %v6346_v9 }
 0x4b3   : > { %v4250_v2 = vsel %vm2023_vm7, %v10961_v23, %v6391_v49  ;;  %5286 = vmatmul.msk.bf16.vlgmr.msrb.gmra.mxu1 %vm577_vm1, %v10130_v52  ;;  %4388 = vmatpush.bf16.msrb.mxu0 %v4288_v38  ;;  %v4283_v52 = vpack.c.bf16 %v4270_v18, %v4269_v58  ;;  %v6409_v49 = vpop.permute.xlu1 %6408 }
 0x4b4   : > { %4407 = vmatpush.bf16.msrb.mxu1 %v4289_v56  ;;  %4575 = vmatpush.bf16.msrb.mxu3 %v4522_v63  ;;  %v3586_v41 = vpop.f32.mrf.mxu2  ;;  %v4282_v53 = vpack.c.bf16 %v4250_v2, %v4249_v14 }
 0x4b5   : > { %v10353_v3 = vadd.f32 %v3586_v41, %v10176_v45  ;;  %v6404_v29 = vpop.permute.xlu0 %6403 }
 0x4b6   : > { %4556 = vmatpush.bf16.msrb.mxu2 %v4521_v57  ;;  %v6406_v38 = vunpack.i.h.bf16 %v6404_v29  ;;  %v6405_v28 = vunpack.i.l.bf16 %v6404_v29 }
 0x4b7   : > { %4389 = vmatpush.bf16.msrb.mxu0 %v4282_v53  ;;  %v3493_v1 = vpop.f32.mrf.mxu0  ;;  %v10406_v53 = vld [vmem:[#allocation7 + $0x70] sm:$0xff] }
 0x4b8   : > { %4408 = vmatpush.bf16.msrb.mxu1 %v4283_v52  ;;  %v3512_v11 = vpop.f32.mrf.mxu1  ;;  %v10356_v59 = vadd.f32 %v3493_v1, %v10079_v54  ;;  %v6400_v52 = vunpack.i.l.bf16 %v6399_v20  ;;  %v4513_v24 = vsel %vm2267_vm8, %v6406_v38, %v6371_v47  ;;  %v10963_v47 = vunpack.i.l.bf16 %v10218_v32 }
 0x4b9   : > { %v10359_v10 = vadd.f32 %v3512_v11, %v10072_v50  ;;  %v3607_v9 = vpop.f32.mrf.mxu3 }
 0x4ba   : > { %v10362_v63 = vadd.f32 %v3607_v9, %v10211_v48 }
 0x4bb   : > { %v6414_v15 = vpop.permute.xlu1 %6413 }
 0x4bc   : > { %v3588_v45 = vpop.f32.mrf.mxu2  ;;  %v6416_v18 = vunpack.i.h.bf16 %v6414_v15  ;;  %v6415_v41 = vunpack.i.l.bf16 %v6414_v15 }
 0x4bd   : > { %v10365_v19 = vadd.f32 %v3588_v45, %v10208_v37 }
 0x4be   : > { %5291 = vmatmul.msk.bf16.gmra.mxu3 %vm577_vm1, %v10216_v51 }
 0x4bf   : > { %v3496_v54 = vpop.f32.mrf.mxu0 }
 0x4c0   : > { %v3515_v42 = vpop.f32.mrf.mxu1  ;;  %v10372_v50 = vadd.f32 %v3496_v54, %v10105_v55  ;;  %v6410_v55 = vunpack.i.l.bf16 %v6409_v49  ;;  %v6396_v54 = vunpack.i.h.bf16 %v10369_v30 }
 0x4c1   : > { %v10375_v17 = vadd.f32 %v3515_v42, %v10096_v6  ;;  %v3610_v48 = vpop.f32.mrf.mxu3  ;;  %5289 = vmatmul.msk.bf16.gmra.mxu2 %vm577_vm1, %v10216_v51  ;;  %v6411_v6 = vunpack.i.h.bf16 %v6409_v49  ;;  %v4502_v49 = vsel %vm2267_vm8, %v10963_v47, %v6415_v41  ;;  %v4498_v42 = vsel %vm2267_vm8, %v6415_v41, %v6400_v52 }
 0x4c2   : > { %v10380_v37 = vadd.f32 %v3610_v48, %v10233_v7  ;;  %5285 = vmatmul.msk.bf16.gmra.mxu0 %vm577_vm1, %v10216_v51  ;;  %v6419_v7 = vpop.permute.xlu2 %6418  ;;  %v4514_v23 = vsel %vm2267_vm8, %v6410_v55, %v6355_v43  ;;  %v6401_v43 = vunpack.i.h.bf16 %v6399_v20  ;;  %v6395_v20 = vunpack.i.l.bf16 %v10369_v30 }
 0x4c3   : > { %5287 = vmatmul.msk.bf16.gmra.mxu1 %vm577_vm1, %v10216_v51  ;;  %v4515_v58 = vsel %vm2267_vm8, %v6411_v6, %v6356_v25  ;;  %v6421_v45 = vunpack.i.h.bf16 %v6419_v7 }
 0x4c4   : > { %v3591_v61 = vpop.f32.mrf.mxu2  ;;  %v4495_v25 = vsel %vm2267_vm8, %v6401_v43, %v6411_v6  ;;  %v4532_v11 = vpack.c.bf16 %v4515_v58, %v4514_v23  ;;  %v4492_v6 = vsel %vm2267_vm8, %v6395_v20, %v6405_v28 }
 0x4c5   : > { %v10387_v14 = vadd.f32 %v3591_v61, %v10230_v22 }
 0x4c7   : > { %v3498_v4 = vpop.f32.mrf.mxu0 }
 0x4c8   : > { %v3517_v56 = vpop.f32.mrf.mxu1  ;;  %v10394_v51 = vadd.f32 %v3498_v4, %v10144_v0  ;;  %v6420_v0 = vunpack.i.l.bf16 %v6419_v7  ;;  %v4493_v7 = vsel %vm2267_vm8, %v6396_v54, %v6406_v38 }
 0x4c9   : > { %v10397_v2 = vadd.f32 %v3517_v56, %v10128_v40  ;;  %v3612_v22 = vpop.f32.mrf.mxu3  ;;  %v4512_v40 = vsel %vm2267_vm8, %v6405_v28, %v6370_v44  ;;  %v10962_v44 = vunpack.i.h.bf16 %v10218_v32  ;;  %v4525_v28 = vpack.c.bf16 %v4493_v7, %v4492_v6  ;;  %v5371_v6 = vld [vmem:[#allocation7 + $0x88] sm:$0xff] }
 0x4ca   : > { %v10404_v57 = vadd.f32 %v3612_v22, %v10267_v46  ;;  %v4494_v46 = vsel %vm2267_vm8, %v6400_v52, %v6410_v55  ;;  %v4526_v55 = vpack.c.bf16 %v4513_v24, %v4512_v40  ;;  %v4500_v32 = vsel %vm2267_vm8, %v6380_v60, %v6420_v0  ;;  %v5369_v40 = vld [vmem:[#allocation7 + $0x78] sm:$0xff] }
 0x4cb   : > { %v4503_v33 = vsel %vm2267_vm8, %v10962_v44, %v6416_v18  ;;  %v4531_v48 = vpack.c.bf16 %v4495_v25, %v4494_v46  ;;  %v4496_v60 = vsel %vm2267_vm8, %v6420_v0, %v6395_v20 }
 0x4cc   : > { %v3593_v1 = vpop.f32.mrf.mxu2  ;;  %v4529_v30 = vpack.c.bf16 %v4503_v33, %v4502_v49 }
 0x4cd   : > { %v10421_v9 = vadd.f32 %v3593_v1, %v10264_v13  ;;  %v4499_v13 = vsel %vm2267_vm8, %v6416_v18, %v6401_v43 }
 0x4ce   : > { %5306 = vmatmul.msk.bf16.vlgmr.msra.gmra.mxu3 %vm577_vm1, %v10406_v53  ;;  %v4530_v23 = vpack.c.bf16 %v4499_v13, %v4498_v42 }
 0x4cf   : > { %4650 = vmatpush.bf16.msra.mxu3 %v4532_v11  ;;  %v3624_v61 = vpop.f32.mrf.mxu0 }
 0x4d0   : > { %v3643_v29 = vpop.f32.mrf.mxu1  ;;  %v10446_v15 = vadd.f32 %v3624_v61, %v10205_v5  ;;  %v10964_v5 = vunpack.i.h.bf16 %v10249_v12 }
 0x4d1   : > { %v3694_v4 = vadd.f32 %v3643_v29, %v10188_v62  ;;  %v3681_v56 = vpop.f32.mrf.mxu3  ;;  %5304 = vmatmul.msk.bf16.vlgmr.msra.gmra.mxu2 %vm577_vm1, %v10406_v53 }
 0x4d2   : > { %v10454_v22 = vadd.f32 %v3681_v56, %v10325_v27  ;;  %5300 = vmatmul.msk.bf16.vlgmr.msra.gmra.mxu0 %vm577_vm1, %v10406_v53  ;;  %4631 = vmatpush.bf16.msra.mxu2 %v4531_v48  ;;  %v4501_v62 = vsel %vm2267_vm8, %v10964_v5, %v6421_v45  ;;  %v4497_v27 = vsel %vm2267_vm8, %v6421_v45, %v6396_v54 }
 0x4d3   : > { %5302 = vmatmul.msk.bf16.vlgmr.msra.gmra.mxu1 %vm577_vm1, %v10406_v53  ;;  %4593 = vmatpush.bf16.msra.mxu0 %v4529_v30  ;;  %v4523_v12 = vpack.c.bf16 %v4501_v62, %v4500_v32  ;;  %v4524_v18 = vpack.c.bf16 %v4497_v27, %v4496_v60 }
 0x4d4   : > { %4612 = vmatpush.bf16.msra.mxu1 %v4530_v23  ;;  %4651 = vmatpush.bf16.msra.mxu3 %v4526_v55  ;;  %v3662_v38 = vpop.f32.mrf.mxu2 }
 0x4d5   : > { %v10469_v58 = vadd.f32 %v3662_v38, %v10322_v8 }
 0x4d6   : > { %4632 = vmatpush.bf16.msra.mxu2 %v4525_v28 }
 0x4d7   : > { %4594 = vmatpush.bf16.msra.mxu0 %v4523_v12  ;;  %v3626_v41 = vpop.f32.mrf.mxu0 }
 0x4d8   : > { %4613 = vmatpush.bf16.msra.mxu1 %v4524_v18  ;;  %v3645_v43 = vpop.f32.mrf.mxu1  ;;  %v3699_v52 = vadd.f32 %v3626_v41, %v10223_v26 }
 0x4d9   : > { %v3700_v0 = vadd.f32 %v3645_v43, %v10214_v36  ;;  %v3683_v35 = vpop.f32.mrf.mxu3 }
 0x4da   : > { %v10474_v1 = vadd.f32 %v3683_v35, %v10359_v10 }
 0x4dc   : > { %v3664_v24 = vpop.f32.mrf.mxu2 }
 0x4dd   : > { %v10477_v8 = vadd.f32 %v3664_v24, %v10356_v59 }
 0x4de   : > { %5307 = vmatmul.msk.bf16.gmra.mxu3 %vm577_vm1, %v5369_v40 }
 0x4df   : > { %v3629_v25 = vpop.f32.mrf.mxu0 }
 0x4e0   : > { %v3648_v46 = vpop.f32.mrf.mxu1  ;;  %v3705_v11 = vadd.f32 %v3629_v25, %v10247_v31 }
 0x4e1   : > { %v3706_v20 = vadd.f32 %v3648_v46, %v10238_v39  ;;  %v3686_v26 = vpop.f32.mrf.mxu3  ;;  %5305 = vmatmul.msk.bf16.gmra.mxu2 %vm577_vm1, %v5369_v40 }
 0x4e2   : > { %v10484_v36 = vadd.f32 %v3686_v26, %v10375_v17  ;;  %5301 = vmatmul.msk.bf16.gmra.mxu0 %vm577_vm1, %v5369_v40  ;;  %v5370_v17 = vld [vmem:[#allocation7 + $0x80] sm:$0xff] }
 0x4e3   : > { %5303 = vmatmul.msk.bf16.gmra.mxu1 %vm577_vm1, %v5369_v40 }
 0x4e4   : > { %v3667_v59 = vpop.f32.mrf.mxu2 }
 0x4e5   : > { %v10489_v10 = vadd.f32 %v3667_v59, %v10372_v50 }
 0x4e7   : > { %v3631_v45 = vpop.f32.mrf.mxu0 }
 0x4e8   : > { %v3650_v44 = vpop.f32.mrf.mxu1  ;;  %v3711_v31 = vadd.f32 %v3631_v45, %v10285_v21 }
 0x4e9   : > { %v3712_v39 = vadd.f32 %v3650_v44, %v10270_v16  ;;  %v3688_v33 = vpop.f32.mrf.mxu3 }
 0x4ea   : > { %v10494_v47 = vadd.f32 %v3688_v33, %v10397_v2 }
 0x4ec   : > { %v3669_v49 = vpop.f32.mrf.mxu2 }
 0x4ed   : > { %v10497_v54 = vadd.f32 %v3669_v49, %v10394_v51 }
 0x4ee   : > { %5322 = vmatmul.msk.bf16.vlgmr.msrb.gmra.mxu3 %vm577_vm1, %v5370_v17 }
 0x4ef   : > { %v3829_v13 = vpop.f32.mrf.mxu0 }
 0x4f0   : > { %v3848_v50 = vpop.f32.mrf.mxu1  ;;  %v3934_v42 = vadd.f32 %v3829_v13, %v10353_v3 }
 0x4f1   : > { %v3935_v48 = vadd.f32 %v3848_v50, %v10334_v34  ;;  %v3886_v21 = vpop.f32.mrf.mxu3  ;;  %5320 = vmatmul.msk.bf16.vlgmr.msrb.gmra.mxu2 %vm577_vm1, %v5370_v17 }
 0x4f2   : > { %v10503_v16 = vadd.f32 %v3886_v21, %v3694_v4  ;;  %5308 = vmatmul.msk.bf16.vlgmr.msrb.gmra.mxu0 %vm577_vm1, %v10406_v53 }
 0x4f3   : > { %5310 = vmatmul.msk.bf16.vlgmr.msrb.gmra.mxu1 %vm577_vm1, %v10406_v53 }
 0x4f4   : > { %v3867_v51 = vpop.f32.mrf.mxu2 }
 0x4f5   : > { %v10510_v2 = vadd.f32 %v3867_v51, %v10446_v15 }
 0x4f7   : > { %v3831_v61 = vpop.f32.mrf.mxu0 }
 0x4f8   : > { %v3850_v29 = vpop.f32.mrf.mxu1  ;;  %v3940_v3 = vadd.f32 %v3831_v61, %v10365_v19 }
 0x4f9   : > { %v3941_v34 = vadd.f32 %v3850_v29, %v10362_v63  ;;  %v3888_v55 = vpop.f32.mrf.mxu3 }
 0x4fa   : > { %v10514_v32 = vadd.f32 %v3888_v55, %v3700_v0 }
 0x4fc   : > { %v3869_v30 = vpop.f32.mrf.mxu2 }
 0x4fd   : > { %v10516_v4 = vadd.f32 %v3869_v30, %v3699_v52 }
 0x4fe   : > { %5323 = vmatmul.msk.bf16.gmra.mxu3 %vm577_vm1, %v5371_v6 }
 0x4ff   : > { %v3834_v53 = vpop.f32.mrf.mxu0 }
 0x500   : > { %v3853_v56 = vpop.f32.mrf.mxu1  ;;  %v3946_v15 = vadd.f32 %v3834_v53, %v10387_v14 }
 0x501   : > { %v3947_v7 = vadd.f32 %v3853_v56, %v10380_v37  ;;  %v3891_v23 = vpop.f32.mrf.mxu3  ;;  %5321 = vmatmul.msk.bf16.gmra.mxu2 %vm577_vm1, %v5371_v6 }
 0x502   : > { %v10522_v19 = vadd.f32 %v3891_v23, %v3706_v20  ;;  %5309 = vmatmul.msk.bf16.gmra.mxu0 %vm577_vm1, %v5369_v40 }
 0x503   : > { %5311 = vmatmul.msk.bf16.gmra.mxu1 %vm577_vm1, %v5369_v40 }
 0x504   : > { %v3872_v63 = vpop.f32.mrf.mxu2 }
 0x505   : > { %v10526_v5 = vadd.f32 %v3872_v63, %v3705_v11 }
 0x507   : > { %v3836_v62 = vpop.f32.mrf.mxu0 }
 0x508   : > { %v3855_v60 = vpop.f32.mrf.mxu1  ;;  %v3952_v27 = vadd.f32 %v3836_v62, %v10421_v9 }
 0x509   : > { %v3953_v14 = vadd.f32 %v3855_v60, %v10404_v57  ;;  %v3893_v38 = vpop.f32.mrf.mxu3 }
 0x50a   : > { %v10530_v37 = vadd.f32 %v3893_v38, %v3712_v39 }
 0x50c   : > { %v3874_v28 = vpop.f32.mrf.mxu2 }
 0x50d   : > { %v10532_v12 = vadd.f32 %v3874_v28, %v3711_v31 }
 0x50e   : > { %5330 = vmatmul.msk.bf16.vlgmr.msra.gmra.mxu3 %vm577_vm1, %v5370_v17 }
 0x50f   : > { %v3905_v18 = vpop.f32.mrf.mxu0 }
 0x510   : > { %v3924_v41 = vpop.f32.mrf.mxu1  ;;  %v3938_v43 = vadd.f32 %v3905_v18, %v10469_v58 }
 0x511   : > { %v3939_v52 = vadd.f32 %v3924_v41, %v10454_v22  ;;  %v4091_v0 = vpop.f32.mrf.mxu3  ;;  %5328 = vmatmul.msk.bf16.vlgmr.msra.gmra.mxu2 %vm577_vm1, %v5370_v17 }
 0x512   : > { %v10538_v9 = vadd.f32 %v4091_v0, %v3935_v48  ;;  %5324 = vmatmul.msk.bf16.vlgmr.msra.gmra.mxu0 %vm577_vm1, %v5370_v17 }
 0x513   : > { %5326 = vmatmul.msk.bf16.vlgmr.msra.gmra.mxu1 %vm577_vm1, %v5370_v17 }
 0x514   : > { %v4072_v57 = vpop.f32.mrf.mxu2 }
 0x515   : > { %v10542_v35 = vadd.f32 %v4072_v57, %v3934_v42 }
 0x517   : > { %v3907_v40 = vpop.f32.mrf.mxu0 }
 0x518   : > { %v3926_v24 = vpop.f32.mrf.mxu1  ;;  %v3944_v25 = vadd.f32 %v3907_v40, %v10477_v8 }
 0x519   : > { %v3945_v58 = vadd.f32 %v3926_v24, %v10474_v1  ;;  %v4093_v46 = vpop.f32.mrf.mxu3 }
 0x51a   : > { %v10546_v22 = vadd.f32 %v4093_v46, %v3941_v34 }
 0x51c   : > { %v4074_v11 = vpop.f32.mrf.mxu2 }
 0x51d   : > { %v10548_v20 = vadd.f32 %v4074_v11, %v3940_v3 }
 0x51e   : > { %5331 = vmatmul.msk.bf16.gmra.mxu3 %vm577_vm1, %v5371_v6 }
 0x51f   : > { %v3910_v26 = vpop.f32.mrf.mxu0 }
 0x520   : > { %v3929_v59 = vpop.f32.mrf.mxu1  ;;  %v3950_v45 = vadd.f32 %v3910_v26, %v10489_v10 }
 0x521   : > { %v3951_v44 = vadd.f32 %v3929_v59, %v10484_v36  ;;  %v4096_v31 = vpop.f32.mrf.mxu3  ;;  %5329 = vmatmul.msk.bf16.gmra.mxu2 %vm577_vm1, %v5371_v6 }
 0x522   : > { %v10554_v8 = vadd.f32 %v4096_v31, %v3947_v7  ;;  %5325 = vmatmul.msk.bf16.gmra.mxu0 %vm577_vm1, %v5371_v6 }
 0x523   : > { %5327 = vmatmul.msk.bf16.gmra.mxu1 %vm577_vm1, %v5371_v6 }
 0x524   : > { %v4077_v1 = vpop.f32.mrf.mxu2 }
 0x525   : > { %v10558_v39 = vadd.f32 %v4077_v1, %v3946_v15 }
 0x527   : > { %v3912_v33 = vpop.f32.mrf.mxu0 }
 0x528   : > { %v3931_v17 = vpop.f32.mrf.mxu1  ;;  %v3956_v49 = vadd.f32 %v3912_v33, %v10497_v54 }
 0x529   : > { %v3957_v10 = vadd.f32 %v3931_v17, %v10494_v47  ;;  %v4098_v13 = vpop.f32.mrf.mxu3 }
 0x52a   : > { %v10562_v36 = vadd.f32 %v4098_v13, %v3953_v14 }
 0x52c   : > { %v4079_v50 = vpop.f32.mrf.mxu2 }
 0x52d   : > { %v10564_v42 = vadd.f32 %v4079_v50, %v3952_v27  ;;  %v10633_v50 = vpop.permute.xlu2 %4703 }
 0x52f   : > { %v4110_v48 = vpop.f32.mrf.mxu0 }
 0x530   : > { %v4129_v21 = vpop.f32.mrf.mxu1  ;;  %v10567_v51 = vadd.f32 %v4110_v48, %v10510_v2 }
 0x531   : > { %v10570_v61 = vadd.f32 %v4129_v21, %v10503_v16  ;;  %v4167_v29 = vpop.f32.mrf.mxu3 }
 0x532   : > { %v10572_v3 = vadd.f32 %v4167_v29, %v3939_v52 }
 0x534   : > { %v4148_v54 = vpop.f32.mrf.mxu2 }
 0x535   : > { %v10574_v34 = vadd.f32 %v4148_v54, %v3938_v43 }
 0x537   : > { %v4112_v47 = vpop.f32.mrf.mxu0 }
 0x538   : > { %v4131_v55 = vpop.f32.mrf.mxu1  ;;  %v10577_v6 = vadd.f32 %v4112_v47, %v10516_v4 }
 0x539   : > { %v10580_v30 = vadd.f32 %v4131_v55, %v10514_v32  ;;  %v4169_v53 = vpop.f32.mrf.mxu3 }
 0x53a   : > { %v10582_v2 = vadd.f32 %v4169_v53, %v3945_v58 }
 0x53c   : > { %v4150_v56 = vpop.f32.mrf.mxu2 }
 0x53d   : > { %v10584_v16 = vadd.f32 %v4150_v56, %v3944_v25  ;;  %v6446_v56 = vld [vmem:[%s6797_s15 + $0x8] sm:$0xff] }
 0x53f   : > { %v4115_v15 = vpop.f32.mrf.mxu0 }
 0x540   : > { %v4134_v7 = vpop.f32.mrf.mxu1  ;;  %v10587_v23 = vadd.f32 %v4115_v15, %v10526_v5 }
 0x541   : > { %v10590_v63 = vadd.f32 %v4134_v7, %v10522_v19  ;;  %v4172_v62 = vpop.f32.mrf.mxu3 }
 0x542   : > { %v10592_v4 = vadd.f32 %v4172_v62, %v3951_v44  ;;  %v10622_v44 = vpop.permute.xlu1 %4698 }
 0x544   : > { %v4153_v60 = vpop.f32.mrf.mxu2 }
 0x545   : > { %v10594_v32 = vadd.f32 %v4153_v60, %v3950_v45 }
 0x547   : > { %v4117_v27 = vpop.f32.mrf.mxu0 }
 0x548   : > { %v4136_v14 = vpop.f32.mrf.mxu1  ;;  %v10597_v38 = vadd.f32 %v4117_v27, %v10532_v12 }
 0x549   : > { %v10600_v28 = vadd.f32 %v4136_v14, %v10530_v37  ;;  %v4174_v18 = vpop.f32.mrf.mxu3 }
 0x54a   : > { %v10602_v5 = vadd.f32 %v4174_v18, %v3957_v10  ;;  %v10637_v54 = vpop.permute.xlu1 %4741 }
 0x54c   : > { %v4155_v41 = vpop.f32.mrf.mxu2 }
 0x54d   : > { %v10604_v19 = vadd.f32 %v4155_v41, %v3956_v49  ;;  %v10631_v49 = vpop.permute.xlu0 %4693 }
 0x54f   : > { %v4315_v43 = vpop.f32.mrf.mxu0 }
 0x550   : > { %v4334_v52 = vpop.f32.mrf.mxu1  ;;  %v4420_v48 = vadd.f32 %v4315_v43, %v10542_v35  ;;  %v6447_v43 = vld [vmem:[%s6797_s15] sm:$0xff] }
 0x551   : > { %v10606_v0 = vpop.f32.mrf.mxu3  ;;  %v4421_v1 = vadd.f32 %v4334_v52, %v10538_v9 }
 0x554   : > { %v10608_v57 = vpop.f32.mrf.mxu2 }
 0x555   : > { %v10648_v18 = vpop.permute.xlu0 %4708 }
 0x557   : > { %v4317_v40 = vpop.f32.mrf.mxu0 }
 0x558   : > { %v4336_v24 = vpop.f32.mrf.mxu1  ;;  %v4426_v41 = vadd.f32 %v4317_v40, %v10548_v20 }
 0x559   : > { %v10610_v25 = vpop.f32.mrf.mxu3  ;;  %v4427_v53 = vadd.f32 %v4336_v24, %v10546_v22 }
 0x55c   : > { %v10612_v12 = vpop.f32.mrf.mxu2 }
 0x55f   : > { %v4320_v37 = vpop.f32.mrf.mxu0 }
 0x560   : > { %v4339_v58 = vpop.f32.mrf.mxu1 }
 0x561   : > { %v10614_v46 = vpop.f32.mrf.mxu3  ;;  %v4433_v40 = vadd.f32 %v4339_v58, %v10554_v8 }
 0x564   : > { %v10616_v11 = vpop.f32.mrf.mxu2 }
 0x567   : > { %v10618_v26 = vpop.f32.mrf.mxu0 }
 0x568   : > { %v4341_v59 = vpop.f32.mrf.mxu1 }
 0x569   : > { %v10620_v45 = vpop.f32.mrf.mxu3 }
 0x56c   : > { %v10624_v31 = vpop.f32.mrf.mxu2 }
 0x56f   : > { %v10627_v33 = vpop.f32.mrf.mxu0 }
 0x570   : > { %v10629_v17 = vpop.f32.mrf.mxu1 }
 0x571   : > { %v4577_v10 = vpop.f32.mrf.mxu3 }
 0x572   : > { %v4664_v13 = vadd.f32 %v4577_v10, %v4421_v1  ;;  %v10658_v1 = vpop.permute.xlu2 %4746 }
 0x574   : > { %v4712_v21 = vmul.f32 %v10631_v49, %v4664_v13  ;;  %v4558_v29 = vpop.f32.mrf.mxu2 }
 0x575   : > { %v4663_v47 = vadd.f32 %v4558_v29, %v4420_v48 }
 0x576   : > { %v4760_v9 = vadd.f32 %v10637_v54, %v4712_v21  ;;  %v6448_v21 = vld [vmem:[%s6797_s15 + $0x38] sm:$0xff] }
 0x577   : > { %v4711_v55 = vmul.f32 %v10631_v49, %v4663_v47  ;;  %v10643_v7 = vpop.f32.mrf.mxu0 }
 0x578   : > { %v4784_v15 = vadd.f32 %v6446_v56, %v4760_v9  ;;  %v10645_v62 = vpop.f32.mrf.mxu1 }
 0x579   : > { %v4759_v35 = vadd.f32 %v10637_v54, %v4711_v55  ;;  %v4579_v60 = vpop.f32.mrf.mxu3 }
 0x57a   : > { %v4808_v27 = vmax.f32 %v4784_v15, 0.0  ;;  %v4670_v14 = vadd.f32 %v4579_v60, %v4427_v53  ;;  %v6449_v60 = vld [vmem:[%s6797_s15 + $0x30] sm:$0xff] }
 0x57b   : > { %v4783_v52 = vadd.f32 %v6447_v43, %v4759_v35  ;;  %v4432_v35 = vadd.f32 %v4320_v37, %v10558_v39  ;;  %v6450_v39 = vld [vmem:[%s6797_s15 + $0x68] sm:$0xff] }
 0x57c   : > { %4832 = vst [vmem:[%s10654_s20 + $0x8] sm:$0xff] %v4808_v27  ;;  %v4718_v22 = vmul.f32 %v10622_v44, %v4670_v14  ;;  %v4560_v24 = vpop.f32.mrf.mxu2  ;;  %v10674_v14 = vpop.permute.xlu0 %4751 }
 0x57d   : > { %v4807_v10 = vmax.f32 %v4783_v52, 0.0  ;;  %v4669_v13 = vadd.f32 %v4560_v24, %v4426_v41  ;;  %v4439_v24 = vadd.f32 %v4341_v59, %v10562_v36 }
 0x57e   : > { %v4766_v48 = vadd.f32 %v10658_v1, %v4718_v22 }
 0x57f   : > { %4831 = vst [vmem:[%s10654_s20] sm:$0xff] %v4807_v10  ;;  %v4717_v20 = vmul.f32 %v10622_v44, %v4669_v13  ;;  %v10665_v47 = vpop.f32.mrf.mxu0 }
 0x580   : > { %v4790_v29 = vadd.f32 %v6448_v21, %v4766_v48  ;;  %v10667_v9 = vpop.f32.mrf.mxu1 }
 0x581   : > { %v4765_v55 = vadd.f32 %v10658_v1, %v4717_v20  ;;  %v4582_v53 = vpop.f32.mrf.mxu3 }
 0x582   : > { %v4814_v56 = vmax.f32 %v4790_v29, 0.0  ;;  %v4676_v15 = vadd.f32 %v4582_v53, %v4433_v40  ;;  %v4438_v29 = vadd.f32 %v10618_v26, %v10564_v42  ;;  %v4425_v26 = vadd.f32 %v10629_v17, %v10572_v3 }
 0x583   : > { %v4789_v27 = vadd.f32 %v6449_v60, %v4765_v55  ;;  %v6451_v55 = vld [vmem:[%s6797_s15 + $0x60] sm:$0xff] }
 0x584   : > { %4838 = vst [vmem:[%s10654_s20 + $0x38] sm:$0xff] %v4814_v56  ;;  %v4724_v8 = vmul.f32 %v10633_v50, %v4676_v15  ;;  %v4563_v58 = vpop.f32.mrf.mxu2  ;;  %v10691_v56 = vpop.permute.xlu1 %4756 }
 0x585   : > { %v4813_v41 = vmax.f32 %v4789_v27, 0.0  ;;  %v4675_v43 = vadd.f32 %v4563_v58, %v4432_v35  ;;  %v4423_v27 = vadd.f32 %v10606_v0, %v10570_v61  ;;  %v6452_v58 = vld [vmem:[%s6797_s15 + $0x98] sm:$0xff] }
 0x586   : > { %v4772_v52 = vadd.f32 %v10674_v14, %v4724_v8  ;;  %v4422_v8 = vadd.f32 %v10608_v57, %v10567_v51  ;;  %v4424_v51 = vadd.f32 %v10627_v33, %v10574_v34  ;;  %v6453_v57 = vld [vmem:[%s6797_s15 + $0x90] sm:$0xff]  ;;  %v4428_v33 = vadd.f32 %v10612_v12, %v10577_v6 }
 0x587   : > { %4837 = vst [vmem:[%s10654_s20 + $0x30] sm:$0xff] %v4813_v41  ;;  %v4723_v22 = vmul.f32 %v10633_v50, %v4675_v43  ;;  %v10681_v10 = vpop.f32.mrf.mxu0 }
 0x588   : > { %v4796_v37 = vadd.f32 %v6450_v39, %v4772_v52  ;;  %v10683_v13 = vpop.f32.mrf.mxu1 }
 0x589   : > { %v4771_v48 = vadd.f32 %v10674_v14, %v4723_v22  ;;  %v4584_v20 = vpop.f32.mrf.mxu3 }
 0x58a   : > { %v4820_v40 = vmax.f32 %v4796_v37, 0.0  ;;  %v4682_v21 = vadd.f32 %v4584_v20, %v4439_v24 }
 0x58b   : > { %v4795_v53 = vadd.f32 %v6451_v55, %v4771_v48 }
 0x58c   : > { %4844 = vst [vmem:[%s10654_s20 + $0x68] sm:$0xff] %v4820_v40  ;;  %v4730_v36 = vmul.f32 %v10648_v18, %v4682_v21  ;;  %v4565_v59 = vpop.f32.mrf.mxu2 }
 0x58d   : > { %v4819_v15 = vmax.f32 %v4795_v53, 0.0  ;;  %v4681_v35 = vadd.f32 %v4565_v59, %v4438_v29 }
 0x58e   : > { %v4778_v60 = vadd.f32 %v10691_v56, %v4730_v36  ;;  %v6454_v36 = vld [vmem:[%s6797_s15 + $0x10] sm:$0xff] }
 0x58f   : > { %4843 = vst [vmem:[%s10654_s20 + $0x60] sm:$0xff] %v4819_v15  ;;  %v4729_v42 = vmul.f32 %v10648_v18, %v4681_v35  ;;  %v4596_v43 = vpop.f32.mrf.mxu0  ;;  %v6455_v15 = vld [vmem:[%s6797_s15 + $0x18] sm:$0xff] }
 0x590   : > { %v4802_v41 = vadd.f32 %v6452_v58, %v4778_v60  ;;  %v4615_v52 = vpop.f32.mrf.mxu1  ;;  %v4665_v24 = vadd.f32 %v4596_v43, %v4422_v8  ;;  %v4431_v8 = vadd.f32 %v10645_v62, %v10582_v2  ;;  %v6457_v2 = vld [vmem:[%s6797_s15 + $0x20] sm:$0xff] }
 0x591   : > { %v4777_v22 = vadd.f32 %v10691_v56, %v4729_v42  ;;  %v4666_v39 = vadd.f32 %v4615_v52, %v4423_v27  ;;  %v4653_v61 = vpop.f32.mrf.mxu3  ;;  %v4429_v27 = vadd.f32 %v10610_v25, %v10580_v30  ;;  %v6456_v42 = vld [vmem:[%s6797_s15 + $0x28] sm:$0xff]  ;;  %v4430_v30 = vadd.f32 %v10643_v7, %v10584_v16 }
 0x592   : > { %v4826_v0 = vmax.f32 %v4802_v41, 0.0  ;;  %v4668_v37 = vadd.f32 %v4653_v61, %v4425_v26  ;;  %v4713_v17 = vmul.f32 %v10631_v49, %v4665_v24 }
 0x593   : > { %v4801_v3 = vadd.f32 %v6453_v57, %v4777_v22  ;;  %v4714_v48 = vmul.f32 %v10631_v49, %v4666_v39 }
 0x594   : > { %4850 = vst [vmem:[%s10654_s20 + $0x98] sm:$0xff] %v4826_v0  ;;  %v4716_v20 = vmul.f32 %v10631_v49, %v4668_v37  ;;  %v4634_v40 = vpop.f32.mrf.mxu2  ;;  %v4761_v29 = vadd.f32 %v10637_v54, %v4713_v17  ;;  %v4434_v17 = vadd.f32 %v10616_v11, %v10587_v23 }
 0x595   : > { %v4825_v21 = vmax.f32 %v4801_v3, 0.0  ;;  %v4762_v55 = vadd.f32 %v10637_v54, %v4714_v48  ;;  %v4667_v53 = vadd.f32 %v4634_v40, %v4424_v51  ;;  %v4435_v3 = vadd.f32 %v10614_v46, %v10590_v63  ;;  %v6458_v48 = vld [vmem:[%s6797_s15 + $0x40] sm:$0xff] }
 0x596   : > { %v4764_v34 = vadd.f32 %v10637_v54, %v4716_v20  ;;  %v4785_v59 = vadd.f32 %v6454_v36, %v4761_v29  ;;  %v6459_v29 = vld [vmem:[%s6797_s15 + $0x48] sm:$0xff] }
 0x597   : > { %4849 = vst [vmem:[%s10654_s20 + $0x90] sm:$0xff] %v4825_v21  ;;  %v4786_v35 = vadd.f32 %v6455_v15, %v4762_v55  ;;  %v4715_v60 = vmul.f32 %v10631_v49, %v4667_v53  ;;  %v4598_v58 = vpop.f32.mrf.mxu0  ;;  %v4437_v21 = vadd.f32 %v10667_v9, %v10592_v4  ;;  %v6460_v53 = vld [vmem:[%s6797_s15 + $0x58] sm:$0xff]  ;;  %v4436_v4 = vadd.f32 %v10665_v47, %v10594_v32  ;;  %v6461_v9 = vld [vmem:[%s6797_s15 + $0x50] sm:$0xff] }
 0x598   : > { %v4788_v26 = vadd.f32 %v6456_v42, %v4764_v34  ;;  %v4617_v6 = vpop.f32.mrf.mxu1  ;;  %v4809_v12 = vmax.f32 %v4785_v59, 0.0  ;;  %v4671_v52 = vadd.f32 %v4598_v58, %v4428_v33 }
 0x599   : > { %v4810_v41 = vmax.f32 %v4786_v35, 0.0  ;;  %v4763_v43 = vadd.f32 %v10637_v54, %v4715_v60  ;;  %v4655_v49 = vpop.f32.mrf.mxu3  ;;  %v4672_v24 = vadd.f32 %v4617_v6, %v4429_v27 }
 0x59a   : > { %v4812_v22 = vmax.f32 %v4788_v26, 0.0  ;;  %v4674_v39 = vadd.f32 %v4655_v49, %v4431_v8  ;;  %4833 = vst [vmem:[%s10654_s20 + $0x10] sm:$0xff] %v4809_v12  ;;  %v4719_v62 = vmul.f32 %v10622_v44, %v4671_v52  ;;  %v4440_v12 = vadd.f32 %v10624_v31, %v10597_v38  ;;  %v6463_v52 = vld [vmem:[%s6797_s15 + $0x78] sm:$0xff] }
 0x59b   : > { %v4787_v25 = vadd.f32 %v6457_v2, %v4763_v43  ;;  %4834 = vst [vmem:[%s10654_s20 + $0x18] sm:$0xff] %v4810_v41  ;;  %v4720_v61 = vmul.f32 %v10622_v44, %v4672_v24  ;;  %v6462_v41 = vld [vmem:[%s6797_s15 + $0x70] sm:$0xff]  ;;  %v4441_v24 = vadd.f32 %v10620_v45, %v10600_v28  ;;  %v4442_v45 = vadd.f32 %v10681_v10, %v10604_v19 }
 0x59c   : > { %v4722_v54 = vmul.f32 %v10622_v44, %v4674_v39  ;;  %v4636_v0 = vpop.f32.mrf.mxu2  ;;  %4836 = vst [vmem:[%s10654_s20 + $0x28] sm:$0xff] %v4812_v22  ;;  %v4767_v51 = vadd.f32 %v10658_v1, %v4719_v62  ;;  %v4443_v39 = vadd.f32 %v10683_v13, %v10602_v5  ;;  %v6465_v5 = vld [vmem:[%s6797_s15 + $0x80] sm:$0xff] }
 0x59d   : > { %v4811_v37 = vmax.f32 %v4787_v25, 0.0  ;;  %v4673_v16 = vadd.f32 %v4636_v0, %v4430_v30  ;;  %v4768_v7 = vadd.f32 %v10658_v1, %v4720_v61  ;;  %v6464_v30 = vld [vmem:[%s6797_s15 + $0x88] sm:$0xff] }
 0x59e   : > { %v4770_v57 = vadd.f32 %v10658_v1, %v4722_v54  ;;  %v4791_v20 = vadd.f32 %v6458_v48, %v4767_v51  ;;  %v6466_v48 = vld [vmem:[%s6797_s15 + $0xa0] sm:$0xff] }
 0x59f   : > { %4835 = vst [vmem:[%s10654_s20 + $0x20] sm:$0xff] %v4811_v37  ;;  %v4721_v40 = vmul.f32 %v10622_v44, %v4673_v16  ;;  %v4792_v55 = vadd.f32 %v6459_v29, %v4768_v7  ;;  %v4601_v33 = vpop.f32.mrf.mxu0 }
 0x5a0   : > { %v4794_v34 = vadd.f32 %v6460_v53, %v4770_v57  ;;  %v4620_v63 = vpop.f32.mrf.mxu1  ;;  %v4815_v46 = vmax.f32 %v4791_v20, 0.0  ;;  %v4677_v11 = vadd.f32 %v4601_v33, %v4434_v17 }
 0x5a1   : > { %v4769_v23 = vadd.f32 %v10658_v1, %v4721_v40  ;;  %v4678_v36 = vadd.f32 %v4620_v63, %v4435_v3  ;;  %v4658_v59 = vpop.f32.mrf.mxu3  ;;  %v4816_v44 = vmax.f32 %v4792_v55, 0.0  ;;  %v6468_v55 = vld [vmem:[%s6797_s15 + $0xb8] sm:$0xff] }
 0x5a2   : > { %v4818_v15 = vmax.f32 %v4794_v34, 0.0  ;;  %v4680_v35 = vadd.f32 %v4658_v59, %v4437_v21  ;;  %4839 = vst [vmem:[%s10654_s20 + $0x40] sm:$0xff] %v4815_v46  ;;  %v4725_v27 = vmul.f32 %v10633_v50, %v4677_v11  ;;  %v6467_v21 = vld [vmem:[%s6797_s15 + $0xa8] sm:$0xff] }
 0x5a3   : > { %v4793_v60 = vadd.f32 %v6461_v9, %v4769_v23  ;;  %v4726_v1 = vmul.f32 %v10633_v50, %v4678_v36  ;;  %4840 = vst [vmem:[%s10654_s20 + $0x48] sm:$0xff] %v4816_v44 }
 0x5a4   : > { %v4728_v8 = vmul.f32 %v10633_v50, %v4680_v35  ;;  %v4639_v42 = vpop.f32.mrf.mxu2  ;;  %4842 = vst [vmem:[%s10654_s20 + $0x58] sm:$0xff] %v4818_v15  ;;  %v4773_v58 = vadd.f32 %v10674_v14, %v4725_v27 }
 0x5a5   : > { %v4817_v26 = vmax.f32 %v4793_v60, 0.0  ;;  %v4774_v32 = vadd.f32 %v10674_v14, %v4726_v1  ;;  %v4679_v47 = vadd.f32 %v4639_v42, %v4436_v4 }
 0x5a6   : > { %v4776_v6 = vadd.f32 %v10674_v14, %v4728_v8  ;;  %v4797_v43 = vadd.f32 %v6462_v41, %v4773_v58 }
 0x5a7   : > { %4841 = vst [vmem:[%s10654_s20 + $0x50] sm:$0xff] %v4817_v26  ;;  %v4798_v49 = vadd.f32 %v6463_v52, %v4774_v32  ;;  %v4727_v22 = vmul.f32 %v10633_v50, %v4679_v47  ;;  %v4603_v25 = vpop.f32.mrf.mxu0 }
 0x5a8   : > { %v4800_v2 = vadd.f32 %v6464_v30, %v4776_v6  ;;  %v4622_v38 = vpop.f32.mrf.mxu1  ;;  %v4821_v31 = vmax.f32 %v4797_v43, 0.0  ;;  %v4683_v50 = vadd.f32 %v4603_v25, %v4440_v12 }
 0x5a9   : > { %v4822_v62 = vmax.f32 %v4798_v49, 0.0  ;;  %v4775_v61 = vadd.f32 %v10674_v14, %v4727_v22  ;;  %v4660_v54 = vpop.f32.mrf.mxu3  ;;  %v4684_v37 = vadd.f32 %v4622_v38, %v4441_v24 }
 0x5aa   : > { %v4824_v0 = vmax.f32 %v4800_v2, 0.0  ;;  %v4686_v28 = vadd.f32 %v4660_v54, %v4443_v39  ;;  %4845 = vst [vmem:[%s10654_s20 + $0x70] sm:$0xff] %v4821_v31  ;;  %v4731_v51 = vmul.f32 %v10648_v18, %v4683_v50 }
 0x5ab   : > { %v4799_v13 = vadd.f32 %v6465_v5, %v4775_v61  ;;  %4846 = vst [vmem:[%s10654_s20 + $0x78] sm:$0xff] %v4822_v62  ;;  %v4732_v14 = vmul.f32 %v10648_v18, %v4684_v37 }
 0x5ac   : > { %v4734_v16 = vmul.f32 %v10648_v18, %v4686_v28  ;;  %v4641_v7 = vpop.f32.mrf.mxu2  ;;  %4848 = vst [vmem:[%s10654_s20 + $0x88] sm:$0xff] %v4824_v0  ;;  %v4779_v19 = vadd.f32 %v10691_v56, %v4731_v51 }
 0x5ad   : > { %v4823_v57 = vmax.f32 %v4799_v13, 0.0  ;;  %v4685_v10 = vadd.f32 %v4641_v7, %v4442_v45  ;;  %v4780_v3 = vadd.f32 %v10691_v56, %v4732_v14 }
 0x5ae   : > { %v4782_v17 = vadd.f32 %v10691_v56, %v4734_v16  ;;  %v4803_v20 = vadd.f32 %v6466_v48, %v4779_v19 }
 0x5af   : > { %4847 = vst [vmem:[%s10654_s20 + $0x80] sm:$0xff] %v4823_v57  ;;  %v4733_v40 = vmul.f32 %v10648_v18, %v4685_v10  ;;  %v4804_v29 = vadd.f32 %v6467_v21, %v4780_v3  ;;  %v6469_v18 = vld [vmem:[%s6797_s15 + $0xb0] sm:$0xff] }
 0x5b0   : > { %v4806_v53 = vadd.f32 %v6468_v55, %v4782_v17  ;;  %v4827_v34 = vmax.f32 %v4803_v20, 0.0 }
 0x5b1   : > { %v4781_v33 = vadd.f32 %v10691_v56, %v4733_v40  ;;  %v4828_v63 = vmax.f32 %v4804_v29, 0.0 }
 0x5b2   : > { %v4830_v46 = vmax.f32 %v4806_v53, 0.0  ;;  %4851 = vst [vmem:[%s10654_s20 + $0xa0] sm:$0xff] %v4827_v34 }
 0x5b3   : > { %v4805_v23 = vadd.f32 %v6469_v18, %v4781_v33  ;;  %4852 = vst [vmem:[%s10654_s20 + $0xa8] sm:$0xff] %v4828_v63 }
 0x5b4   : > { %4854 = vst [vmem:[%s10654_s20 + $0xb8] sm:$0xff] %v4830_v46 }
 0x5b5   : > { %v4829_v11 = vmax.f32 %v4805_v23, 0.0 }
 0x5b7   : > { %4853 = vst [vmem:[%s10654_s20 + $0xb0] sm:$0xff] %v4829_v11 }
 0x5b8   : > { %6587 = shalt.err (!%p6584_p10)
}
 0x5b9   : > { %s6648_s29 = smov 768   ;;  %s6649_s11 = smov 3072  }
 0x5ba   : > { %s6650_s16 = smov 48  }
 0x5bb   : > { %5385 = dma.vmem_to_hbm [thread:$0]  (%p6761_p0), %s4869_s13, 3072, %s4871_s10, %s4856_s22, %s6648_s29, %s6649_s11, %s6650_s16  }
 0x5bc PF: > { %p5407_p11 = scmp.ge.s32.totalorder %s6630_s30, 2  ;;  %s4885_s20 = sand.u32 1, %s6618_s27  }
 0x5bd   : > { %s4886_s1 = scalar_lea.sflag [#allocation4], %s4885_s20 }
 0x5be   : > { %p5399_p12 = pnand %p5407_p11, %p6731_p6 }
 0x5c0   : > { %p5400_p13 = pneg %p5399_p12 }
 0x5c2   : > { %6613 = dma.done.wait (%p5400_p13), %s4886_s1, 3072  }
 0x5c3   : > { %6615 = vsyncadd (%p5400_p13), %s4886_s1, 4294964224  ;;  %s10965_s9 = sld [smem:[#allocation12_spill]]  ;;  %p22_p3 = scmp.ge.s32.totalorder %s6751_s26, 6  }
 0x5c4   : > { %s10966_s29 = sld [smem:[#allocation13_spill]]  ;;  %s10967_s27 = smov %s6622_s28 }
 0x5c5   : > { %s10969_s30 = smov %s6751_s26  ;;  %24 = sbr.rel (!%p22_p3) target bundleno = 9 (0x9), region = 121 }
 0x5c9   : > { %s10968_s28 = smov %s10965_s9 }
 0x5ca   :  { %4892 = vsyncpa [#allocation3], 1 }
 0x5cb   :  { %4894 = vsyncpa [#allocation3 + $0x1], 1 }
 0x5cc   :  { %4895 = vsyncpa [#allocation6], 1 }
 0x5cd   :  { %4896 = vsyncpa [#allocation4], 1 }
 0x5ce   :  { %4898 = vsyncpa [#allocation4 + $0x1], 1 }

</bundles_post_ra>
